<compile_context>
chip_gen: v6e
topology: v6e:2x2x1
jax: 0.10.0
libtpu: 0.0.40
codegen_flags: <defaults>
</compile_context>

<pallas_src>
import jax
import jax.numpy as jnp
from jax.experimental import pallas as pl
from jax.experimental.pallas import tpu as pltpu

# Logical (PyTorch) layer dims and padded kernel dims (latent 64 -> 128 so no
# intermediate activation has lane width < 128; pads are zeros -> math exact).
LOGICAL_DIMS = [784, 256, 128, 64, 128, 256, 784]
PADDED_DIMS = [784, 256, 128, 128, 128, 256, 784]
NUM_LAYERS = 6
BIAS_ROWS = 8  # 6 bias rows padded to a sublane multiple


# ----------------------------------------------------------------------------
# Kernel: fused 6-layer MLP forward
# ----------------------------------------------------------------------------
def mnist_ae_kernel(x_ref, w1, w2, w3, w4, w5, w6, b_ref, o_ref):
    weights = (w1, w2, w3, w4, w5, w6)
    h = x_ref[...]                                   # bf16 [tm, 784]
    for li in range(NUM_LAYERS):
        out_dim = PADDED_DIMS[li + 1]
        # bf16 x bf16 MXU matmul with f32 accumulation.
        acc = jnp.dot(h, weights[li][...], preferred_element_type=jnp.float32)
        # f32 bias add (row li of the packed bias block, static slices).
        acc = acc + b_ref[li:li + 1, :out_dim]
        if li < NUM_LAYERS - 1:
            # ReLU on the f32 accumulator, then bf16 for the next MXU matmul.
            h = jnp.maximum(acc, 0.0).astype(jnp.bfloat16)
        else:
            # output_layer: no ReLU; single f32->bf16 cast at the store.
            o_ref[...] = acc.astype(o_ref.dtype)


# ----------------------------------------------------------------------------
# Wrapper
# ----------------------------------------------------------------------------
def _pick_batch_tile(B):
    """Largest tile with >= 4 grid steps (pipeline + 2 steps/core on v7x),
    else >= 2 steps, else one tile covering the whole (sublane-padded) batch."""
    for min_steps in (4, 2):
        for t in (1024, 512, 256, 128, 64, 32, 16, 8):
            if B >= min_steps * t:
                return t
    return max(8, ((B + 7) // 8) * 8)  # tiny batch: single tile, grid = 1


def mnist_ae_forward(x, kernel_params, *, batch_tile=None, vmem_limit_bytes=None):
    """x: [B, 784] (f32 or bf16).  kernel_params: (weights, bias_packed) from
    pad_params_for_kernel: 6 bf16 [in, out] padded weights + (8, 784) f32 bias
    block (row i = bias of layer i, zero padded)."""
    weights, b_packed = kernel_params
    if x.dtype != jnp.bfloat16:
        x = x.astype(jnp.bfloat16)   # bf16 I/O: halves the dominant HBM streams
    B, d_in = x.shape
    assert d_in == PADDED_DIMS[0], (d_in, PADDED_DIMS[0])

    tm = batch_tile if batch_tile is not None else _pick_batch_tile(B)
    n_tiles = pl.cdiv(B, tm)
    B_pad = n_tiles * tm
    if B_pad != B:
        x = jnp.pad(x, ((0, B_pad - B), (0, 0)))  # zero rows, sliced off below

    # Argument list: x, w1..w6, b_packed.
    flat_args = [x] + list(weights) + [b_packed]
    in_specs = [pl.BlockSpec((tm, PADDED_DIMS[0]), lambda i: (i, 0))]
    param_bytes = 0
    for w in weights:
        # Whole weight as one block with a constant index_map -> resident in
        # VMEM across the grid (never re-fetched from HBM).
        in_specs.append(pl.BlockSpec(w.shape, lambda i: (0, 0)))
        param_bytes += w.size * w.dtype.itemsize
    in_specs.append(pl.BlockSpec(b_packed.shape, lambda i: (0, 0)))
    param_bytes += b_packed.size * b_packed.dtype.itemsize

    out_spec = pl.BlockSpec((tm, PADDED_DIMS[-1]), lambda i: (i, 0))

    flops = 2 * B_pad * sum(PADDED_DIMS[i] * PADDED_DIMS[i + 1] for i in range(NUM_LAYERS))
    bytes_accessed = (B_pad * PADDED_DIMS[0] * 2     # bf16 x
                      + B_pad * PADDED_DIMS[-1] * 2  # bf16 out
                      + param_bytes)

    fn = pl.pallas_call(
        mnist_ae_kernel,
        out_shape=jax.ShapeDtypeStruct((B_pad, PADDED_DIMS[-1]), jnp.bfloat16),
        grid_spec=pltpu.PrefetchScalarGridSpec(
            num_scalar_prefetch=0,
            grid=(n_tiles,),
            in_specs=in_specs,
            out_specs=out_spec,
        ),
        compiler_params=pltpu.CompilerParams(
            dimension_semantics=("parallel",),
            vmem_limit_bytes=vmem_limit_bytes,
        ),
        cost_estimate=pl.CostEstimate(
            flops=flops, transcendentals=0, bytes_accessed=bytes_accessed),
    )
    out = fn(*flat_args)
    return out[:B] if B_pad != B else out


# ----------------------------------------------------------------------------
# Parameters: PyTorch-style init (U(-k, k), k = 1/sqrt(fan_in)), weights stored
# as [in, out] = PyTorch weight transposed.  Padding is zeros, so the padded
# latent columns (post-ReLU) are exactly 0 and meet zero rows of the next
# weight -> math identical to the unpadded model.
# ----------------------------------------------------------------------------
def init_params(key):
    params = []
    for li in range(NUM_LAYERS):
        fan_in, fan_out = LOGICAL_DIMS[li], LOGICAL_DIMS[li + 1]
        key, kw, kb = jax.random.split(key, 3)
        bound = 1.0 / (fan_in ** 0.5)
        w = jax.random.uniform(kw, (fan_in, fan_out), jnp.float32, -bound, bound)
        b = jax.random.uniform(kb, (1, fan_out), jnp.float32, -bound, bound)
        params.append((w, b))
    return params


def pad_params_for_kernel(params):
    weights = []
    b_packed = jnp.zeros((BIAS_ROWS, PADDED_DIMS[-1]), jnp.float32)
    for li, (w, b) in enumerate(params):
        in_p, out_p = PADDED_DIMS[li], PADDED_DIMS[li + 1]
        w_p = jnp.zeros((in_p, out_p), jnp.float32).at[: w.shape[0], : w.shape[1]].set(w)
        weights.append(w_p.astype(jnp.bfloat16))          # bf16 weights
        b_packed = b_packed.at[li, : b.shape[1]].set(b[0])  # f32 biases, packed
    return tuple(weights), b_packed


def reference_forward(x, params):
    # Pure-JAX reference of the same numerics (bf16 matmul inputs, f32 accum,
    # f32 bias/ReLU), on the UNPADDED logical params -> also validates padding.
    h = x.astype(jnp.float32)
    for li, (w, b) in enumerate(params):
        h = jnp.dot(h.astype(jnp.bfloat16), w.astype(jnp.bfloat16),
                    preferred_element_type=jnp.float32) + b
        if li < NUM_LAYERS - 1:
            h = jnp.maximum(h, 0.0)
    return h  # f32; kernel output is this rounded once to bf16


if __name__ == "__main__":
    key = jax.random.PRNGKey(0)
    key, kx = jax.random.split(key)

    params = init_params(key)
    kernel_params = pad_params_for_kernel(params)

    # 4 tiles of 256 rows: pipeline double-buffers, and on v7x each TensorCore
    # gets 2 steps so prefetch/writeback hide under compute.
    B = 1024
    x = jax.random.normal(kx, (B, LOGICAL_DIMS[0]), jnp.float32)

    out = jax.block_until_ready(mnist_ae_forward(x, kernel_params))
    assert out.shape == (B, 784), out.shape
    assert out.dtype == jnp.bfloat16, out.dtype

    ref = reference_forward(x, params)
    err = float(jnp.max(jnp.abs(out.astype(jnp.float32) - ref)))
    assert jnp.allclose(out.astype(jnp.float32), ref, atol=3e-2, rtol=3e-2), \
        f"mismatch vs reference: {err}"

    # Ragged batch (does not divide the tile): exercises the cdiv + pad path.
    B2 = 100
    out2 = jax.block_until_ready(mnist_ae_forward(x[:B2], kernel_params))
    assert out2.shape == (B2, 784), out2.shape
    err2 = float(jnp.max(jnp.abs(out2.astype(jnp.float32) - ref[:B2])))
    assert jnp.allclose(out2.astype(jnp.float32), ref[:B2], atol=3e-2, rtol=3e-2), \
        f"ragged-batch mismatch vs reference: {err2}"

    print("KERNEL_OK")
</pallas_src>

<mosaic_0001>
module attributes {stable_mosaic.version = 11 : i64} {
  func.func @mnist_ae_kernel(%arg0: i32, %arg1: memref<256x784xbf16, #tpu.memory_space<vmem>>, %arg2: memref<784x256xbf16, #tpu.memory_space<vmem>>, %arg3: memref<256x128xbf16, #tpu.memory_space<vmem>>, %arg4: memref<128x128xbf16, #tpu.memory_space<vmem>>, %arg5: memref<128x128xbf16, #tpu.memory_space<vmem>>, %arg6: memref<128x256xbf16, #tpu.memory_space<vmem>>, %arg7: memref<256x784xbf16, #tpu.memory_space<vmem>>, %arg8: memref<8x784xf32, #tpu.memory_space<vmem>>, %arg9: memref<256x784xbf16, #tpu.memory_space<vmem>>) attributes {dimension_semantics = [#tpu.dimension_semantics<parallel>], iteration_bounds = array<i64: 4>, scalar_prefetch = 0 : i64, scratch_operands = 0 : i64, tpu.core_type = #tpu.core_type<tc>, window_params = [{transform_indices = @transform_0, window_bounds = array<i64: 256, 784>}, {pipeline_mode = #tpu.pipeline_mode<synchronous>, transform_indices = @transform_1, window_bounds = array<i64: 784, 256>}, {pipeline_mode = #tpu.pipeline_mode<synchronous>, transform_indices = @transform_2, window_bounds = array<i64: 256, 128>}, {pipeline_mode = #tpu.pipeline_mode<synchronous>, transform_indices = @transform_3, window_bounds = array<i64: 128, 128>}, {pipeline_mode = #tpu.pipeline_mode<synchronous>, transform_indices = @transform_4, window_bounds = array<i64: 128, 128>}, {pipeline_mode = #tpu.pipeline_mode<synchronous>, transform_indices = @transform_5, window_bounds = array<i64: 128, 256>}, {pipeline_mode = #tpu.pipeline_mode<synchronous>, transform_indices = @transform_6, window_bounds = array<i64: 256, 784>}, {pipeline_mode = #tpu.pipeline_mode<synchronous>, transform_indices = @transform_7, window_bounds = array<i64: 8, 784>}, {transform_indices = @transform_8, window_bounds = array<i64: 256, 784>}]} {
    %c0 = arith.constant 0 : index
    %c0_0 = arith.constant 0 : index
    %0 = vector.load %arg1[%c0, %c0_0] : memref<256x784xbf16, #tpu.memory_space<vmem>>, vector<256x784xbf16>
    %c0_1 = arith.constant 0 : index
    %c0_2 = arith.constant 0 : index
    %1 = vector.load %arg2[%c0_1, %c0_2] : memref<784x256xbf16, #tpu.memory_space<vmem>>, vector<784x256xbf16>
    %cst = arith.constant dense<0.000000e+00> : vector<256x256xf32>
    %2 = tpu.matmul %0, %1, %cst {dimension_numbers = #tpu.dot_dimension_numbers<[1], [0], [0], [1], [0, 0, 1, 1], [], []>} : vector<256x784xbf16>, vector<784x256xbf16>, vector<256x256xf32> -> vector<256x256xf32>
    %c0_3 = arith.constant 0 : index
    %c0_4 = arith.constant 0 : index
    %3 = vector.load %arg8[%c0_3, %c0_4] : memref<8x784xf32, #tpu.memory_space<vmem>>, vector<1x256xf32>
    %4 = vector.broadcast %3 : vector<1x256xf32> to vector<256x256xf32>
    %5 = arith.addf %2, %4 : vector<256x256xf32>
    %cst_5 = arith.constant 0.000000e+00 : f32
    %6 = vector.broadcast %cst_5 : f32 to vector<256x256xf32>
    %7 = arith.maximumf %5, %6 : vector<256x256xf32>
    %8 = arith.truncf %7 : vector<256x256xf32> to vector<256x256xbf16>
    %c0_6 = arith.constant 0 : index
    %c0_7 = arith.constant 0 : index
    %9 = vector.load %arg3[%c0_6, %c0_7] : memref<256x128xbf16, #tpu.memory_space<vmem>>, vector<256x128xbf16>
    %cst_8 = arith.constant dense<0.000000e+00> : vector<256x128xf32>
    %10 = tpu.matmul %8, %9, %cst_8 {dimension_numbers = #tpu.dot_dimension_numbers<[1], [0], [0], [1], [0, 0, 1, 1], [], []>} : vector<256x256xbf16>, vector<256x128xbf16>, vector<256x128xf32> -> vector<256x128xf32>
    %c1 = arith.constant 1 : index
    %c0_9 = arith.constant 0 : index
    %11 = vector.load %arg8[%c1, %c0_9] : memref<8x784xf32, #tpu.memory_space<vmem>>, vector<1x128xf32>
    %12 = vector.broadcast %11 : vector<1x128xf32> to vector<256x128xf32>
    %13 = arith.addf %10, %12 : vector<256x128xf32>
    %cst_10 = arith.constant 0.000000e+00 : f32
    %14 = vector.broadcast %cst_10 : f32 to vector<256x128xf32>
    %15 = arith.maximumf %13, %14 : vector<256x128xf32>
    %16 = arith.truncf %15 : vector<256x128xf32> to vector<256x128xbf16>
    %c0_11 = arith.constant 0 : index
    %c0_12 = arith.constant 0 : index
    %17 = vector.load %arg4[%c0_11, %c0_12] : memref<128x128xbf16, #tpu.memory_space<vmem>>, vector<128x128xbf16>
    %cst_13 = arith.constant dense<0.000000e+00> : vector<256x128xf32>
    %18 = tpu.matmul %16, %17, %cst_13 {dimension_numbers = #tpu.dot_dimension_numbers<[1], [0], [0], [1], [0, 0, 1, 1], [], []>} : vector<256x128xbf16>, vector<128x128xbf16>, vector<256x128xf32> -> vector<256x128xf32>
    %c2 = arith.constant 2 : index
    %c0_14 = arith.constant 0 : index
    %19 = vector.load %arg8[%c2, %c0_14] : memref<8x784xf32, #tpu.memory_space<vmem>>, vector<1x128xf32>
    %20 = vector.broadcast %19 : vector<1x128xf32> to vector<256x128xf32>
    %21 = arith.addf %18, %20 : vector<256x128xf32>
    %cst_15 = arith.constant 0.000000e+00 : f32
    %22 = vector.broadcast %cst_15 : f32 to vector<256x128xf32>
    %23 = arith.maximumf %21, %22 : vector<256x128xf32>
    %24 = arith.truncf %23 : vector<256x128xf32> to vector<256x128xbf16>
    %c0_16 = arith.constant 0 : index
    %c0_17 = arith.constant 0 : index
    %25 = vector.load %arg5[%c0_16, %c0_17] : memref<128x128xbf16, #tpu.memory_space<vmem>>, vector<128x128xbf16>
    %cst_18 = arith.constant dense<0.000000e+00> : vector<256x128xf32>
    %26 = tpu.matmul %24, %25, %cst_18 {dimension_numbers = #tpu.dot_dimension_numbers<[1], [0], [0], [1], [0, 0, 1, 1], [], []>} : vector<256x128xbf16>, vector<128x128xbf16>, vector<256x128xf32> -> vector<256x128xf32>
    %c3 = arith.constant 3 : index
    %c0_19 = arith.constant 0 : index
    %27 = vector.load %arg8[%c3, %c0_19] : memref<8x784xf32, #tpu.memory_space<vmem>>, vector<1x128xf32>
    %28 = vector.broadcast %27 : vector<1x128xf32> to vector<256x128xf32>
    %29 = arith.addf %26, %28 : vector<256x128xf32>
    %cst_20 = arith.constant 0.000000e+00 : f32
    %30 = vector.broadcast %cst_20 : f32 to vector<256x128xf32>
    %31 = arith.maximumf %29, %30 : vector<256x128xf32>
    %32 = arith.truncf %31 : vector<256x128xf32> to vector<256x128xbf16>
    %c0_21 = arith.constant 0 : index
    %c0_22 = arith.constant 0 : index
    %33 = vector.load %arg6[%c0_21, %c0_22] : memref<128x256xbf16, #tpu.memory_space<vmem>>, vector<128x256xbf16>
    %cst_23 = arith.constant dense<0.000000e+00> : vector<256x256xf32>
    %34 = tpu.matmul %32, %33, %cst_23 {dimension_numbers = #tpu.dot_dimension_numbers<[1], [0], [0], [1], [0, 0, 1, 1], [], []>} : vector<256x128xbf16>, vector<128x256xbf16>, vector<256x256xf32> -> vector<256x256xf32>
    %c4 = arith.constant 4 : index
    %c0_24 = arith.constant 0 : index
    %35 = vector.load %arg8[%c4, %c0_24] : memref<8x784xf32, #tpu.memory_space<vmem>>, vector<1x256xf32>
    %36 = vector.broadcast %35 : vector<1x256xf32> to vector<256x256xf32>
    %37 = arith.addf %34, %36 : vector<256x256xf32>
    %cst_25 = arith.constant 0.000000e+00 : f32
    %38 = vector.broadcast %cst_25 : f32 to vector<256x256xf32>
    %39 = arith.maximumf %37, %38 : vector<256x256xf32>
    %40 = arith.truncf %39 : vector<256x256xf32> to vector<256x256xbf16>
    %c0_26 = arith.constant 0 : index
    %c0_27 = arith.constant 0 : index
    %41 = vector.load %arg7[%c0_26, %c0_27] : memref<256x784xbf16, #tpu.memory_space<vmem>>, vector<256x784xbf16>
    %cst_28 = arith.constant dense<0.000000e+00> : vector<256x784xf32>
    %42 = tpu.matmul %40, %41, %cst_28 {dimension_numbers = #tpu.dot_dimension_numbers<[1], [0], [0], [1], [0, 0, 1, 1], [], []>} : vector<256x256xbf16>, vector<256x784xbf16>, vector<256x784xf32> -> vector<256x784xf32>
    %c5 = arith.constant 5 : index
    %c0_29 = arith.constant 0 : index
    %43 = vector.load %arg8[%c5, %c0_29] : memref<8x784xf32, #tpu.memory_space<vmem>>, vector<1x784xf32>
    %44 = vector.broadcast %43 : vector<1x784xf32> to vector<256x784xf32>
    %45 = arith.addf %42, %44 : vector<256x784xf32>
    %46 = arith.truncf %45 : vector<256x784xf32> to vector<256x784xbf16>
    %c0_30 = arith.constant 0 : index
    %c0_31 = arith.constant 0 : index
    %47 = vector.load %arg9[%c0_30, %c0_31] : memref<256x784xbf16, #tpu.memory_space<vmem>>, vector<256x784xbf16>
    tpu.vector_store %arg9[%c0_30, %c0_31], %46 {strides = array<i32>} : memref<256x784xbf16, #tpu.memory_space<vmem>>, vector<256x784xbf16>,
    return
  }
  func.func @transform_0(%arg0: i32) -> (i32, i32) {
    %c0_i32 = arith.constant 0 : i32
    %c0_i32_0 = arith.constant 0 : i32
    return %arg0, %c0_i32 : i32, i32
  }
  func.func @transform_1(%arg0: i32) -> (i32, i32) {
    %c0_i32 = arith.constant 0 : i32
    %c0_i32_0 = arith.constant 0 : i32
    %c0_i32_1 = arith.constant 0 : i32
    return %c0_i32, %c0_i32_0 : i32, i32
  }
  func.func @transform_2(%arg0: i32) -> (i32, i32) {
    %c0_i32 = arith.constant 0 : i32
    %c0_i32_0 = arith.constant 0 : i32
    %c0_i32_1 = arith.constant 0 : i32
    return %c0_i32, %c0_i32_0 : i32, i32
  }
  func.func @transform_3(%arg0: i32) -> (i32, i32) {
    %c0_i32 = arith.constant 0 : i32
    %c0_i32_0 = arith.constant 0 : i32
    %c0_i32_1 = arith.constant 0 : i32
    return %c0_i32, %c0_i32_0 : i32, i32
  }
  func.func @transform_4(%arg0: i32) -> (i32, i32) {
    %c0_i32 = arith.constant 0 : i32
    %c0_i32_0 = arith.constant 0 : i32
    %c0_i32_1 = arith.constant 0 : i32
    return %c0_i32, %c0_i32_0 : i32, i32
  }
  func.func @transform_5(%arg0: i32) -> (i32, i32) {
    %c0_i32 = arith.constant 0 : i32
    %c0_i32_0 = arith.constant 0 : i32
    %c0_i32_1 = arith.constant 0 : i32
    return %c0_i32, %c0_i32_0 : i32, i32
  }
  func.func @transform_6(%arg0: i32) -> (i32, i32) {
    %c0_i32 = arith.constant 0 : i32
    %c0_i32_0 = arith.constant 0 : i32
    %c0_i32_1 = arith.constant 0 : i32
    return %c0_i32, %c0_i32_0 : i32, i32
  }
  func.func @transform_7(%arg0: i32) -> (i32, i32) {
    %c0_i32 = arith.constant 0 : i32
    %c0_i32_0 = arith.constant 0 : i32
    %c0_i32_1 = arith.constant 0 : i32
    return %c0_i32, %c0_i32_0 : i32, i32
  }
  func.func @transform_8(%arg0: i32) -> (i32, i32) {
    %c0_i32 = arith.constant 0 : i32
    %c0_i32_0 = arith.constant 0 : i32
    return %arg0, %c0_i32 : i32, i32
  }
}

</mosaic_0001>

<bundles_post_ra>
// kernel: tpu_custom_call.1
= control target key start
LH: loop header
LB: loop body
LE: loop exit
PB: predicated region body
PF: predicated region fallthrough
CT: control target
= control target key end

     0   :  { %s7822_s27 = smov 0   ;;  %s10210_s0 = inlined_call_operand.vmem [shape: bf16[1024,784], index: 0, kind: input, shape index: {}]   ;;  %s10211_s1 = inlined_call_operand.vmem [shape: bf16[784,256], index: 1, kind: input, shape index: {}]   ;;  %s10212_s2 = inlined_call_operand.vmem [shape: bf16[256,128], index: 2, kind: input, shape index: {}]   ;;  %s10213_s3 = inlined_call_operand.vmem [shape: bf16[128,128], index: 3, kind: input, shape index: {}]   ;;  %s10214_s4 = inlined_call_operand.vmem [shape: bf16[128,128], index: 4, kind: input, shape index: {}]   ;;  %s10215_s5 = inlined_call_operand.vmem [shape: bf16[128,256], index: 5, kind: input, shape index: {}]   ;;  %s10216_s6 = inlined_call_operand.vmem [shape: bf16[256,784], index: 6, kind: input, shape index: {}]   ;;  %s10217_s7 = inlined_call_operand.vmem [shape: f32[8,784], index: 7, kind: input, shape index: {}]   ;;  %s10218_s8 = inlined_call_operand.vmem [shape: bf16[1024,784], index: 8, kind: output, shape index: {}]  }
   0x1 LB: > { %s6179_s28 = sadd.s32 4294967295, %s7774_s27   ;;  %p6183_p0 = scmp.ge.s32.totalorder %s7774_s27, 1  ;;  %s7774_s27 = sphi %s7822_s27, %s18_s27  }
   0x2   : > { %p264_p1 = scmp.lt.s32.totalorder %s7774_s27, 5 }
   0x4   : > { %p265_p2 = pnand %p6183_p0, %p264_p1 }
   0x6   : > { %268 = sbr.rel (%p265_p2) target bundleno = 1760 (0x6e0), region = 52 }
   0xb   : > { %v7245_v0 = vld [vmem:[%s10211_s1 + $0x74] ss:$8 sps:$4 sm:$0xff]   ;;  %v7247_v1 = vld [vmem:[%s10211_s1 + $0x70] ss:$8 sps:$4 sm:$0xff]   ;;  %v7248_v2 = vld [vmem:[%s10211_s1 + $0x64] ss:$8 sps:$4 sm:$0xff]  }
   0xc   : > { %7203 = vmatprep.subr.bf16.mxu1 %v7245_v0  ;;  %1652 = vmatprep.subr.bf16.mxu0 %v7245_v0  ;;  %v7250_v3 = vld [vmem:[%s10211_s1 + $0x60] ss:$8 sps:$4 sm:$0xff]   ;;  %v7251_v4 = vld [vmem:[%s10211_s1 + $0x54] ss:$8 sps:$4 sm:$0xff]   ;;  %s6184_s17 = sshll.u32 %s6179_s28, 5  ;;  %vm1603_vm0 = vcmask 130048  }
   0xd   : > { %7219 = vmatpush1.bf16.msra.mxu1 %v7247_v1  ;;  %1653 = vmatpush1.bf16.msra.mxu0 %v7247_v1  ;;  %v7253_v5 = vld [vmem:[%s10211_s1 + $0x50] ss:$8 sps:$4 sm:$0xff]   ;;  %p301_p3 = scmp.lt.s32.totalorder %s6184_s17, 127  ;;  %v7254_v6 = vld [vmem:[%s10211_s1 + $0x44] ss:$8 sps:$4 sm:$0xff]   ;;  %vm5995_vm1 = vcmask 125952  }
   0xe   : > { %7204 = vmatprep.subr.bf16.mxu1 %v7248_v2  ;;  %1654 = vmatprep.subr.bf16.mxu0 %v7248_v2  ;;  %v7256_v7 = vld [vmem:[%s10211_s1 + $0x40] ss:$8 sps:$4 sm:$0xff]   ;;  %v7257_v8 = vld [vmem:[%s10211_s1 + $0x34] ss:$8 sps:$4 sm:$0xff]   ;;  %v7259_v9 = vld [vmem:[%s10211_s1 + $0x30] ss:$8 sps:$4 sm:$0xff]  }
   0xf   : > { %s10379_s17 = smov (!%p301_p3, %s6184_s17), 127  ;;  %v7260_v10 = vld [vmem:[%s10211_s1 + $0x24] ss:$8 sps:$4 sm:$0xff]   ;;  %v7262_v11 = vld [vmem:[%s10211_s1 + $0x20] ss:$8 sps:$4 sm:$0xff]  }
  0x10   : > { %s7235_s29 = smul.u32 28, %s10379_s17  ;;  %v7263_v12 = vld [vmem:[%s10211_s1 + $0x14] ss:$8 sps:$4 sm:$0xff]   ;;  %v7265_v14 = vld [vmem:[%s10211_s1 + $0x10] ss:$8 sps:$4 sm:$0xff]  }
  0x11   : > { %7220 = vmatpush1.bf16.msra.mxu1 %v7250_v3  ;;  %1655 = vmatpush1.bf16.msra.mxu0 %v7250_v3  ;;  %v7266_v15 = vld [vmem:[%s10211_s1 + $0x4] ss:$8 sps:$4 sm:$0xff]   ;;  %v7268_v17 = vld [vmem:[%s10211_s1] ss:$8 sps:$4 sm:$0xff]   ;;  %v7269_v18 = vld [vmem:[%s10211_s1 + $0xf4] ss:$8 sps:$4 sm:$0xff]  }
  0x12   : > { %7205 = vmatprep.subr.bf16.mxu1 %v7251_v4  ;;  %1656 = vmatprep.subr.bf16.mxu0 %v7251_v4  ;;  %s7874_s14 = scalar_lea.vmem %s10210_s0, %s7235_s29  ;;  %v7271_v19 = vld [vmem:[%s10211_s1 + $0xf0] ss:$8 sps:$4 sm:$0xff]   ;;  %v7272_v20 = vld [vmem:[%s10211_s1 + $0xe4] ss:$8 sps:$4 sm:$0xff]   ;;  %v7274_v21 = vld [vmem:[%s10211_s1 + $0xe0] ss:$8 sps:$4 sm:$0xff]   ;;  %s9787_s22 = scalar_lea.vmem %s10218_s8, %s7235_s29 }
  0x13   : > { %v7295_v13 = vld [vmem:[%s7874_s14 + $0x1c4] ss:$28 sps:$4 sm:$0xff]   ;;  %v7275_v22 = vld [vmem:[%s10211_s1 + $0xd4] ss:$8 sps:$4 sm:$0xff]   ;;  %v7277_v23 = vld [vmem:[%s10211_s1 + $0xd0] ss:$8 sps:$4 sm:$0xff]  }
  0x14   : > { %1764 = vmatprep.mubr.bf16.mxu1 %v7295_v13  ;;  %v7301_v16 = vld [vmem:[%s7874_s14 + $0x4] ss:$28 sps:$4 sm:$0xff]   ;;  %v7281_v26 = vld [vmem:[%s10211_s1 + $0xb4] ss:$8 sps:$4 sm:$0xff]   ;;  %v7283_v27 = vld [vmem:[%s10211_s1 + $0xb0] ss:$8 sps:$4 sm:$0xff]  }
  0x15   : > { %7221 = vmatpush1.bf16.msra.mxu1 %v7253_v5  ;;  %1657 = vmatpush1.bf16.msra.mxu0 %v7253_v5  ;;  %v7278_v24 = vld [vmem:[%s10211_s1 + $0xc4] ss:$8 sps:$4 sm:$0xff]   ;;  %v7280_v25 = vld [vmem:[%s10211_s1 + $0xc0] ss:$8 sps:$4 sm:$0xff]   ;;  %v7287_v30 = vld [vmem:[%s10211_s1 + $0x94] ss:$8 sps:$4 sm:$0xff]  }
  0x16   : > { %7206 = vmatprep.subr.bf16.mxu1 %v7254_v6  ;;  %1658 = vmatprep.subr.bf16.mxu0 %v7254_v6  ;;  %v7284_v28 = vld [vmem:[%s10211_s1 + $0xa4] ss:$8 sps:$4 sm:$0xff]   ;;  %v7286_v29 = vld [vmem:[%s10211_s1 + $0xa0] ss:$8 sps:$4 sm:$0xff]   ;;  %v7289_v31 = vld [vmem:[%s10211_s1 + $0x90] ss:$8 sps:$4 sm:$0xff]  }
  0x17   : > { %1684 = vmatprep.mubr.bf16.mxu0 %v7301_v16  ;;  %v7290_v32 = vld [vmem:[%s10211_s1 + $0x84] ss:$8 sps:$4 sm:$0xff]   ;;  %v7292_v33 = vld [vmem:[%s10211_s1 + $0x80] ss:$8 sps:$4 sm:$0xff]   ;;  %v7298_v34 = vld [vmem:[%s10211_s1 + $0x174] ss:$8 sps:$4 sm:$0xff]  }
  0x18   : > { %v7293_v35 = vld [vmem:[%s7874_s14 + $0x1c0] ss:$28 sps:$4 sm:$0xff]   ;;  %v7296_v37 = vld [vmem:[%s10211_s1 + $0x170] ss:$8 sps:$4 sm:$0xff]   ;;  %v7307_v40 = vld [vmem:[%s10211_s1 + $0x164] ss:$8 sps:$4 sm:$0xff]  }
  0x19   : > { %7222 = vmatpush1.bf16.msra.mxu1 %v7256_v7  ;;  %1659 = vmatpush1.bf16.msra.mxu0 %v7256_v7  ;;  %v7304_v36 = vld [vmem:[%s10211_s1 + $0x274] ss:$8 sps:$4 sm:$0xff]   ;;  %v7302_v39 = vld [vmem:[%s10211_s1 + $0x270] ss:$8 sps:$4 sm:$0xff]   ;;  %v7310_v41 = vld [vmem:[%s10211_s1 + $0x264] ss:$8 sps:$4 sm:$0xff]  }
  0x1a   : > { %7207 = vmatprep.subr.bf16.mxu1 %v7257_v8  ;;  %1660 = vmatprep.subr.bf16.mxu0 %v7257_v8  ;;  %v7299_v38 = vld [vmem:[%s7874_s14] ss:$28 sps:$4 sm:$0xff]   ;;  %v7313_v47 = vld [vmem:[%s7874_s14 + $0x1f8] ss:$28 sps:$4 sm:$0xff]   ;;  %v7325_v52 = vld [vmem:[%s10211_s1 + $0x144] ss:$8 sps:$4 sm:$0xff]  }
  0x1b   : > { %v7311_v42 = vld [vmem:[%s7874_s14 + $0x1fc] ss:$28 sps:$4 sm:$0xff]   ;;  %v7305_v44 = vld [vmem:[%s10211_s1 + $0x160] ss:$8 sps:$4 sm:$0xff]   ;;  %v7328_v53 = vld [vmem:[%s10211_s1 + $0x244] ss:$8 sps:$4 sm:$0xff]  }
  0x1c   : > { %v7317_v43 = vld [vmem:[%s7874_s14 + $0x3c] ss:$28 sps:$4 sm:$0xff]   ;;  %v7308_v45 = vld [vmem:[%s10211_s1 + $0x260] ss:$8 sps:$4 sm:$0xff]   ;;  %v7329_v54 = vld [vmem:[%s7874_s14 + $0x234] ss:$28 sps:$4 sm:$0xff]  }
  0x1d   : > { %7223 = vmatpush1.bf16.msra.mxu1 %v7259_v9  ;;  %1661 = vmatpush1.bf16.msra.mxu0 %v7259_v9  ;;  %v7316_v46 = vld [vmem:[%s10211_s1 + $0x154] ss:$8 sps:$4 sm:$0xff]   ;;  %v7314_v49 = vld [vmem:[%s10211_s1 + $0x150] ss:$8 sps:$4 sm:$0xff]   ;;  %v7323_v56 = vld [vmem:[%s10211_s1 + $0x140] ss:$8 sps:$4 sm:$0xff]  }
  0x1e   : > { %7208 = vmatprep.subr.bf16.mxu1 %v7260_v10  ;;  %1662 = vmatprep.subr.bf16.mxu0 %v7260_v10  ;;  %v7322_v48 = vld [vmem:[%s10211_s1 + $0x254] ss:$8 sps:$4 sm:$0xff]   ;;  %v7320_v51 = vld [vmem:[%s10211_s1 + $0x250] ss:$8 sps:$4 sm:$0xff]   ;;  %v7326_v57 = vld [vmem:[%s10211_s1 + $0x240] ss:$8 sps:$4 sm:$0xff]  }
  0x1f   : > { %v7319_v50 = vld [vmem:[%s7874_s14 + $0x38] ss:$28 sps:$4 sm:$0xff]   ;;  %v7331_v59 = vld [vmem:[%s7874_s14 + $0x230] ss:$28 sps:$4 sm:$0xff]   ;;  %v7341_v4 = vld [vmem:[%s10211_s1 + $0x120] ss:$8 sps:$4 sm:$0xff]  }
  0x20   : > { %v7335_v55 = vld [vmem:[%s7874_s14 + $0x74] ss:$28 sps:$4 sm:$0xff]   ;;  %v7343_v0 = vld [vmem:[%s10211_s1 + $0x124] ss:$8 sps:$4 sm:$0xff]   ;;  %v7344_v5 = vld [vmem:[%s10211_s1 + $0x220] ss:$8 sps:$4 sm:$0xff]  }
  0x21   : > { %7224 = vmatpush1.bf16.msra.mxu1 %v7262_v11  ;;  %1663 = vmatpush1.bf16.msra.mxu0 %v7262_v11  ;;  %v7334_v58 = vld [vmem:[%s10211_s1 + $0x134] ss:$8 sps:$4 sm:$0xff]   ;;  %v7332_v61 = vld [vmem:[%s10211_s1 + $0x130] ss:$8 sps:$4 sm:$0xff]   ;;  %v7346_v1 = vld [vmem:[%s10211_s1 + $0x224] ss:$8 sps:$4 sm:$0xff]  }
  0x22   : > { %7209 = vmatprep.subr.bf16.mxu1 %v7263_v12  ;;  %1664 = vmatprep.subr.bf16.mxu0 %v7263_v12  ;;  %v7340_v60 = vld [vmem:[%s10211_s1 + $0x234] ss:$8 sps:$4 sm:$0xff]   ;;  %v7337_v62 = vld [vmem:[%s7874_s14 + $0x70] ss:$28 sps:$4 sm:$0xff]   ;;  %v7349_v7 = vld [vmem:[%s7874_s14 + $0x268] ss:$28 sps:$4 sm:$0xff]  }
  0x23   : > { %v7338_v63 = vld [vmem:[%s10211_s1 + $0x230] ss:$8 sps:$4 sm:$0xff]   ;;  %v7347_v2 = vld [vmem:[%s7874_s14 + $0x26c] ss:$28 sps:$4 sm:$0xff]   ;;  %v7352_v6 = vld [vmem:[%s10211_s1 + $0x114] ss:$8 sps:$4 sm:$0xff]  }
  0x24   : > { %v7353_v3 = vld [vmem:[%s7874_s14 + $0xac] ss:$28 sps:$4 sm:$0xff]   ;;  %v7358_v8 = vld [vmem:[%s10211_s1 + $0x214] ss:$8 sps:$4 sm:$0xff]   ;;  %v7350_v9 = vld [vmem:[%s10211_s1 + $0x110] ss:$8 sps:$4 sm:$0xff]  }
  0x25   : > { %7225 = vmatpush1.bf16.msra.mxu1 %v7265_v14  ;;  %1665 = vmatpush1.bf16.msra.mxu0 %v7265_v14  ;;  %v7355_v10 = vld [vmem:[%s7874_s14 + $0xa8] ss:$28 sps:$4 sm:$0xff]   ;;  %v7356_v11 = vld [vmem:[%s10211_s1 + $0x210] ss:$8 sps:$4 sm:$0xff]  }
  0x26   : > { %7210 = vmatprep.subr.bf16.mxu1 %v7266_v15  ;;  %1666 = vmatprep.subr.bf16.mxu0 %v7266_v15  ;;  %v7361_v12 = vld [vmem:[%s10211_s1 + $0x104] ss:$8 sps:$4 sm:$0xff]   ;;  %v7359_v16 = vld [vmem:[%s10211_s1 + $0x100] ss:$8 sps:$4 sm:$0xff]  }
  0x27   : > { %v7364_v13 = vld [vmem:[%s10211_s1 + $0x204] ss:$8 sps:$4 sm:$0xff]  }
  0x28   : > { %v7365_v14 = vld [vmem:[%s7874_s14 + $0x2a4] ss:$28 sps:$4 sm:$0xff]  }
  0x29   : > { %7226 = vmatpush1.bf16.msra.mxu1 %v7268_v17  ;;  %1667 = vmatpush1.bf16.msra.mxu0 %v7268_v17  ;;  %v7371_v15 = vld [vmem:[%s7874_s14 + $0xe4] ss:$28 sps:$4 sm:$0xff]  }
  0x2a   : > { %7211 = vmatprep.subr.bf16.mxu1 %v7269_v18  ;;  %1668 = vmatprep.subr.bf16.mxu0 %v7269_v18  ;;  %v7362_v17 = vld [vmem:[%s10211_s1 + $0x200] ss:$8 sps:$4 sm:$0xff]   ;;  %v7370_v18 = vld [vmem:[%s10211_s1 + $0x1f4] ss:$8 sps:$4 sm:$0xff]  }
  0x2d   : > { %7227 = vmatpush2.bf16.msra.mxu1 %v7271_v19  ;;  %1669 = vmatpush2.bf16.msra.mxu0 %v7271_v19  ;;  %v7367_v19 = vld [vmem:[%s7874_s14 + $0x2a0] ss:$28 sps:$4 sm:$0xff]  }
  0x2e   : > { %7212 = vmatprep.subr.bf16.mxu1 %v7272_v20  ;;  %1670 = vmatprep.subr.bf16.mxu0 %v7272_v20  ;;  %v7376_v20 = vld [vmem:[%s10211_s1 + $0x2f4] ss:$8 sps:$4 sm:$0xff]  }
  0x31   : > { %7228 = vmatpush2.bf16.msra.mxu1 %v7274_v21  ;;  %1671 = vmatpush2.bf16.msra.mxu0 %v7274_v21  ;;  %v7368_v21 = vld [vmem:[%s10211_s1 + $0x1f0] ss:$8 sps:$4 sm:$0xff]  }
  0x32   : > { %7213 = vmatprep.subr.bf16.mxu1 %v7275_v22  ;;  %1672 = vmatprep.subr.bf16.mxu0 %v7275_v22  ;;  %v7373_v22 = vld [vmem:[%s7874_s14 + $0xe0] ss:$28 sps:$4 sm:$0xff]  }
  0x35   : > { %7229 = vmatpush2.bf16.msra.mxu1 %v7277_v23  ;;  %1673 = vmatpush2.bf16.msra.mxu0 %v7277_v23  ;;  %v7374_v23 = vld [vmem:[%s10211_s1 + $0x2f0] ss:$8 sps:$4 sm:$0xff]  }
  0x36   : > { %7214 = vmatprep.subr.bf16.mxu1 %v7278_v24  ;;  %1674 = vmatprep.subr.bf16.mxu0 %v7278_v24  ;;  %v7379_v24 = vld [vmem:[%s10211_s1 + $0x1e4] ss:$8 sps:$4 sm:$0xff]  }
  0x39   : > { %7230 = vmatpush2.bf16.msra.mxu1 %v7280_v25  ;;  %1675 = vmatpush2.bf16.msra.mxu0 %v7280_v25  ;;  %v7382_v25 = vld [vmem:[%s10211_s1 + $0x2e4] ss:$8 sps:$4 sm:$0xff]  }
  0x3a   : > { %7215 = vmatprep.subr.bf16.mxu1 %v7281_v26  ;;  %1676 = vmatprep.subr.bf16.mxu0 %v7281_v26  ;;  %v7383_v26 = vld [vmem:[%s7874_s14 + $0x2dc] ss:$28 sps:$4 sm:$0xff]  }
  0x3d   : > { %7231 = vmatpush2.bf16.msra.mxu1 %v7283_v27  ;;  %1677 = vmatpush2.bf16.msra.mxu0 %v7283_v27  ;;  %v7389_v27 = vld [vmem:[%s7874_s14 + $0x11c] ss:$28 sps:$4 sm:$0xff]  }
  0x3e   : > { %7216 = vmatprep.subr.bf16.mxu1 %v7284_v28  ;;  %1678 = vmatprep.subr.bf16.mxu0 %v7284_v28  ;;  %v7377_v28 = vld [vmem:[%s10211_s1 + $0x1e0] ss:$8 sps:$4 sm:$0xff]  }
  0x41   : > { %7232 = vmatpush2.bf16.msra.mxu1 %v7286_v29  ;;  %1679 = vmatpush2.bf16.msra.mxu0 %v7286_v29  ;;  %v7380_v29 = vld [vmem:[%s10211_s1 + $0x2e0] ss:$8 sps:$4 sm:$0xff]  }
  0x42   : > { %7217 = vmatprep.subr.bf16.mxu1 %v7287_v30  ;;  %1680 = vmatprep.subr.bf16.mxu0 %v7287_v30  ;;  %v7388_v30 = vld [vmem:[%s10211_s1 + $0x1d4] ss:$8 sps:$4 sm:$0xff]  }
  0x45   : > { %7233 = vmatpush2.bf16.msra.mxu1 %v7289_v31  ;;  %1681 = vmatpush2.bf16.msra.mxu0 %v7289_v31  ;;  %v7385_v31 = vld [vmem:[%s7874_s14 + $0x2d8] ss:$28 sps:$4 sm:$0xff]  }
  0x46   : > { %7218 = vmatprep.subr.bf16.mxu1 %v7290_v32  ;;  %1682 = vmatprep.subr.bf16.mxu0 %v7290_v32  ;;  %v7394_v32 = vld [vmem:[%s10211_s1 + $0x2d4] ss:$8 sps:$4 sm:$0xff]  }
  0x49   : > { %7234 = vmatpush2.bf16.msra.mxu1 %v7292_v33  ;;  %1683 = vmatpush2.bf16.msra.mxu0 %v7292_v33  ;;  %v7386_v33 = vld [vmem:[%s10211_s1 + $0x1d0] ss:$8 sps:$4 sm:$0xff]  }
  0x4a   : > { %1845 = vmatprep.subr.bf16.mxu1 %v7298_v34  ;;  %2038 = vmatprep.subr.bf16.mxu0 %v7304_v36  ;;  %v7391_v34 = vld [vmem:[%s7874_s14 + $0x118] ss:$28 sps:$4 sm:$0xff]   ;;  %v7397_v36 = vld [vmem:[%s10211_s1 + $0x1c4] ss:$8 sps:$4 sm:$0xff]  }
  0x4c   : > { %1765 = vmatmul.mubr.bf16.vlgmr.msra.gmra.mxu1 %v7293_v35  ;;  %1685 = vmatmul.mubr.bf16.vlgmr.msra.gmra.mxu0 %v7299_v38  ;;  %v7392_v35 = vld [vmem:[%s10211_s1 + $0x2d0] ss:$8 sps:$4 sm:$0xff]  }
  0x4d   : > { %1846 = vmatpush1.bf16.msra.mxu1 %v7296_v37  ;;  %2039 = vmatpush1.bf16.msra.mxu0 %v7302_v39  ;;  %v7400_v37 = vld [vmem:[%s10211_s1 + $0x2c4] ss:$8 sps:$4 sm:$0xff]   ;;  %v7401_v38 = vld [vmem:[%s7874_s14 + $0x314] ss:$28 sps:$4 sm:$0xff]  }
  0x4e   : > { %1847 = vmatprep.subr.bf16.mxu1 %v7307_v40  ;;  %2040 = vmatprep.subr.bf16.mxu0 %v7310_v41  ;;  %v7407_v39 = vld [vmem:[%s7874_s14 + $0x154] ss:$28 sps:$4 sm:$0xff]   ;;  %v7395_v40 = vld [vmem:[%s10211_s1 + $0x1c0] ss:$8 sps:$4 sm:$0xff]  }
  0x4f   : > { %1774 = vmatprep.mubr.bf16.mxu1 %v7311_v42  ;;  %1694 = vmatprep.mubr.bf16.mxu0 %v7317_v43  ;;  %v7398_v41 = vld [vmem:[%s10211_s1 + $0x2c0] ss:$8 sps:$4 sm:$0xff]   ;;  %v7406_v42 = vld [vmem:[%s10211_s1 + $0x1b4] ss:$8 sps:$4 sm:$0xff]   ;;  %v7403_v43 = vld [vmem:[%s7874_s14 + $0x310] ss:$28 sps:$4 sm:$0xff]  }
  0x51   : > { %1848 = vmatpush1.bf16.msra.mxu1 %v7305_v44  ;;  %2041 = vmatpush1.bf16.msra.mxu0 %v7308_v45  ;;  %v7412_v44 = vld [vmem:[%s10211_s1 + $0x2b4] ss:$8 sps:$4 sm:$0xff]   ;;  %v7404_v45 = vld [vmem:[%s10211_s1 + $0x1b0] ss:$8 sps:$4 sm:$0xff]  }
  0x52   : > { %1849 = vmatprep.subr.bf16.mxu1 %v7316_v46  ;;  %2042 = vmatprep.subr.bf16.mxu0 %v7322_v48  ;;  %v7409_v46 = vld [vmem:[%s7874_s14 + $0x150] ss:$28 sps:$4 sm:$0xff]  }
  0x53   : > { %v7415_v48 = vld [vmem:[%s10211_s1 + $0x1a4] ss:$8 sps:$4 sm:$0xff]  }
  0x54   : > { %1775 = vmatmul.mubr.bf16.gmra.mxu1 %v7313_v47  ;;  %1695 = vmatmul.mubr.bf16.gmra.mxu0 %v7319_v50  ;;  %v7410_v47 = vld [vmem:[%s10211_s1 + $0x2b0] ss:$8 sps:$4 sm:$0xff]   ;;  %v7419_v50 = vld [vmem:[%s7874_s14 + $0x34c] ss:$28 sps:$4 sm:$0xff]  }
  0x55   : > { %1850 = vmatpush1.bf16.msra.mxu1 %v7314_v49  ;;  %2043 = vmatpush1.bf16.msra.mxu0 %v7320_v51  ;;  %v7418_v49 = vld [vmem:[%s10211_s1 + $0x2a4] ss:$8 sps:$4 sm:$0xff]  }
  0x56   : > { %1851 = vmatprep.subr.bf16.mxu1 %v7325_v52  ;;  %2044 = vmatprep.subr.bf16.mxu0 %v7328_v53  ;;  %v7425_v51 = vld [vmem:[%s7874_s14 + $0x18c] ss:$28 sps:$4 sm:$0xff]  }
  0x57   : > { %1784 = vmatprep.mubr.bf16.mxu1 %v7329_v54  ;;  %1704 = vmatprep.mubr.bf16.mxu0 %v7335_v55  ;;  %v7413_v52 = vld [vmem:[%s10211_s1 + $0x1a0] ss:$8 sps:$4 sm:$0xff]   ;;  %v7424_v54 = vld [vmem:[%s10211_s1 + $0x194] ss:$8 sps:$4 sm:$0xff]  }
  0x58   : > { %v7416_v53 = vld [vmem:[%s10211_s1 + $0x2a0] ss:$8 sps:$4 sm:$0xff]  }
  0x59   : > { %1852 = vmatpush1.bf16.msra.mxu1 %v7323_v56  ;;  %2045 = vmatpush1.bf16.msra.mxu0 %v7326_v57  ;;  %v7421_v55 = vld [vmem:[%s7874_s14 + $0x348] ss:$28 sps:$4 sm:$0xff]   ;;  %v7430_v56 = vld [vmem:[%s10211_s1 + $0x294] ss:$8 sps:$4 sm:$0xff]   ;;  %v7422_v57 = vld [vmem:[%s10211_s1 + $0x190] ss:$8 sps:$4 sm:$0xff]  }
  0x5a   : > { %1853 = vmatprep.subr.bf16.mxu1 %v7334_v58  ;;  %2046 = vmatprep.subr.bf16.mxu0 %v7340_v60  ;;  %v7427_v58 = vld [vmem:[%s7874_s14 + $0x188] ss:$28 sps:$4 sm:$0xff]  }
  0x5b   : > { %v7433_v60 = vld [vmem:[%s10211_s1 + $0x184] ss:$8 sps:$4 sm:$0xff]  }
  0x5c   : > { %1785 = vmatmul.mubr.bf16.gmra.mxu1 %v7331_v59  ;;  %1705 = vmatmul.mubr.bf16.gmra.mxu0 %v7337_v62  ;;  %v7428_v59 = vld [vmem:[%s10211_s1 + $0x290] ss:$8 sps:$4 sm:$0xff]   ;;  %v7439_v62 = vld [vmem:[%s7874_s14 + $0xc] ss:$28 sps:$4 sm:$0xff]  }
  0x5d   : > { %1854 = vmatpush1.bf16.msra.mxu1 %v7332_v61  ;;  %2047 = vmatpush1.bf16.msra.mxu0 %v7338_v63  ;;  %v7436_v61 = vld [vmem:[%s10211_s1 + $0x284] ss:$8 sps:$4 sm:$0xff]   ;;  %v7445_v63 = vld [vmem:[%s7874_s14 + $0x14] ss:$28 sps:$4 sm:$0xff]  }
  0x5e   : > { %1855 = vmatprep.subr.bf16.mxu1 %v7343_v0  ;;  %2048 = vmatprep.subr.bf16.mxu0 %v7346_v1  ;;  %v7431_v0 = vld [vmem:[%s10211_s1 + $0x180] ss:$8 sps:$4 sm:$0xff]  }
  0x5f   : > { %1794 = vmatprep.mubr.bf16.mxu1 %v7347_v2  ;;  %1714 = vmatprep.mubr.bf16.mxu0 %v7353_v3  ;;  %v7434_v1 = vld [vmem:[%s10211_s1 + $0x280] ss:$8 sps:$4 sm:$0xff]   ;;  %v7442_v2 = vld [vmem:[%s10211_s1 + $0x304] ss:$8 sps:$4 sm:$0xff]  }
  0x60   : > { %v7437_v3 = vld [vmem:[%s7874_s14 + $0x8] ss:$28 sps:$4 sm:$0xff]  }
  0x61   : > { %1856 = vmatpush1.bf16.msra.mxu1 %v7341_v4  ;;  %2049 = vmatpush1.bf16.msra.mxu0 %v7344_v5  ;;  %v7443_v4 = vld [vmem:[%s7874_s14 + $0x10] ss:$28 sps:$4 sm:$0xff]   ;;  %v7440_v5 = vld [vmem:[%s10211_s1 + $0x300] ss:$8 sps:$4 sm:$0xff]  }
  0x62   : > { %1857 = vmatprep.subr.bf16.mxu1 %v7352_v6  ;;  %2050 = vmatprep.subr.bf16.mxu0 %v7358_v8  ;;  %v7446_v6 = vld [vmem:[%s7874_s14 + $0x44] ss:$28 sps:$4 sm:$0xff]  }
  0x63   : > { %v7448_v8 = vld [vmem:[%s7874_s14 + $0x40] ss:$28 sps:$4 sm:$0xff]  }
  0x64   : > { %1795 = vmatmul.mubr.bf16.gmra.mxu1 %v7349_v7  ;;  %1715 = vmatmul.mubr.bf16.gmra.mxu0 %v7355_v10  ;;  %v7449_v7 = vld [vmem:[%s7874_s14 + $0x4c] ss:$28 sps:$4 sm:$0xff]   ;;  %v7452_v10 = vld [vmem:[%s7874_s14 + $0x7c] ss:$28 sps:$4 sm:$0xff]  }
  0x65   : > { %1858 = vmatpush1.bf16.msra.mxu1 %v7350_v9  ;;  %2051 = vmatpush1.bf16.msra.mxu0 %v7356_v11  ;;  %v7451_v9 = vld [vmem:[%s7874_s14 + $0x48] ss:$28 sps:$4 sm:$0xff]  }
  0x66   : > { %1859 = vmatprep.subr.bf16.mxu1 %v7361_v12  ;;  %2052 = vmatprep.subr.bf16.mxu0 %v7364_v13  ;;  %v7455_v11 = vld [vmem:[%s7874_s14 + $0x84] ss:$28 sps:$4 sm:$0xff]   ;;  %v7454_v12 = vld [vmem:[%s7874_s14 + $0x78] ss:$28 sps:$4 sm:$0xff]  }
  0x67   : > { %1804 = vmatprep.mubr.bf16.mxu1 %v7365_v14  ;;  %1724 = vmatprep.mubr.bf16.mxu0 %v7371_v15  ;;  %v7457_v13 = vld [vmem:[%s7874_s14 + $0x80] ss:$28 sps:$4 sm:$0xff]   ;;  %v7458_v14 = vld [vmem:[%s7874_s14 + $0xb4] ss:$28 sps:$4 sm:$0xff]  }
  0x68   : > { %v7461_v15 = vld [vmem:[%s7874_s14 + $0xbc] ss:$28 sps:$4 sm:$0xff]  }
  0x69   : > { %1860 = vmatpush1.bf16.msra.mxu1 %v7359_v16  ;;  %2053 = vmatpush1.bf16.msra.mxu0 %v7362_v17  ;;  %v7460_v16 = vld [vmem:[%s7874_s14 + $0xb0] ss:$28 sps:$4 sm:$0xff]   ;;  %v7463_v17 = vld [vmem:[%s7874_s14 + $0xb8] ss:$28 sps:$4 sm:$0xff]  }
  0x6a   : > { %1861 = vmatprep.subr.bf16.mxu1 %v7370_v18  ;;  %2054 = vmatprep.subr.bf16.mxu0 %v7376_v20  ;;  %v7464_v18 = vld [vmem:[%s7874_s14 + $0xec] ss:$28 sps:$4 sm:$0xff]  }
  0x6b   : > { %v7466_v20 = vld [vmem:[%s7874_s14 + $0xe8] ss:$28 sps:$4 sm:$0xff]  }
  0x6c   : > { %1805 = vmatmul.mubr.bf16.gmra.mxu1 %v7367_v19  ;;  %1725 = vmatmul.mubr.bf16.gmra.mxu0 %v7373_v22  ;;  %v7467_v19 = vld [vmem:[%s7874_s14 + $0xf4] ss:$28 sps:$4 sm:$0xff]   ;;  %v7470_v22 = vld [vmem:[%s7874_s14 + $0x124] ss:$28 sps:$4 sm:$0xff]  }
  0x6d   : > { %1862 = vmatpush2.bf16.msra.mxu1 %v7368_v21  ;;  %2055 = vmatpush2.bf16.msra.mxu0 %v7374_v23  ;;  %v7469_v21 = vld [vmem:[%s7874_s14 + $0xf0] ss:$28 sps:$4 sm:$0xff]  }
  0x6e   : > { %1863 = vmatprep.subr.bf16.mxu1 %v7379_v24  ;;  %2056 = vmatprep.subr.bf16.mxu0 %v7382_v25  ;;  %v7473_v23 = vld [vmem:[%s7874_s14 + $0x12c] ss:$28 sps:$4 sm:$0xff]   ;;  %v7472_v24 = vld [vmem:[%s7874_s14 + $0x120] ss:$28 sps:$4 sm:$0xff]  }
  0x6f   : > { %1814 = vmatprep.mubr.bf16.mxu1 %v7383_v26  ;;  %1734 = vmatprep.mubr.bf16.mxu0 %v7389_v27  ;;  %v7475_v25 = vld [vmem:[%s7874_s14 + $0x128] ss:$28 sps:$4 sm:$0xff]   ;;  %v7476_v26 = vld [vmem:[%s7874_s14 + $0x15c] ss:$28 sps:$4 sm:$0xff]  }
  0x70   : > { %v7479_v27 = vld [vmem:[%s7874_s14 + $0x164] ss:$28 sps:$4 sm:$0xff]  }
  0x71   : > { %1864 = vmatpush2.bf16.msra.mxu1 %v7377_v28  ;;  %2057 = vmatpush2.bf16.msra.mxu0 %v7380_v29  ;;  %v7478_v28 = vld [vmem:[%s7874_s14 + $0x158] ss:$28 sps:$4 sm:$0xff]   ;;  %v7481_v29 = vld [vmem:[%s7874_s14 + $0x160] ss:$28 sps:$4 sm:$0xff]  }
  0x72   : > { %1865 = vmatprep.subr.bf16.mxu1 %v7388_v30  ;;  %2058 = vmatprep.subr.bf16.mxu0 %v7394_v32  ;;  %v7482_v30 = vld [vmem:[%s7874_s14 + $0x194] ss:$28 sps:$4 sm:$0xff]  }
  0x73   : > { %v7484_v32 = vld [vmem:[%s7874_s14 + $0x190] ss:$28 sps:$4 sm:$0xff]  }
  0x74   : > { %1815 = vmatmul.mubr.bf16.gmra.mxu1 %v7385_v31  ;;  %1735 = vmatmul.mubr.bf16.gmra.mxu0 %v7391_v34  ;;  %v7485_v31 = vld [vmem:[%s7874_s14 + $0x19c] ss:$28 sps:$4 sm:$0xff]   ;;  %v7488_v34 = vld [vmem:[%s7874_s14 + $0x1cc] ss:$28 sps:$4 sm:$0xff]  }
  0x75   : > { %1866 = vmatpush2.bf16.msra.mxu1 %v7386_v33  ;;  %2059 = vmatpush2.bf16.msra.mxu0 %v7392_v35  ;;  %v7487_v33 = vld [vmem:[%s7874_s14 + $0x198] ss:$28 sps:$4 sm:$0xff]  }
  0x76   : > { %1867 = vmatprep.subr.bf16.mxu1 %v7397_v36  ;;  %2060 = vmatprep.subr.bf16.mxu0 %v7400_v37  ;;  %v7491_v35 = vld [vmem:[%s7874_s14 + $0x1d4] ss:$28 sps:$4 sm:$0xff]   ;;  %v7490_v36 = vld [vmem:[%s7874_s14 + $0x1c8] ss:$28 sps:$4 sm:$0xff]  }
  0x77   : > { %1824 = vmatprep.mubr.bf16.mxu1 %v7401_v38  ;;  %1744 = vmatprep.mubr.bf16.mxu0 %v7407_v39  ;;  %v7493_v37 = vld [vmem:[%s7874_s14 + $0x1d0] ss:$28 sps:$4 sm:$0xff]   ;;  %v7494_v38 = vld [vmem:[%s7874_s14 + $0x204] ss:$28 sps:$4 sm:$0xff]  }
  0x78   : > { %v7497_v39 = vld [vmem:[%s7874_s14 + $0x20c] ss:$28 sps:$4 sm:$0xff]  }
  0x79   : > { %1868 = vmatpush2.bf16.msra.mxu1 %v7395_v40  ;;  %2061 = vmatpush2.bf16.msra.mxu0 %v7398_v41  ;;  %v7496_v40 = vld [vmem:[%s7874_s14 + $0x200] ss:$28 sps:$4 sm:$0xff]   ;;  %v7499_v41 = vld [vmem:[%s7874_s14 + $0x208] ss:$28 sps:$4 sm:$0xff]  }
  0x7a   : > { %1869 = vmatprep.subr.bf16.mxu1 %v7406_v42  ;;  %2062 = vmatprep.subr.bf16.mxu0 %v7412_v44  ;;  %v7500_v42 = vld [vmem:[%s7874_s14 + $0x23c] ss:$28 sps:$4 sm:$0xff]  }
  0x7b   : > { %v7502_v44 = vld [vmem:[%s7874_s14 + $0x238] ss:$28 sps:$4 sm:$0xff]  }
  0x7c   : > { %1825 = vmatmul.mubr.bf16.gmra.mxu1 %v7403_v43  ;;  %1745 = vmatmul.mubr.bf16.gmra.mxu0 %v7409_v46  ;;  %v7503_v43 = vld [vmem:[%s7874_s14 + $0x244] ss:$28 sps:$4 sm:$0xff]   ;;  %v7506_v46 = vld [vmem:[%s7874_s14 + $0x274] ss:$28 sps:$4 sm:$0xff]  }
  0x7d   : > { %1870 = vmatpush2.bf16.msra.mxu1 %v7404_v45  ;;  %2063 = vmatpush2.bf16.msra.mxu0 %v7410_v47  ;;  %v7505_v45 = vld [vmem:[%s7874_s14 + $0x240] ss:$28 sps:$4 sm:$0xff]  }
  0x7e   : > { %1871 = vmatprep.subr.bf16.mxu1 %v7415_v48  ;;  %2064 = vmatprep.subr.bf16.mxu0 %v7418_v49  ;;  %v7509_v47 = vld [vmem:[%s7874_s14 + $0x27c] ss:$28 sps:$4 sm:$0xff]  }
  0x7f   : > { %1834 = vmatprep.mubr.bf16.mxu1 %v7419_v50  ;;  %1754 = vmatprep.mubr.bf16.mxu0 %v7425_v51  ;;  %v7546_v48 = vld [vmem:[%s10212_s2 + $0x78] sm:$0xff]   ;;  %v7508_v50 = vld [vmem:[%s7874_s14 + $0x270] ss:$28 sps:$4 sm:$0xff]  }
  0x80   : > { %v7547_v49 = vld [vmem:[%s10212_s2 + $0x38] sm:$0xff]  }
  0x81   : > { %1872 = vmatpush2.bf16.msra.mxu1 %v7413_v52  ;;  %2065 = vmatpush2.bf16.msra.mxu0 %v7416_v53  ;;  %v7511_v51 = vld [vmem:[%s7874_s14 + $0x278] ss:$28 sps:$4 sm:$0xff]   ;;  %v7512_v52 = vld [vmem:[%s7874_s14 + $0x2ac] ss:$28 sps:$4 sm:$0xff]  }
  0x82   : > { %1873 = vmatprep.subr.bf16.mxu1 %v7424_v54  ;;  %2066 = vmatprep.subr.bf16.mxu0 %v7430_v56  ;;  %v7515_v53 = vld [vmem:[%s7874_s14 + $0x2b4] ss:$28 sps:$4 sm:$0xff]   ;;  %v7514_v54 = vld [vmem:[%s7874_s14 + $0x2a8] ss:$28 sps:$4 sm:$0xff]  }
  0x83   : > { %v7518_v56 = vld [vmem:[%s7874_s14 + $0x2e4] ss:$28 sps:$4 sm:$0xff]  }
  0x84   : > { %1835 = vmatmul.mubr.bf16.gmra.mxu1 %v7421_v55  ;;  %1755 = vmatmul.mubr.bf16.gmra.mxu0 %v7427_v58  ;;  %v7517_v55 = vld [vmem:[%s7874_s14 + $0x2b0] ss:$28 sps:$4 sm:$0xff]  }
  0x85   : > { %1874 = vmatpush2.bf16.msra.mxu1 %v7422_v57  ;;  %2067 = vmatpush2.bf16.msra.mxu0 %v7428_v59  ;;  %v7521_v57 = vld [vmem:[%s7874_s14 + $0x2ec] ss:$28 sps:$4 sm:$0xff]   ;;  %v7550_v58 = vld [vmem:[%s10212_s2 + $0x70] sm:$0xff]  }
  0x86   : > { %1875 = vmatprep.subr.bf16.mxu1 %v7433_v60  ;;  %2068 = vmatprep.subr.bf16.mxu0 %v7436_v61  ;;  %v7551_v59 = vld [vmem:[%s10212_s2 + $0x30] sm:$0xff]   ;;  %v7520_v60 = vld [vmem:[%s7874_s14 + $0x2e0] ss:$28 sps:$4 sm:$0xff]   ;;  %v7523_v61 = vld [vmem:[%s7874_s14 + $0x2e8] ss:$28 sps:$4 sm:$0xff]  }
  0x87   : > { %1877 = vmatprep.mubr.bf16.mxu1 %v7439_v62  ;;  %2070 = vmatprep.mubr.bf16.mxu0 %v7445_v63  ;;  %v7524_v62 = vld [vmem:[%s7874_s14 + $0x31c] ss:$28 sps:$4 sm:$0xff]   ;;  %v7527_v63 = vld [vmem:[%s7874_s14 + $0x324] ss:$28 sps:$4 sm:$0xff]  }
  0x89   : > { %1876 = vmatpush2.bf16.msra.mxu1 %v7431_v0  ;;  %2069 = vmatpush2.bf16.msra.mxu0 %v7434_v1  ;;  %v7526_v0 = vld [vmem:[%s7874_s14 + $0x318] ss:$28 sps:$4 sm:$0xff]   ;;  %v7529_v1 = vld [vmem:[%s7874_s14 + $0x320] ss:$28 sps:$4 sm:$0xff]  }
  0x8a   : > { %2245 = vmatprep.subr.bf16.mxu1 %v7442_v2  ;;  %6835 = vmatprep.subr.bf16.mxu0 %v7546_v48  ;;  %v7530_v2 = vld [vmem:[%s7874_s14 + $0x354] ss:$28 sps:$4 sm:$0xff]  }
  0x8c   : > { %1878 = vmatmul.mubr.bf16.vlgmr.msra.gmra.mxu1 %v7437_v3  ;;  %2071 = vmatmul.mubr.bf16.vlgmr.msra.gmra.mxu0 %v7443_v4  ;;  %v7533_v3 = vld [vmem:[%s7874_s14 + $0x35c] ss:$28 sps:$4 sm:$0xff]   ;;  %v7554_v4 = vld [vmem:[%s10212_s2 + $0x68] sm:$0xff]  }
  0x8d   : > { %2246 = vmatpush1.bf16.msra.mxu1 %v7440_v5  ;;  %1887 = vmatprep.mubr.bf16.mxu1 %v7446_v6  ;;  %v7555_v5 = vld [vmem:[%s10212_s2 + $0x28] sm:$0xff]   ;;  %v543_v6 = vlaneseq }
  0x8e   : > { %2080 = vmatprep.mubr.bf16.mxu0 %v7449_v7  ;;  %6836 = vmatpush3.bf16.msra.mxu0 %v7547_v49  ;;  %v7532_v7 = vld [vmem:[%s7874_s14 + $0x350] ss:$28 sps:$4 sm:$0xff]  }
  0x8f   : > { %6837 = vmatprep.subr.bf16.mxu0 %v7550_v58 }
  0x92   : > { %6838 = vmatpush3.bf16.msra.mxu0 %v7551_v59 }
  0x93   : > { %6839 = vmatprep.subr.bf16.mxu0 %v7554_v4  ;;  %v7540_v4 = vld [vmem:[%s7874_s14 + $0xf8] ss:$28 sps:$4 sm:$0xff]  }
  0x94   : > { %1888 = vmatmul.mubr.bf16.gmra.mxu1 %v7448_v8  ;;  %2081 = vmatmul.mubr.bf16.gmra.mxu0 %v7451_v9  ;;  %v7535_v8 = vld [vmem:[%s7874_s14 + $0x358] ss:$28 sps:$4 sm:$0xff]   ;;  %v8248_v9 = vshrl.u32 %v543_v6, 7 }
  0x95   : > { %1897 = vmatprep.mubr.bf16.mxu1 %v7452_v10  ;;  %2090 = vmatprep.mubr.bf16.mxu0 %v7455_v11  ;;  %v10225_v10 = vmov 0  }
  0x96   : > { %6840 = vmatpush3.bf16.msra.mxu0 %v7555_v5  ;;  %10228 = vst [vmem:[#allocation2_spill] sm:$0xff] %v8248_v9  ;;  %v8252_v11 = vsub.s32 0, %v8248_v9 }
  0x98   : > { %10229 = vst [vmem:[#allocation3_spill] sm:$0xff] %v8252_v11 }
  0x9c   : > { %1898 = vmatmul.mubr.bf16.gmra.mxu1 %v7454_v12  ;;  %2091 = vmatmul.mubr.bf16.gmra.mxu0 %v7457_v13  ;;  %v541_v12 = vld [vmem:[%s10217_s7] ss:$8 sm:$0x3]  ;;  %v8258_v13 = vsub.s32 1, %v8248_v9 }
  0x9d   : > { %1907 = vmatprep.mubr.bf16.mxu1 %v7458_v14  ;;  %2100 = vmatprep.mubr.bf16.mxu0 %v7461_v15  ;;  %v7536_v14 = vld [vmem:[%s7874_s14 + $0x18] ss:$28 sps:$4 sm:$0xff]   ;;  %v8262_v15 = vrot.slane %v541_v12, %v8252_v11 }
  0x9e   : > { %10230 = vst [vmem:[#allocation4_spill] sm:$0xff] %v8258_v13 }
  0xa4   : > { %1908 = vmatmul.mubr.bf16.gmra.mxu1 %v7460_v16  ;;  %2101 = vmatmul.mubr.bf16.gmra.mxu0 %v7463_v17  ;;  %v8265_v16 = vrot.slane %v541_v12, %v8258_v13  ;;  %v7558_v17 = vld [vmem:[%s10212_s2 + $0x60] sm:$0xff]   ;;  %v7562_v12 = vld [vmem:[%s10212_s2 + $0x50] sm:$0xff]  }
  0xa5   : > { %1917 = vmatprep.mubr.bf16.mxu1 %v7464_v18  ;;  %2110 = vmatprep.mubr.bf16.mxu0 %v7467_v19  ;;  %v7559_v18 = vld [vmem:[%s10212_s2 + $0x20] sm:$0xff]  }
  0xa6   : > { %6841 = vmatprep.subr.bf16.mxu0 %v7558_v17 }
  0xa7   : > { %6842 = vmatpush3.bf16.msra.mxu0 %v7559_v18 }
  0xac   : > { %1918 = vmatmul.mubr.bf16.gmra.mxu1 %v7466_v20  ;;  %2111 = vmatmul.mubr.bf16.gmra.mxu0 %v7469_v21 }
  0xad   : > { %1927 = vmatprep.mubr.bf16.mxu1 %v7470_v22  ;;  %2120 = vmatprep.mubr.bf16.mxu0 %v7473_v23 }
  0xb4   : > { %1928 = vmatmul.mubr.bf16.gmra.mxu1 %v7472_v24  ;;  %2121 = vmatmul.mubr.bf16.gmra.mxu0 %v7475_v25 }
  0xb5   : > { %1937 = vmatprep.mubr.bf16.mxu1 %v7476_v26  ;;  %2130 = vmatprep.mubr.bf16.mxu0 %v7479_v27  ;;  %v7537_v27 = vld [vmem:[%s7874_s14 + $0x50] ss:$28 sps:$4 sm:$0xff]  }
  0xbc   : > { %1938 = vmatmul.mubr.bf16.gmra.mxu1 %v7478_v28  ;;  %2131 = vmatmul.mubr.bf16.gmra.mxu0 %v7481_v29 }
  0xbd   : > { %1947 = vmatprep.mubr.bf16.mxu1 %v7482_v30  ;;  %2140 = vmatprep.mubr.bf16.mxu0 %v7485_v31 }
  0xc4   : > { %1948 = vmatmul.mubr.bf16.gmra.mxu1 %v7484_v32  ;;  %2141 = vmatmul.mubr.bf16.gmra.mxu0 %v7487_v33 }
  0xc5   : > { %1957 = vmatprep.mubr.bf16.mxu1 %v7488_v34  ;;  %2150 = vmatprep.mubr.bf16.mxu0 %v7491_v35 }
  0xcc   : > { %1958 = vmatmul.mubr.bf16.gmra.mxu1 %v7490_v36  ;;  %2151 = vmatmul.mubr.bf16.gmra.mxu0 %v7493_v37 }
  0xcd   : > { %1967 = vmatprep.mubr.bf16.mxu1 %v7494_v38  ;;  %2160 = vmatprep.mubr.bf16.mxu0 %v7497_v39 }
  0xd4   : > { %1968 = vmatmul.mubr.bf16.gmra.mxu1 %v7496_v40  ;;  %2161 = vmatmul.mubr.bf16.gmra.mxu0 %v7499_v41  ;;  %v7538_v40 = vld [vmem:[%s7874_s14 + $0x88] ss:$28 sps:$4 sm:$0xff]  }
  0xd5   : > { %1977 = vmatprep.mubr.bf16.mxu1 %v7500_v42  ;;  %2170 = vmatprep.mubr.bf16.mxu0 %v7503_v43 }
  0xdc   : > { %1978 = vmatmul.mubr.bf16.gmra.mxu1 %v7502_v44  ;;  %2171 = vmatmul.mubr.bf16.gmra.mxu0 %v7505_v45  ;;  %v7560_v45 = vld [vmem:[%s10212_s2 + $0x58] sm:$0xff]  }
  0xdd   : > { %1987 = vmatprep.mubr.bf16.mxu1 %v7506_v46  ;;  %2180 = vmatprep.mubr.bf16.mxu0 %v7509_v47  ;;  %v7561_v46 = vld [vmem:[%s10212_s2 + $0x18] sm:$0xff]  }
  0xde   : > { %6843 = vmatprep.subr.bf16.mxu0 %v7560_v45 }
  0xdf   : > { %6844 = vmatpush3.bf16.msra.mxu0 %v7561_v46 }
  0xe0   : > { %6845 = vmatprep.subr.bf16.mxu0 %v7562_v12 }
  0xe4   : > { %1988 = vmatmul.mubr.bf16.gmra.mxu1 %v7508_v50  ;;  %2181 = vmatmul.mubr.bf16.gmra.mxu0 %v7511_v51 }
  0xe5   : > { %1997 = vmatprep.mubr.bf16.mxu1 %v7512_v52  ;;  %2190 = vmatprep.mubr.bf16.mxu0 %v7515_v53 }
  0xec   : > { %1998 = vmatmul.mubr.bf16.gmra.mxu1 %v7514_v54  ;;  %2191 = vmatmul.mubr.bf16.gmra.mxu0 %v7517_v55  ;;  %v7539_v55 = vld [vmem:[%s7874_s14 + $0xc0] ss:$28 sps:$4 sm:$0xff]  }
  0xed   : > { %2007 = vmatprep.mubr.bf16.mxu1 %v7518_v56  ;;  %2200 = vmatprep.mubr.bf16.mxu0 %v7521_v57 }
  0xf4   : > { %2008 = vmatmul.mubr.bf16.gmra.mxu1 %v7520_v60  ;;  %2201 = vmatmul.mubr.bf16.gmra.mxu0 %v7523_v61 }
  0xf5   : > { %2017 = vmatprep.mubr.bf16.mxu1 %v7524_v62  ;;  %2210 = vmatprep.mubr.bf16.mxu0 %v7527_v63 }
  0xfc   : > { %2018 = vmatmul.mubr.bf16.gmra.mxu1 %v7526_v0  ;;  %2211 = vmatmul.mubr.bf16.gmra.mxu0 %v7529_v1 }
  0xfd   : > { %2027 = vmatprep.mubr.bf16.mxu1 %v7530_v2  ;;  %2220 = vmatprep.mubr.bf16.mxu0 %v7533_v3 }
 0x104   : > { %2028 = vmatmul.mubr.bf16.gmra.mxu1 %v7532_v7  ;;  %2221 = vmatmul.mubr.bf16.gmra.mxu0 %v7535_v8 }
 0x105   : > { %2263 = vmatprep.mubr.bf16.mxu1 %v10225_v10 }
 0x10c   : > { %v1766_v19 = vpop.f32.mrf.mxu1  ;;  %6398 = vmatmul.mubr.msk.bf16.vlgmr.msra.gmra.mxu1 %vm1603_vm0, %v7536_v14  ;;  %v8274_v20 = vpop.f32.mrf.mxu0  ;;  %v7563_v14 = vld [vmem:[%s10212_s2 + $0x10] sm:$0xff]  }
 0x10d   : > { %v8277_v21 = vadd.f32 %v1766_v19, %v8262_v15  ;;  %2273 = vmatprep.mubr.bf16.mxu1 %v10225_v10  ;;  %6846 = vmatpush3.bf16.msra.mxu0 %v7563_v14 }
 0x10e   : > { %v1768_v22 = vpop.f32.mrf.mxu1  ;;  %v8280_v23 = vpop.f32.mrf.mxu0 }
 0x10f   : > { %v8283_v24 = vadd.f32 %v1768_v22, %v8265_v16 }
 0x110   : > { %v1770_v25 = vpop.f32.mrf.mxu1  ;;  %v8285_v26 = vpop.f32.mrf.mxu0 }
 0x111   : > { %v8289_v28 = vadd.f32 %v1770_v25, %v8262_v15 }
 0x112   : > { %v1772_v29 = vpop.f32.mrf.mxu1  ;;  %v8291_v30 = vpop.f32.mrf.mxu0 }
 0x113   : > { %v8294_v31 = vadd.f32 %v1772_v29, %v8265_v16 }
 0x114   : > { %v1776_v32 = vpop.f32.mrf.mxu1  ;;  %6399 = vmatmul.mubr.msk.bf16.gmra.mxu1 %vm1603_vm0, %v7537_v27  ;;  %v8297_v33 = vpop.f32.mrf.mxu0 }
 0x115   : > { %10231 = vst [vmem:[#allocation5_spill] sm:$0xff] %v8294_v31  ;;  %v8300_v34 = vadd.f32 %v1776_v32, %v8262_v15  ;;  %2283 = vmatprep.mubr.bf16.mxu1 %v10225_v10 }
 0x116   : > { %v1778_v35 = vpop.f32.mrf.mxu1  ;;  %v8303_v36 = vpop.f32.mrf.mxu0 }
 0x117   : > { %v8306_v37 = vadd.f32 %v1778_v35, %v8265_v16  ;;  %v7541_v35 = vld [vmem:[%s7874_s14 + $0x130] ss:$28 sps:$4 sm:$0xff]  }
 0x118   : > { %v1780_v38 = vpop.f32.mrf.mxu1  ;;  %v8308_v39 = vpop.f32.mrf.mxu0 }
 0x119   : > { %v8312_v41 = vadd.f32 %v1780_v38, %v8262_v15 }
 0x11a   : > { %v1782_v42 = vpop.f32.mrf.mxu1  ;;  %v8314_v43 = vpop.f32.mrf.mxu0 }
 0x11b   : > { %v8317_v44 = vadd.f32 %v1782_v42, %v8265_v16 }
 0x11c   : > { %v1786_v47 = vpop.f32.mrf.mxu1  ;;  %6400 = vmatmul.mubr.msk.bf16.gmra.mxu1 %vm1603_vm0, %v7538_v40  ;;  %v8326_v48 = vpop.f32.mrf.mxu0 }
 0x11d   : > { %10232 = vst [vmem:[#allocation6_spill] sm:$0xff] %v8317_v44  ;;  %v8329_v49 = vadd.f32 %v1786_v47, %v8262_v15  ;;  %2293 = vmatprep.mubr.bf16.mxu1 %v10225_v10 }
 0x11e   : > { %v1788_v50 = vpop.f32.mrf.mxu1  ;;  %v8332_v51 = vpop.f32.mrf.mxu0 }
 0x11f   : > { %v8335_v52 = vadd.f32 %v1788_v50, %v8265_v16 }
 0x120   : > { %v1790_v53 = vpop.f32.mrf.mxu1  ;;  %v8337_v54 = vpop.f32.mrf.mxu0 }
 0x121   : > { %10233 = vst [vmem:[#allocation7_spill] sm:$0xff] %v8337_v54  ;;  %v8341_v56 = vadd.f32 %v1790_v53, %v8262_v15  ;;  %v7549_v54 = vld [vmem:[%s7874_s14 + $0x280] ss:$28 sps:$4 sm:$0xff]  }
 0x122   : > { %v1792_v57 = vpop.f32.mrf.mxu1  ;;  %v8343_v58 = vpop.f32.mrf.mxu0 }
 0x123   : > { %10234 = vst [vmem:[#allocation8_spill] sm:$0xff] %v8343_v58  ;;  %v8346_v59 = vadd.f32 %v1792_v57, %v8265_v16 }
 0x124   : > { %v1796_v60 = vpop.f32.mrf.mxu1  ;;  %6401 = vmatmul.mubr.msk.bf16.gmra.mxu1 %vm1603_vm0, %v7539_v55  ;;  %v8349_v61 = vpop.f32.mrf.mxu0 }
 0x125   : > { %10235 = vst [vmem:[#allocation9_spill] sm:$0xff] %v8346_v59  ;;  %v8352_v62 = vadd.f32 %v1796_v60, %v8262_v15  ;;  %2303 = vmatprep.mubr.bf16.mxu1 %v10225_v10 }
 0x126   : > { %v1798_v63 = vpop.f32.mrf.mxu1  ;;  %v8355_v0 = vpop.f32.mrf.mxu0 }
 0x127   : > { %v8358_v1 = vadd.f32 %v1798_v63, %v8265_v16 }
 0x128   : > { %v1800_v2 = vpop.f32.mrf.mxu1  ;;  %v8360_v3 = vpop.f32.mrf.mxu0 }
 0x129   : > { %10236 = vst [vmem:[#allocation10_spill] sm:$0xff] %v8360_v3  ;;  %v8364_v5 = vadd.f32 %v1800_v2, %v8262_v15  ;;  %v7542_v2 = vld [vmem:[%s7874_s14 + $0x168] ss:$28 sps:$4 sm:$0xff]   ;;  %v1707_v3 = vadd.f32 %v8326_v48, %v8262_v15 }
 0x12a   : > { %v1802_v6 = vpop.f32.mrf.mxu1  ;;  %v8366_v7 = vpop.f32.mrf.mxu0 }
 0x12b   : > { %10237 = vst [vmem:[#allocation11_spill] sm:$0xff] %v8366_v7  ;;  %v8369_v8 = vadd.f32 %v1802_v6, %v8265_v16  ;;  %v7548_v7 = vld [vmem:[%s7874_s14 + $0x248] ss:$28 sps:$4 sm:$0xff]  }
 0x12c   : > { %v1806_v17 = vpop.f32.mrf.mxu1  ;;  %6402 = vmatmul.mubr.msk.bf16.gmra.mxu1 %vm1603_vm0, %v7540_v4  ;;  %v8378_v18 = vpop.f32.mrf.mxu0 }
 0x12d   : > { %10238 = vst [vmem:[#allocation12_spill] sm:$0xff] %v8369_v8  ;;  %v8381_v19 = vadd.f32 %v1806_v17, %v8262_v15  ;;  %2313 = vmatprep.mubr.bf16.mxu1 %v10225_v10  ;;  %v7564_v17 = vld [vmem:[%s10212_s2 + $0x48] sm:$0xff]  }
 0x12e   : > { %v1808_v22 = vpop.f32.mrf.mxu1  ;;  %v8384_v25 = vpop.f32.mrf.mxu0  ;;  %6847 = vmatprep.subr.bf16.mxu0 %v7564_v17 }
 0x12f   : > { %v8387_v27 = vadd.f32 %v1808_v22, %v8265_v16  ;;  %v7565_v22 = vld [vmem:[%s10212_s2 + $0x8] sm:$0xff]  }
 0x130   : > { %v1810_v29 = vpop.f32.mrf.mxu1  ;;  %v8389_v32 = vpop.f32.mrf.mxu0  ;;  %6848 = vmatpush3.bf16.msra.mxu0 %v7565_v22 }
 0x131   : > { %10239 = vst [vmem:[#allocation13_spill] sm:$0xff] %v8389_v32  ;;  %v8393_v38 = vadd.f32 %v1810_v29, %v8262_v15 }
 0x132   : > { %v1812_v40 = vpop.f32.mrf.mxu1  ;;  %v8395_v42 = vpop.f32.mrf.mxu0 }
 0x133   : > { %10240 = vst [vmem:[#allocation14_spill] sm:$0xff] %v8395_v42  ;;  %v8398_v45 = vadd.f32 %v1812_v40, %v8265_v16 }
 0x134   : > { %v1816_v46 = vpop.f32.mrf.mxu1  ;;  %6403 = vmatmul.mubr.msk.bf16.gmra.mxu1 %vm1603_vm0, %v7541_v35  ;;  %v8401_v47 = vpop.f32.mrf.mxu0 }
 0x135   : > { %10241 = vst [vmem:[#allocation15_spill] sm:$0xff] %v8398_v45  ;;  %v8404_v50 = vadd.f32 %v1816_v46, %v8262_v15  ;;  %2323 = vmatprep.mubr.bf16.mxu1 %v10225_v10 }
 0x136   : > { %v1818_v53 = vpop.f32.mrf.mxu1  ;;  %v8407_v55 = vpop.f32.mrf.mxu0 }
 0x137   : > { %v8410_v57 = vadd.f32 %v1818_v53, %v8265_v16 }
 0x138   : > { %v1820_v60 = vpop.f32.mrf.mxu1  ;;  %v8412_v63 = vpop.f32.mrf.mxu0 }
 0x139   : > { %10242 = vst [vmem:[#allocation16_spill] sm:$0xff] %v8412_v63  ;;  %v8416_v4 = vadd.f32 %v1820_v60, %v8262_v15  ;;  %v7545_v63 = vld [vmem:[%s7874_s14 + $0x210] ss:$28 sps:$4 sm:$0xff]  }
 0x13a   : > { %v1822_v6 = vpop.f32.mrf.mxu1  ;;  %v8418_v12 = vpop.f32.mrf.mxu0 }
 0x13b   : > { %10243 = vst [vmem:[#allocation17_spill] sm:$0xff] %v8418_v12  ;;  %v8421_v14 = vadd.f32 %v1822_v6, %v8265_v16 }
 0x13c   : > { %v1826_v29 = vpop.f32.mrf.mxu1  ;;  %6404 = vmatmul.mubr.msk.bf16.gmra.mxu1 %vm1603_vm0, %v7542_v2  ;;  %v8430_v35 = vpop.f32.mrf.mxu0  ;;  %v7543_v2 = vld [vmem:[%s7874_s14 + $0x1a0] ss:$28 sps:$4 sm:$0xff]  }
 0x13d   : > { %10244 = vst [vmem:[#allocation18_spill] sm:$0xff] %v8421_v14  ;;  %v8433_v40 = vadd.f32 %v1826_v29, %v8262_v15  ;;  %2333 = vmatprep.mubr.bf16.mxu1 %v10225_v10  ;;  %v10248_v14 = vmov 0  }
 0x13e   : > { %v1828_v46 = vpop.f32.mrf.mxu1  ;;  %v8436_v53 = vpop.f32.mrf.mxu0 }
 0x13f   : > { %v8439_v60 = vadd.f32 %v1828_v46, %v8265_v16 }
 0x140   : > { %v1830_v6 = vpop.f32.mrf.mxu1  ;;  %v8441_v9 = vpop.f32.mrf.mxu0 }
 0x141   : > { %10245 = vst [vmem:[#allocation19_spill] sm:$0xff] %v8441_v9  ;;  %v8445_v11 = vadd.f32 %v1830_v6, %v8262_v15 }
 0x142   : > { %v1832_v29 = vpop.f32.mrf.mxu1  ;;  %v8447_v13 = vpop.f32.mrf.mxu0 }
 0x143   : > { %10246 = vst [vmem:[#allocation20_spill] sm:$0xff] %v8447_v13  ;;  %v8450_v17 = vadd.f32 %v1832_v29, %v8265_v16  ;;  %v7544_v29 = vld [vmem:[%s7874_s14 + $0x1d8] ss:$28 sps:$4 sm:$0xff]   ;;  %v1689_v13 = vadd.f32 %v8280_v23, %v8265_v16 }
 0x144   : > { %v1836_v10 = vpop.f32.mrf.mxu1  ;;  %6405 = vmatmul.mubr.msk.bf16.gmra.mxu1 %vm1603_vm0, %v7543_v2  ;;  %v8453_v22 = vpop.f32.mrf.mxu0  ;;  %v1687_v2 = vadd.f32 %v8274_v20, %v8262_v15  ;;  %v7567_v20 = vld [vmem:[%s10212_s2] sm:$0xff]  }
 0x145   : > { %10247 = vst [vmem:[#allocation21_spill] sm:$0xff] %v8450_v17  ;;  %v8456_v46 = vadd.f32 %v1836_v10, %v8262_v15  ;;  %2343 = vmatprep.mubr.bf16.mxu1 %v10248_v14 }
 0x146   : > { %v1838_v45 = vpop.f32.mrf.mxu1  ;;  %v8459_v8 = vpop.f32.mrf.mxu0 }
 0x147   : > { %v8462_v6 = vadd.f32 %v1838_v45, %v8265_v16 }
 0x148   : > { %v1840_v59 = vpop.f32.mrf.mxu1  ;;  %v8464_v44 = vpop.f32.mrf.mxu0 }
 0x149   : > { %10249 = vst [vmem:[#allocation22_spill] sm:$0xff] %v8464_v44  ;;  %v8470_v17 = vadd.f32 %v1840_v59, %v8262_v15  ;;  %v7566_v44 = vld [vmem:[%s10212_s2 + $0x40] sm:$0xff]  }
 0x14a   : > { %v1842_v10 = vpop.f32.mrf.mxu1  ;;  %v8472_v31 = vpop.f32.mrf.mxu0  ;;  %6849 = vmatprep.subr.bf16.mxu0 %v7566_v44  ;;  %v1699_v44 = vadd.f32 %v8303_v36, %v8265_v16 }
 0x14b   : > { %10250 = vst [vmem:[#allocation23_spill] sm:$0xff] %v8472_v31  ;;  %v8477_v45 = vadd.f32 %v1842_v10, %v8265_v16  ;;  %6850 = vmatpush3.bf16.msra.mxu0 %v7567_v20 }
 0x14c   : > { %v1879_v59 = vpop.f32.mrf.mxu1  ;;  %6406 = vmatmul.mubr.msk.bf16.gmra.mxu1 %vm1603_vm0, %v7544_v29  ;;  %v8486_v9 = vpop.f32.mrf.mxu0  ;;  %v1697_v29 = vadd.f32 %v8297_v33, %v8262_v15 }
 0x14d   : > { %10251 = vst [vmem:[#allocation24_spill] sm:$0xff] %v8477_v45  ;;  %v8488_v31 = vadd.f32 %v1879_v59, %v1687_v2  ;;  %2353 = vmatprep.mubr.bf16.mxu1 %v10248_v14 }
 0x14e   : > { %v1881_v23 = vpop.f32.mrf.mxu1  ;;  %v8491_v10 = vpop.f32.mrf.mxu0 }
 0x14f   : > { %v8493_v45 = vadd.f32 %v1881_v23, %v1689_v13 }
 0x150   : > { %v8495_v12 = vpop.f32.mrf.mxu1  ;;  %v8502_v2 = vpop.f32.mrf.mxu0 }
 0x152   : > { %v8500_v42 = vpop.f32.mrf.mxu1  ;;  %v8510_v13 = vpop.f32.mrf.mxu0 }
 0x154   : > { %v1889_v59 = vpop.f32.mrf.mxu1  ;;  %6407 = vmatmul.mubr.msk.bf16.gmra.mxu1 %vm1603_vm0, %v7545_v63  ;;  %v8519_v36 = vpop.f32.mrf.mxu0  ;;  %v1709_v63 = vadd.f32 %v8332_v51, %v8265_v16 }
 0x155   : > { %v8507_v20 = vadd.f32 %v1889_v59, %v1697_v29  ;;  %2363 = vmatprep.mubr.bf16.mxu1 %v10248_v14  ;;  %10253 = vst [vmem:[#allocation26_spill] sm:$0xff] %v8519_v36 }
 0x156   : > { %v1891_v23 = vpop.f32.mrf.mxu1 }
 0x157   : > { %v8512_v32 = vadd.f32 %v1891_v23, %v1699_v44  ;;  %v8529_v44 = vpop.f32.mrf.mxu0 }
 0x158   : > { %v8514_v33 = vpop.f32.mrf.mxu1 }
 0x159   : > { %10252 = vst [vmem:[#allocation25_spill] sm:$0xff] %v8512_v32  ;;  %v8538_v51 = vpop.f32.mrf.mxu0 }
 0x15a   : > { %v8521_v58 = vpop.f32.mrf.mxu1 }
 0x15b   : > { %10254 = vst [vmem:[#allocation27_spill] sm:$0xff] %v8521_v58  ;;  %v1717_v58 = vadd.f32 %v8349_v61, %v8262_v15 }
 0x15c   : > { %v1899_v29 = vpop.f32.mrf.mxu1  ;;  %6408 = vmatmul.mubr.msk.bf16.gmra.mxu1 %vm1603_vm0, %v7548_v7 }
 0x15d   : > { %v8526_v59 = vadd.f32 %v1899_v29, %v1707_v3  ;;  %2373 = vmatprep.mubr.bf16.mxu1 %v10248_v14  ;;  %v1719_v3 = vadd.f32 %v8355_v0, %v8265_v16 }
 0x15e   : > { %v1901_v23 = vpop.f32.mrf.mxu1 }
 0x15f   : > { %10255 = vst [vmem:[#allocation28_spill] sm:$0xff] %v8526_v59  ;;  %v8531_v32 = vadd.f32 %v1901_v23, %v1709_v63  ;;  %v8548_v63 = vpop.f32.mrf.mxu0  ;;  %v7552_v59 = vld [vmem:[%s7874_s14 + $0x2b8] ss:$28 sps:$4 sm:$0xff]  }
 0x160   : > { %v8533_v48 = vpop.f32.mrf.mxu1 }
 0x161   : > { %10256 = vst [vmem:[#allocation29_spill] sm:$0xff] %v8531_v32  ;;  %10257 = vst [vmem:[#allocation30_spill] sm:$0xff] %v8533_v48  ;;  %v8557_v0 = vpop.f32.mrf.mxu0 }
 0x162   : > { %v8540_v36 = vpop.f32.mrf.mxu1 }
 0x163   : > { %10258 = vst [vmem:[#allocation31_spill] sm:$0xff] %v8540_v36  ;;  %v1727_v36 = vadd.f32 %v8378_v18, %v8262_v15 }
 0x164   : > { %v1909_v7 = vpop.f32.mrf.mxu1  ;;  %6409 = vmatmul.mubr.msk.bf16.gmra.mxu1 %vm1603_vm0, %v7549_v54  ;;  %v1729_v54 = vadd.f32 %v8384_v25, %v8265_v16 }
 0x165   : > { %v8545_v29 = vadd.f32 %v1909_v7, %v1717_v58  ;;  %2383 = vmatprep.mubr.bf16.mxu1 %v10248_v14 }
 0x166   : > { %v1911_v23 = vpop.f32.mrf.mxu1 }
 0x167   : > { %10259 = vst [vmem:[#allocation32_spill] sm:$0xff] %v8545_v29  ;;  %v8550_v32 = vadd.f32 %v1911_v23, %v1719_v3  ;;  %v8567_v3 = vpop.f32.mrf.mxu0  ;;  %v7553_v29 = vld [vmem:[%s7874_s14 + $0x2f0] ss:$28 sps:$4 sm:$0xff]  }
 0x168   : > { %v8552_v61 = vpop.f32.mrf.mxu1 }
 0x169   : > { %10260 = vst [vmem:[#allocation33_spill] sm:$0xff] %v8550_v32  ;;  %10261 = vst [vmem:[#allocation34_spill] sm:$0xff] %v8552_v61  ;;  %v8576_v25 = vpop.f32.mrf.mxu0 }
 0x16a   : > { %v8559_v48 = vpop.f32.mrf.mxu1 }
 0x16b   : > { %10262 = vst [vmem:[#allocation35_spill] sm:$0xff] %v8559_v48  ;;  %v1737_v48 = vadd.f32 %v8401_v47, %v8262_v15 }
 0x16c   : > { %v1919_v58 = vpop.f32.mrf.mxu1  ;;  %6410 = vmatmul.mubr.msk.bf16.gmra.mxu1 %vm1603_vm0, %v7552_v59 }
 0x16d   : > { %v8564_v7 = vadd.f32 %v1919_v58, %v1727_v36  ;;  %2393 = vmatprep.mubr.bf16.mxu1 %v10248_v14  ;;  %v1739_v36 = vadd.f32 %v8407_v55, %v8265_v16 }
 0x16e   : > { %v1921_v23 = vpop.f32.mrf.mxu1 }
 0x16f   : > { %10263 = vst [vmem:[#allocation36_spill] sm:$0xff] %v8564_v7  ;;  %v8569_v32 = vadd.f32 %v1921_v23, %v1729_v54  ;;  %v8586_v54 = vpop.f32.mrf.mxu0  ;;  %v7556_v7 = vld [vmem:[%s7874_s14 + $0x328] ss:$28 sps:$4 sm:$0xff]  }
 0x170   : > { %v8571_v18 = vpop.f32.mrf.mxu1 }
 0x171   : > { %10264 = vst [vmem:[#allocation37_spill] sm:$0xff] %v8569_v32  ;;  %10265 = vst [vmem:[#allocation38_spill] sm:$0xff] %v8571_v18  ;;  %v8595_v55 = vpop.f32.mrf.mxu0 }
 0x172   : > { %v8578_v61 = vpop.f32.mrf.mxu1 }
 0x173   : > { %10266 = vst [vmem:[#allocation39_spill] sm:$0xff] %v8578_v61  ;;  %v1747_v61 = vadd.f32 %v8430_v35, %v8262_v15 }
 0x174   : > { %v1929_v59 = vpop.f32.mrf.mxu1  ;;  %6411 = vmatmul.mubr.msk.bf16.gmra.mxu1 %vm1603_vm0, %v7553_v29 }
 0x175   : > { %v8583_v58 = vadd.f32 %v1929_v59, %v1737_v48  ;;  %2403 = vmatprep.mubr.bf16.mxu1 %v10248_v14  ;;  %v1749_v48 = vadd.f32 %v8436_v53, %v8265_v16 }
 0x176   : > { %v1931_v23 = vpop.f32.mrf.mxu1 }
 0x177   : > { %10267 = vst [vmem:[#allocation40_spill] sm:$0xff] %v8583_v58  ;;  %v8588_v32 = vadd.f32 %v1931_v23, %v1739_v36  ;;  %v8605_v36 = vpop.f32.mrf.mxu0  ;;  %v7557_v58 = vld [vmem:[%s7874_s14 + $0x360] ss:$28 sps:$4 sm:$0xff]  }
 0x178   : > { %v8590_v47 = vpop.f32.mrf.mxu1 }
 0x179   : > { %10268 = vst [vmem:[#allocation41_spill] sm:$0xff] %v8588_v32  ;;  %10269 = vst [vmem:[#allocation42_spill] sm:$0xff] %v8590_v47  ;;  %v8614_v47 = vpop.f32.mrf.mxu0 }
 0x17a   : > { %v8597_v18 = vpop.f32.mrf.mxu1 }
 0x17b   : > { %10270 = vst [vmem:[#allocation43_spill] sm:$0xff] %v8597_v18  ;;  %v1757_v18 = vadd.f32 %v8453_v22, %v8262_v15 }
 0x17c   : > { %v1939_v29 = vpop.f32.mrf.mxu1  ;;  %6412 = vmatmul.mubr.msk.bf16.gmra.mxu1 %vm1603_vm0, %v7556_v7 }
 0x17d   : > { %v8602_v59 = vadd.f32 %v1939_v29, %v1747_v61  ;;  %2413 = vmatprep.mubr.bf16.mxu1 %v10248_v14  ;;  %v1759_v61 = vadd.f32 %v8459_v8, %v8265_v16 }
 0x17e   : > { %v1941_v23 = vpop.f32.mrf.mxu1 }
 0x17f   : > { %10271 = vst [vmem:[#allocation44_spill] sm:$0xff] %v8602_v59  ;;  %v8607_v32 = vadd.f32 %v1941_v23, %v1749_v48  ;;  %v8623_v48 = vpop.f32.mrf.mxu0 }
 0x180   : > { %v8609_v35 = vpop.f32.mrf.mxu1 }
 0x181   : > { %10272 = vst [vmem:[#allocation45_spill] sm:$0xff] %v8607_v32  ;;  %10273 = vst [vmem:[#allocation46_spill] sm:$0xff] %v8609_v35  ;;  %v8629_v22 = vpop.f32.mrf.mxu0 }
 0x182   : > { %v8616_v53 = vpop.f32.mrf.mxu1 }
 0x183   : > { %10274 = vst [vmem:[#allocation47_spill] sm:$0xff] %v8616_v53  ;;  %v8636_v8 = vpop.f32.mrf.mxu0 }
 0x184   : > { %v1949_v7 = vpop.f32.mrf.mxu1  ;;  %6413 = vmatmul.mubr.msk.bf16.gmra.mxu1 %vm1603_vm0, %v7557_v58 }
 0x185   : > { %v8621_v29 = vadd.f32 %v1949_v7, %v1757_v18 }
 0x186   : > { %v1951_v23 = vpop.f32.mrf.mxu1 }
 0x187   : > { %10275 = vst [vmem:[#allocation48_spill] sm:$0xff] %v8621_v29  ;;  %v8625_v14 = vadd.f32 %v1951_v23, %v1759_v61  ;;  %v8644_v23 = vpop.f32.mrf.mxu0 }
 0x188   : > { %v8627_v32 = vpop.f32.mrf.mxu1 }
 0x189   : > { %10276 = vst [vmem:[#allocation49_spill] sm:$0xff] %v8625_v14 }
 0x18a   : > { %v8631_v59 = vpop.f32.mrf.mxu1 }
 0x18b   : > { %10277 = vst [vmem:[#allocation50_spill] sm:$0xff] %v8631_v59 }
 0x18c   : > { %v1959_v53 = vpop.f32.mrf.mxu1 }
 0x18d   : > { %v8634_v35 = vadd.f32 %v1959_v53, %v8277_v21  ;;  %v8651_v21 = vpop.f32.mrf.mxu0 }
 0x18e   : > { %v1961_v58 = vpop.f32.mrf.mxu1 }
 0x18f   : > { %10278 = vst [vmem:[#allocation51_spill] sm:$0xff] %v8634_v35  ;;  %v8639_v18 = vadd.f32 %v1961_v58, %v8283_v24 }
 0x190   : > { %v1963_v7 = vpop.f32.mrf.mxu1 }
 0x191   : > { %10279 = vst [vmem:[#allocation52_spill] sm:$0xff] %v8639_v18  ;;  %v8642_v61 = vadd.f32 %v1963_v7, %v8289_v28  ;;  %v8659_v28 = vpop.f32.mrf.mxu0 }
 0x192   : > { %v8646_v14 = vpop.f32.mrf.mxu1 }
 0x193   : > { %10280 = vst [vmem:[#allocation53_spill] sm:$0xff] %v8642_v61 }
 0x194   : > { %v1969_v29 = vpop.f32.mrf.mxu1 }
 0x195   : > { %v8649_v59 = vadd.f32 %v1969_v29, %v8300_v34  ;;  %v8666_v34 = vpop.f32.mrf.mxu0 }
 0x196   : > { %v1971_v53 = vpop.f32.mrf.mxu1 }
 0x197   : > { %10281 = vst [vmem:[#allocation54_spill] sm:$0xff] %v8649_v59  ;;  %v8654_v35 = vadd.f32 %v1971_v53, %v8306_v37 }
 0x198   : > { %v1973_v24 = vpop.f32.mrf.mxu1 }
 0x199   : > { %10282 = vst [vmem:[#allocation55_spill] sm:$0xff] %v8654_v35  ;;  %v8657_v58 = vadd.f32 %v1973_v24, %v8312_v41  ;;  %v8674_v41 = vpop.f32.mrf.mxu0 }
 0x19a   : > { %v8661_v7 = vpop.f32.mrf.mxu1 }
 0x19b   : > { %10283 = vst [vmem:[#allocation56_spill] sm:$0xff] %v8657_v58 }
 0x19c   : > { %v1979_v61 = vpop.f32.mrf.mxu1 }
 0x19d   : > { %v8664_v18 = vadd.f32 %v1979_v61, %v8329_v49  ;;  %v8681_v49 = vpop.f32.mrf.mxu0 }
 0x19e   : > { %v1981_v29 = vpop.f32.mrf.mxu1 }
 0x19f   : > { %10284 = vst [vmem:[#allocation57_spill] sm:$0xff] %v8664_v18  ;;  %v8669_v59 = vadd.f32 %v1981_v29, %v8335_v52 }
 0x1a0   : > { %v1983_v37 = vpop.f32.mrf.mxu1 }
 0x1a1   : > { %10285 = vst [vmem:[#allocation58_spill] sm:$0xff] %v8669_v59  ;;  %v8672_v53 = vadd.f32 %v1983_v37, %v8341_v56  ;;  %v8689_v56 = vpop.f32.mrf.mxu0 }
 0x1a2   : > { %v8676_v24 = vpop.f32.mrf.mxu1 }
 0x1a3   : > { %10286 = vst [vmem:[#allocation59_spill] sm:$0xff] %v8672_v53 }
 0x1a4   : > { %v1989_v58 = vpop.f32.mrf.mxu1 }
 0x1a5   : > { %v8679_v35 = vadd.f32 %v1989_v58, %v8352_v62  ;;  %v8696_v62 = vpop.f32.mrf.mxu0 }
 0x1a6   : > { %v1991_v61 = vpop.f32.mrf.mxu1 }
 0x1a7   : > { %10287 = vst [vmem:[#allocation60_spill] sm:$0xff] %v8679_v35  ;;  %v8684_v18 = vadd.f32 %v1991_v61, %v8358_v1 }
 0x1a8   : > { %v1993_v52 = vpop.f32.mrf.mxu1 }
 0x1a9   : > { %10288 = vst [vmem:[#allocation61_spill] sm:$0xff] %v8684_v18  ;;  %v8687_v29 = vadd.f32 %v1993_v52, %v8364_v5  ;;  %v8704_v5 = vpop.f32.mrf.mxu0 }
 0x1aa   : > { %v8691_v37 = vpop.f32.mrf.mxu1 }
 0x1ab   : > { %10289 = vst [vmem:[#allocation62_spill] sm:$0xff] %v8687_v29 }
 0x1ac   : > { %v1999_v53 = vpop.f32.mrf.mxu1 }
 0x1ad   : > { %v8694_v59 = vadd.f32 %v1999_v53, %v8381_v19  ;;  %v7568_v19 = vld [vmem:[%s10213_s3 + $0x38] sm:$0xff]   ;;  %v8714_v53 = vpop.f32.mrf.mxu0 }
 0x1ae   : > { %v2001_v58 = vpop.f32.mrf.mxu1  ;;  %7107 = vmatprep.subr.bf16.mxu1 %v7568_v19 }
 0x1af   : > { %v8699_v35 = vadd.f32 %v2001_v58, %v8387_v27  ;;  %7108 = vmatpush3.bf16.msra.mxu1 %v7568_v19 }
 0x1b0   : > { %v2003_v1 = vpop.f32.mrf.mxu1 }
 0x1b1   : > { %10290 = vst [vmem:[#allocation63_spill] sm:$0xff] %v8699_v35  ;;  %v8702_v61 = vadd.f32 %v2003_v1, %v8393_v38 }
 0x1b2   : > { %v8706_v52 = vpop.f32.mrf.mxu1 }
 0x1b3   : > { %10291 = vst [vmem:[#allocation64_spill] sm:$0xff] %v8702_v61  ;;  %10292 = vst [vmem:[#allocation65_spill] sm:$0xff] %v8706_v52  ;;  %v8722_v61 = vpop.f32.mrf.mxu0 }
 0x1b4   : > { %v2009_v29 = vpop.f32.mrf.mxu1 }
 0x1b5   : > { %v8709_v18 = vadd.f32 %v2009_v29, %v8404_v50  ;;  %v8729_v35 = vpop.f32.mrf.mxu0 }
 0x1b6   : > { %v2011_v27 = vpop.f32.mrf.mxu1 }
 0x1b7   : > { %10293 = vst [vmem:[#allocation66_spill] sm:$0xff] %v8709_v18  ;;  %v8717_v58 = vadd.f32 %v2011_v27, %v8410_v57 }
 0x1b8   : > { %v2013_v38 = vpop.f32.mrf.mxu1 }
 0x1b9   : > { %10294 = vst [vmem:[#allocation67_spill] sm:$0xff] %v8717_v58  ;;  %v8720_v1 = vadd.f32 %v2013_v38, %v8416_v4  ;;  %v8737_v4 = vpop.f32.mrf.mxu0 }
 0x1ba   : > { %v8724_v50 = vpop.f32.mrf.mxu1 }
 0x1bb   : > { %10295 = vst [vmem:[#allocation68_spill] sm:$0xff] %v8720_v1 }
 0x1bc   : > { %v2019_v29 = vpop.f32.mrf.mxu1 }
 0x1bd   : > { %v8727_v18 = vadd.f32 %v2019_v29, %v8433_v40  ;;  %v7569_v40 = vld [vmem:[%s10213_s3 + $0x30] sm:$0xff]   ;;  %v8747_v29 = vpop.f32.mrf.mxu0 }
 0x1be   : > { %v2021_v52 = vpop.f32.mrf.mxu1  ;;  %7109 = vmatprep.subr.bf16.mxu1 %v7569_v40 }
 0x1bf   : > { %v8732_v57 = vadd.f32 %v2021_v52, %v8439_v60  ;;  %v1691_v52 = vadd.f32 %v8285_v26, %v8262_v15  ;;  %7110 = vmatpush3.bf16.msra.mxu1 %v7569_v40  ;;  %v2073_v26 = vadd.f32 %v8486_v9, %v8488_v31 }
 0x1c0   : > { %v2023_v27 = vpop.f32.mrf.mxu1 }
 0x1c1   : > { %10296 = vst [vmem:[#allocation69_spill] sm:$0xff] %v8732_v57  ;;  %v8735_v19 = vadd.f32 %v2023_v27, %v8445_v11  ;;  %v1884_v57 = vadd.f32 %v8495_v12, %v1691_v52  ;;  %v1703_v12 = vadd.f32 %v8314_v43, %v8265_v16  ;;  %v7570_v52 = vld [vmem:[%s10213_s3 + $0x28] sm:$0xff]  }
 0x1c2   : > { %v8739_v38 = vpop.f32.mrf.mxu1  ;;  %7111 = vmatprep.subr.bf16.mxu1 %v7570_v52 }
 0x1c3   : > { %10297 = vst [vmem:[#allocation70_spill] sm:$0xff] %v8735_v19  ;;  %10298 = vst [vmem:[#allocation71_spill] sm:$0xff] %v8739_v38  ;;  %7112 = vmatpush3.bf16.msra.mxu1 %v7570_v52 }
 0x1c4   : > { %v2029_v1 = vpop.f32.mrf.mxu1 }
 0x1c5   : > { %v8742_v58 = vadd.f32 %v2029_v1, %v8456_v46  ;;  %v1693_v46 = vadd.f32 %v8291_v30, %v8265_v16  ;;  %v1701_v30 = vadd.f32 %v8308_v39, %v8262_v15 }
 0x1c6   : > { %v2031_v60 = vpop.f32.mrf.mxu1 }
 0x1c7   : > { %10299 = vst [vmem:[#allocation72_spill] sm:$0xff] %v8742_v58  ;;  %v8752_v11 = vadd.f32 %v2031_v60, %v8462_v6  ;;  %v8759_v58 = vpop.f32.mrf.mxu0  ;;  %v1886_v6 = vadd.f32 %v8500_v42, %v1693_v46 }
 0x1c8   : > { %v2033_v27 = vpop.f32.mrf.mxu1 }
 0x1c9   : > { %10300 = vst [vmem:[#allocation73_spill] sm:$0xff] %v8752_v11  ;;  %v8757_v1 = vadd.f32 %v2033_v27, %v8470_v17  ;;  %v8767_v60 = vpop.f32.mrf.mxu0  ;;  %v2075_v17 = vadd.f32 %v8491_v10, %v8493_v45  ;;  %v2077_v27 = vadd.f32 %v8502_v2, %v1884_v57  ;;  %v2079_v9 = vadd.f32 %v8510_v13, %v1886_v6  ;;  %v7571_v45 = vld [vmem:[%s10213_s3 + $0x20] sm:$0xff]  }
 0x1ca   : > { %v8761_v19 = vpop.f32.mrf.mxu1  ;;  %v1894_v10 = vadd.f32 %v8514_v33, %v1701_v30  ;;  %v10303_v13 = vld [vmem:[#allocation26_spill] sm:$0xff]  ;;  %7113 = vmatprep.subr.bf16.mxu1 %v7571_v45  ;;  %v10305_v33 = vld [vmem:[#allocation7_spill] sm:$0xff] }
 0x1cb   : > { %10301 = vst [vmem:[#allocation74_spill] sm:$0xff] %v8757_v1  ;;  %10302 = vst [vmem:[#allocation75_spill] sm:$0xff] %v8761_v19  ;;  %v8780_v46 = vpop.f32.mrf.mxu0  ;;  %v7572_v19 = vld [vmem:[%s10213_s3 + $0x18] sm:$0xff]   ;;  %7114 = vmatpush3.bf16.msra.mxu1 %v7571_v45  ;;  %v10309_v45 = vld [vmem:[#allocation28_spill] sm:$0xff] }
 0x1cc   : > { %v2265_v38 = vpop.f32.mrf.mxu1  ;;  %v2087_v52 = vadd.f32 %v8538_v51, %v1894_v10  ;;  %7115 = vmatprep.subr.bf16.mxu1 %v7572_v19  ;;  %v10308_v10 = vld [vmem:[#allocation30_spill] sm:$0xff] }
 0x1cd   : > { %v2266_v1 = vadd.f32 %v2265_v38, %v2073_v26  ;;  %v2083_v38 = vadd.f32 %v10303_v13, %v8507_v20  ;;  %v10304_v26 = vld [vmem:[#allocation27_spill] sm:$0xff]  ;;  %v8794_v30 = vpop.f32.mrf.mxu0 }
 0x1ce   : > { %v2267_v40 = vpop.f32.mrf.mxu1  ;;  %v1896_v6 = vadd.f32 %v10304_v26, %v1703_v12 }
 0x1cf   : > { %v2268_v31 = vadd.f32 %v2267_v40, %v2075_v17  ;;  %v2424_v2 = vmax.f32 %v2266_v1, 0.0  ;;  %v1711_v1 = vadd.f32 %v10305_v33, %v8262_v15  ;;  %v7573_v33 = vld [vmem:[%s10213_s3 + $0x10] sm:$0xff]   ;;  %7116 = vmatpush3.bf16.msra.mxu1 %v7572_v19 }
 0x1d0   : > { %v2269_v11 = vpop.f32.mrf.mxu1  ;;  %7117 = vmatprep.subr.bf16.mxu1 %v7573_v33 }
 0x1d1   : > { %v2270_v42 = vadd.f32 %v2269_v11, %v2077_v27  ;;  %v2425_v40 = vmax.f32 %v2268_v31, 0.0 }
 0x1d2   : > { %v2271_v39 = vpop.f32.mrf.mxu1 }
 0x1d3   : > { %v2426_v57 = vmax.f32 %v2270_v42, 0.0  ;;  %v2272_v43 = vadd.f32 %v2271_v39, %v2079_v9  ;;  %v10306_v42 = vld [vmem:[#allocation25_spill] sm:$0xff]  ;;  %v10307_v39 = vld [vmem:[#allocation8_spill] sm:$0xff]  ;;  %7118 = vmatpush3.bf16.msra.mxu1 %v7573_v33  ;;  %v10316_v33 = vld [vmem:[#allocation35_spill] sm:$0xff] }
 0x1d4   : > { %v2275_v11 = vpop.f32.mrf.mxu1  ;;  %v2085_v20 = vadd.f32 %v8529_v44, %v10306_v42  ;;  %v8805_v44 = vpop.f32.mrf.mxu0 }
 0x1d5   : > { %v2488_v17 = vpack.c.bf16 %v2426_v57, %v2424_v2  ;;  %v2427_v27 = vmax.f32 %v2272_v43, 0.0  ;;  %v2276_v12 = vadd.f32 %v2275_v11, %v2083_v38  ;;  %v1713_v2 = vadd.f32 %v10307_v39, %v8265_v16 }
 0x1d6   : > { %v2277_v9 = vpop.f32.mrf.mxu1  ;;  %v2089_v43 = vadd.f32 %v8548_v63, %v1896_v6  ;;  %v1904_v38 = vadd.f32 %v10308_v10, %v1711_v1  ;;  %v2093_v63 = vadd.f32 %v8557_v0, %v10309_v45  ;;  %v10311_v1 = vld [vmem:[#allocation10_spill] sm:$0xff]  ;;  %v8816_v39 = vpop.f32.mrf.mxu0 }
 0x1d7   : > { %v2489_v31 = vpack.c.bf16 %v2427_v27, %v2425_v40  ;;  %v2278_v13 = vadd.f32 %v2277_v9, %v2085_v20  ;;  %v2428_v11 = vmax.f32 %v2276_v12, 0.0  ;;  %v10310_v9 = vld [vmem:[#allocation31_spill] sm:$0xff]  ;;  %v1721_v12 = vadd.f32 %v10311_v1, %v8262_v15 }
 0x1d8   : > { %v2279_v57 = vpop.f32.mrf.mxu1  ;;  %v1906_v42 = vadd.f32 %v10310_v9, %v1713_v2  ;;  %v2097_v19 = vadd.f32 %v8576_v25, %v1904_v38  ;;  %v8824_v45 = vpop.f32.mrf.mxu0 }
 0x1d9   : > { %v2280_v26 = vadd.f32 %v2279_v57, %v2087_v52  ;;  %2681 = vmatprep.mubr.bf16.mxu0 %v2489_v31  ;;  %v2429_v20 = vmax.f32 %v2278_v13, 0.0 }
 0x1da   : > { %v2281_v51 = vpop.f32.mrf.mxu1  ;;  %2682 = vmatmul.mubr.bf16.vlgmr.msra.gmra.mxu0 %v2488_v17  ;;  %v7574_v17 = vld [vmem:[%s10213_s3 + $0x8] sm:$0xff]  }
 0x1db   : > { %v2430_v40 = vmax.f32 %v2280_v26, 0.0  ;;  %v2282_v27 = vadd.f32 %v2281_v51, %v2089_v43  ;;  %v10312_v43 = vld [vmem:[#allocation29_spill] sm:$0xff]  ;;  %v10313_v26 = vld [vmem:[#allocation11_spill] sm:$0xff]  ;;  %7119 = vmatprep.subr.bf16.mxu1 %v7574_v17 }
 0x1dc   : > { %v2285_v6 = vpop.f32.mrf.mxu1  ;;  %v2095_v0 = vadd.f32 %v8567_v3, %v10312_v43  ;;  %v1723_v51 = vadd.f32 %v10313_v26, %v8265_v16  ;;  %v10314_v3 = vld [vmem:[#allocation34_spill] sm:$0xff]  ;;  %7120 = vmatpush3.bf16.msra.mxu1 %v7574_v17 }
 0x1dd   : > { %v2490_v52 = vpack.c.bf16 %v2430_v40, %v2428_v11  ;;  %v2431_v31 = vmax.f32 %v2282_v27, 0.0  ;;  %v2286_v2 = vadd.f32 %v2285_v6, %v2093_v63  ;;  %v2099_v11 = vadd.f32 %v8586_v54, %v1906_v42  ;;  %v10315_v6 = vld [vmem:[#allocation32_spill] sm:$0xff]  ;;  %v10319_v17 = vld [vmem:[#allocation14_spill] sm:$0xff] }
 0x1de   : > { %v2287_v57 = vpop.f32.mrf.mxu1  ;;  %v1914_v1 = vadd.f32 %v10314_v3, %v1721_v12  ;;  %v1916_v54 = vadd.f32 %v10316_v33, %v1723_v51  ;;  %v10318_v12 = vld [vmem:[#allocation33_spill] sm:$0xff]  ;;  %v1733_v51 = vadd.f32 %v10319_v17, %v8265_v16  ;;  %v10322_v33 = vld [vmem:[#allocation39_spill] sm:$0xff] }
 0x1df   : > { %v2491_v13 = vpack.c.bf16 %v2431_v31, %v2429_v20  ;;  %v2288_v40 = vadd.f32 %v2287_v57, %v2095_v0  ;;  %v2432_v25 = vmax.f32 %v2286_v2, 0.0  ;;  %v2103_v20 = vadd.f32 %v8595_v55, %v10315_v6  ;;  %v10317_v0 = vld [vmem:[#allocation13_spill] sm:$0xff] }
 0x1e0   : > { %v2289_v10 = vpop.f32.mrf.mxu1  ;;  %v2105_v2 = vadd.f32 %v8605_v36, %v10318_v12  ;;  %v2107_v26 = vadd.f32 %v8614_v47, %v1914_v1  ;;  %v10321_v1 = vld [vmem:[#allocation36_spill] sm:$0xff] }
 0x1e1   : > { %v2290_v27 = vadd.f32 %v2289_v10, %v2097_v19  ;;  %2689 = vmatprep.mubr.bf16.mxu0 %v2491_v13  ;;  %v2433_v42 = vmax.f32 %v2288_v40, 0.0  ;;  %v1731_v19 = vadd.f32 %v10317_v0, %v8262_v15  ;;  %v8832_v13 = vpop.f32.mrf.mxu0  ;;  %v2109_v40 = vadd.f32 %v8623_v48, %v1916_v54  ;;  %v10323_v0 = vld [vmem:[#allocation16_spill] sm:$0xff] }
 0x1e2   : > { %v2291_v9 = vpop.f32.mrf.mxu1  ;;  %2690 = vmatmul.mubr.bf16.gmra.mxu0 %v2490_v52 }
 0x1e3   : > { %v2434_v38 = vmax.f32 %v2290_v27, 0.0  ;;  %v2292_v63 = vadd.f32 %v2291_v9, %v2099_v11  ;;  %v8840_v3 = vpop.f32.mrf.mxu0 }
 0x1e4   : > { %v2295_v31 = vpop.f32.mrf.mxu1 }
 0x1e5   : > { %v2492_v57 = vpack.c.bf16 %v2434_v38, %v2432_v25  ;;  %v2435_v43 = vmax.f32 %v2292_v63, 0.0  ;;  %v2296_v10 = vadd.f32 %v2295_v31, %v2103_v20  ;;  %v10320_v38 = vld [vmem:[#allocation38_spill] sm:$0xff]  ;;  %v2113_v20 = vadd.f32 %v8629_v22, %v10321_v1  ;;  %v8848_v12 = vpop.f32.mrf.mxu0 }
 0x1e6   : > { %v2297_v52 = vpop.f32.mrf.mxu1  ;;  %v1924_v63 = vadd.f32 %v10320_v38, %v1731_v19  ;;  %v10326_v38 = vld [vmem:[#allocation42_spill] sm:$0xff] }
 0x1e7   : > { %v2493_v55 = vpack.c.bf16 %v2435_v43, %v2433_v42  ;;  %v2298_v27 = vadd.f32 %v2297_v52, %v2105_v2  ;;  %v2436_v36 = vmax.f32 %v2296_v10, 0.0  ;;  %v1926_v42 = vadd.f32 %v10322_v33, %v1733_v51  ;;  %v10324_v2 = vld [vmem:[#allocation37_spill] sm:$0xff] }
 0x1e8   : > { %v2299_v11 = vpop.f32.mrf.mxu1  ;;  %v1741_v52 = vadd.f32 %v10323_v0, %v8262_v15  ;;  %v2115_v19 = vadd.f32 %v8636_v8, %v10324_v2 }
 0x1e9   : > { %v2300_v9 = vadd.f32 %v2299_v11, %v2107_v26  ;;  %2697 = vmatprep.mubr.bf16.mxu0 %v2493_v55  ;;  %v2437_v43 = vmax.f32 %v2298_v27, 0.0  ;;  %v2117_v26 = vadd.f32 %v8644_v23, %v1924_v63  ;;  %v10325_v11 = vld [vmem:[#allocation17_spill] sm:$0xff]  ;;  %v2119_v51 = vadd.f32 %v8651_v21, %v1926_v42  ;;  %v10327_v63 = vld [vmem:[#allocation40_spill] sm:$0xff] }
 0x1ea   : > { %v2301_v25 = vpop.f32.mrf.mxu1  ;;  %2698 = vmatmul.mubr.bf16.gmra.mxu0 %v2492_v57  ;;  %v1743_v17 = vadd.f32 %v10325_v11, %v8265_v16 }
 0x1eb   : > { %v2438_v6 = vmax.f32 %v2300_v9, 0.0  ;;  %v2302_v47 = vadd.f32 %v2301_v25, %v2109_v40  ;;  %v8856_v9 = vpop.f32.mrf.mxu0 }
 0x1ec   : > { %v2305_v31 = vpop.f32.mrf.mxu1 }
 0x1ed   : > { %v2494_v48 = vpack.c.bf16 %v2438_v6, %v2436_v36  ;;  %v2439_v54 = vmax.f32 %v2302_v47, 0.0  ;;  %v2306_v10 = vadd.f32 %v2305_v31, %v2113_v20  ;;  %v1934_v36 = vadd.f32 %v10326_v38, %v1741_v52  ;;  %v10328_v20 = vld [vmem:[#allocation43_spill] sm:$0xff]  ;;  %v8864_v0 = vpop.f32.mrf.mxu0 }
 0x1ee   : > { %v2307_v57 = vpop.f32.mrf.mxu1  ;;  %v2123_v47 = vadd.f32 %v8659_v28, %v10327_v63  ;;  %v1936_v31 = vadd.f32 %v10328_v20, %v1743_v17  ;;  %v10335_v20 = vld [vmem:[#allocation22_spill] sm:$0xff] }
 0x1ef   : > { %v2495_v55 = vpack.c.bf16 %v2439_v54, %v2437_v43  ;;  %v2308_v40 = vadd.f32 %v2307_v57, %v2115_v19  ;;  %v2440_v8 = vmax.f32 %v2306_v10, 0.0  ;;  %v10329_v43 = vld [vmem:[#allocation19_spill] sm:$0xff]  ;;  %v10330_v57 = vld [vmem:[#allocation41_spill] sm:$0xff]  ;;  %v2127_v2 = vadd.f32 %v8674_v41, %v1934_v36  ;;  %v10331_v10 = vld [vmem:[#allocation20_spill] sm:$0xff] }
 0x1f0   : > { %v2309_v22 = vpop.f32.mrf.mxu1  ;;  %v1751_v54 = vadd.f32 %v10329_v43, %v8262_v15  ;;  %v2125_v52 = vadd.f32 %v8666_v34, %v10330_v57  ;;  %v10333_v36 = vld [vmem:[#allocation44_spill] sm:$0xff] }
 0x1f1   : > { %v2310_v27 = vadd.f32 %v2309_v22, %v2117_v26  ;;  %2705 = vmatprep.mubr.bf16.mxu0 %v2495_v55  ;;  %v2441_v33 = vmax.f32 %v2308_v40, 0.0  ;;  %v1753_v55 = vadd.f32 %v10331_v10, %v8265_v16  ;;  %v2129_v22 = vadd.f32 %v8681_v49, %v1936_v31 }
 0x1f2   : > { %v2311_v25 = vpop.f32.mrf.mxu1  ;;  %2706 = vmatmul.mubr.bf16.gmra.mxu0 %v2494_v48  ;;  %v1761_v31 = vadd.f32 %v10335_v20, %v8262_v15 }
 0x1f3   : > { %v2442_v6 = vmax.f32 %v2310_v27, 0.0  ;;  %v2312_v23 = vadd.f32 %v2311_v25, %v2119_v51  ;;  %v8872_v51 = vpop.f32.mrf.mxu0  ;;  %v10332_v27 = vld [vmem:[#allocation46_spill] sm:$0xff] }
 0x1f4   : > { %v2315_v1 = vpop.f32.mrf.mxu1  ;;  %v1944_v25 = vadd.f32 %v10332_v27, %v1751_v54  ;;  %v10339_v27 = vld [vmem:[#allocation50_spill] sm:$0xff] }
 0x1f5   : > { %v2496_v21 = vpack.c.bf16 %v2442_v6, %v2440_v8  ;;  %v2443_v42 = vmax.f32 %v2312_v23, 0.0  ;;  %v2316_v19 = vadd.f32 %v2315_v1, %v2123_v47  ;;  %v2133_v8 = vadd.f32 %v8689_v56, %v10333_v36  ;;  %v10334_v23 = vld [vmem:[#allocation47_spill] sm:$0xff]  ;;  %v10340_v36 = vld [vmem:[#allocation49_spill] sm:$0xff] }
 0x1f6   : > { %v2317_v48 = vpop.f32.mrf.mxu1  ;;  %v1946_v63 = vadd.f32 %v10334_v23, %v1753_v55  ;;  %v2137_v54 = vadd.f32 %v8704_v5, %v1944_v25  ;;  %v1954_v55 = vadd.f32 %v8627_v32, %v1761_v31 }
 0x1f7   : > { %v2497_v26 = vpack.c.bf16 %v2443_v42, %v2441_v33  ;;  %v2318_v11 = vadd.f32 %v2317_v48, %v2125_v52  ;;  %v2444_v34 = vmax.f32 %v2316_v19, 0.0  ;;  %v8880_v33 = vpop.f32.mrf.mxu0  ;;  %v10336_v42 = vld [vmem:[#allocation45_spill] sm:$0xff]  ;;  %v10337_v52 = vld [vmem:[#allocation23_spill] sm:$0xff] }
 0x1f8   : > { %v2319_v28 = vpop.f32.mrf.mxu1  ;;  %v2135_v43 = vadd.f32 %v8696_v62, %v10336_v42  ;;  %v2139_v19 = vadd.f32 %v8714_v53, %v1946_v63  ;;  %v2147_v32 = vadd.f32 %v8737_v4, %v1954_v55  ;;  %v10342_v4 = vld [vmem:[#allocation5_spill] sm:$0xff] }
 0x1f9   : > { %v2320_v17 = vadd.f32 %v2319_v28, %v2127_v2  ;;  %2713 = vmatprep.mubr.bf16.mxu0 %v2497_v26  ;;  %v2445_v47 = vmax.f32 %v2318_v11, 0.0  ;;  %v1763_v2 = vadd.f32 %v10337_v52, %v8265_v16  ;;  %v8888_v15 = vpop.f32.mrf.mxu0  ;;  %v10338_v11 = vld [vmem:[#allocation48_spill] sm:$0xff] }
 0x1fa   : > { %v2321_v40 = vpop.f32.mrf.mxu1  ;;  %2714 = vmatmul.mubr.bf16.gmra.mxu0 %v2496_v21 }
 0x1fb   : > { %v2446_v38 = vmax.f32 %v2320_v17, 0.0  ;;  %v2322_v41 = vadd.f32 %v2321_v40, %v2129_v22  ;;  %v2143_v17 = vadd.f32 %v8722_v61, %v10338_v11  ;;  %v1956_v16 = vadd.f32 %v10339_v27, %v1763_v2 }
 0x1fc   : > { %v2325_v6 = vpop.f32.mrf.mxu1 }
 0x1fd   : > { %v2498_v49 = vpack.c.bf16 %v2446_v38, %v2444_v34  ;;  %v2447_v1 = vmax.f32 %v2322_v41, 0.0  ;;  %v2326_v48 = vadd.f32 %v2325_v6, %v2133_v8  ;;  %v8894_v38 = vpop.f32.mrf.mxu0  ;;  %v2145_v8 = vadd.f32 %v8729_v35, %v10340_v36 }
 0x1fe   : > { %v2327_v21 = vpop.f32.mrf.mxu1 }
 0x1ff   : > { %v2499_v57 = vpack.c.bf16 %v2447_v1, %v2445_v47  ;;  %v2328_v26 = vadd.f32 %v2327_v21, %v2135_v43  ;;  %v2448_v62 = vmax.f32 %v2326_v48, 0.0  ;;  %v2149_v47 = vadd.f32 %v8747_v29, %v1956_v16  ;;  %v8900_v1 = vpop.f32.mrf.mxu0  ;;  %v10341_v43 = vld [vmem:[#allocation51_spill] sm:$0xff] }
 0x200   : > { %v2329_v56 = vpop.f32.mrf.mxu1  ;;  %v2153_v35 = vadd.f32 %v8759_v58, %v10341_v43  ;;  %v1966_v48 = vadd.f32 %v8646_v14, %v10342_v4  ;;  %v10349_v4 = vld [vmem:[#allocation57_spill] sm:$0xff] }
 0x201   : > { %v2330_v28 = vadd.f32 %v2329_v56, %v2137_v54  ;;  %2721 = vmatprep.mubr.bf16.mxu0 %v2499_v57  ;;  %v2449_v25 = vmax.f32 %v2328_v26, 0.0  ;;  %v8906_v52 = vpop.f32.mrf.mxu0 }
 0x202   : > { %v2331_v10 = vpop.f32.mrf.mxu1  ;;  %2722 = vmatmul.mubr.bf16.gmra.mxu0 %v2498_v49  ;;  %v2159_v58 = vadd.f32 %v8794_v30, %v1966_v48 }
 0x203   : > { %v2450_v22 = vmax.f32 %v2330_v28, 0.0  ;;  %v2332_v5 = vadd.f32 %v2331_v10, %v2139_v19  ;;  %v10343_v19 = vld [vmem:[#allocation52_spill] sm:$0xff]  ;;  %v10344_v28 = vld [vmem:[#allocation53_spill] sm:$0xff]  ;;  %v8913_v14 = vpop.f32.mrf.mxu0 }
 0x204   : > { %v2335_v40 = vpop.f32.mrf.mxu1  ;;  %v2155_v26 = vadd.f32 %v8767_v60, %v10343_v19  ;;  %v2157_v10 = vadd.f32 %v8780_v46, %v10344_v28  ;;  %v10346_v46 = vld [vmem:[#allocation6_spill] sm:$0xff] }
 0x205   : > { %v2500_v53 = vpack.c.bf16 %v2450_v22, %v2448_v62  ;;  %v2451_v34 = vmax.f32 %v2332_v5, 0.0  ;;  %v2336_v6 = vadd.f32 %v2335_v40, %v2143_v17 }
 0x206   : > { %v2337_v41 = vpop.f32.mrf.mxu1 }
 0x207   : > { %v2501_v23 = vpack.c.bf16 %v2451_v34, %v2449_v25  ;;  %v2338_v61 = vadd.f32 %v2337_v41, %v2145_v8  ;;  %v2452_v31 = vmax.f32 %v2336_v6, 0.0  ;;  %v10345_v25 = vld [vmem:[#allocation54_spill] sm:$0xff]  ;;  %v1976_v34 = vadd.f32 %v8661_v7, %v10346_v46  ;;  %v8919_v8 = vpop.f32.mrf.mxu0  ;;  %v10347_v6 = vld [vmem:[#allocation55_spill] sm:$0xff] }
 0x208   : > { %v2339_v63 = vpop.f32.mrf.mxu1  ;;  %v2163_v60 = vadd.f32 %v8805_v44, %v10345_v25  ;;  %v10353_v25 = vld [vmem:[#allocation60_spill] sm:$0xff] }
 0x209   : > { %v2340_v49 = vadd.f32 %v2339_v63, %v2147_v32  ;;  %2729 = vmatprep.mubr.bf16.mxu0 %v2501_v23  ;;  %v2453_v57 = vmax.f32 %v2338_v61, 0.0  ;;  %v2165_v23 = vadd.f32 %v8816_v39, %v10347_v6  ;;  %v10348_v63 = vld [vmem:[#allocation56_spill] sm:$0xff]  ;;  %v2169_v44 = vadd.f32 %v8832_v13, %v1976_v34  ;;  %v8926_v7 = vpop.f32.mrf.mxu0 }
 0x20a   : > { %v2341_v20 = vpop.f32.mrf.mxu1  ;;  %2730 = vmatmul.mubr.bf16.gmra.mxu0 %v2500_v53  ;;  %v2173_v39 = vadd.f32 %v8840_v3, %v10349_v4 }
 0x20b   : > { %v2454_v21 = vmax.f32 %v2340_v49, 0.0  ;;  %v2342_v42 = vadd.f32 %v2341_v20, %v2149_v47  ;;  %v2167_v47 = vadd.f32 %v8824_v45, %v10348_v63  ;;  %v10350_v45 = vld [vmem:[#allocation9_spill] sm:$0xff] }
 0x20c   : > { %v2345_v54 = vpop.f32.mrf.mxu1 }
 0x20d   : > { %v2502_v56 = vpack.c.bf16 %v2454_v21, %v2452_v31  ;;  %v2455_v29 = vmax.f32 %v2342_v42, 0.0  ;;  %v2346_v55 = vadd.f32 %v2345_v54, %v2153_v35 }
 0x20e   : > { %v2347_v2 = vpop.f32.mrf.mxu1 }
 0x20f   : > { %v2503_v62 = vpack.c.bf16 %v2455_v29, %v2453_v57  ;;  %v2348_v5 = vadd.f32 %v2347_v2, %v2155_v26  ;;  %v2456_v40 = vmax.f32 %v2346_v55, 0.0  ;;  %v1986_v57 = vadd.f32 %v8676_v24, %v10350_v45  ;;  %v8932_v2 = vpop.f32.mrf.mxu0  ;;  %v10351_v26 = vld [vmem:[#allocation58_spill] sm:$0xff] }
 0x210   : > { %v2349_v22 = vpop.f32.mrf.mxu1  ;;  %v2175_v28 = vadd.f32 %v8848_v12, %v10351_v26  ;;  %v2183_v12 = vadd.f32 %v8872_v51, %v10353_v25 }
 0x211   : > { %v2350_v11 = vadd.f32 %v2349_v22, %v2157_v10  ;;  %2737 = vmatprep.mubr.bf16.mxu0 %v2503_v62  ;;  %v2457_v41 = vmax.f32 %v2348_v5, 0.0  ;;  %v10352_v10 = vld [vmem:[#allocation59_spill] sm:$0xff]  ;;  %v2179_v3 = vadd.f32 %v8864_v0, %v1986_v57  ;;  %v8939_v24 = vpop.f32.mrf.mxu0 }
 0x212   : > { %v2351_v17 = vpop.f32.mrf.mxu1  ;;  %2738 = vmatmul.mubr.bf16.gmra.mxu0 %v2502_v56  ;;  %v2177_v55 = vadd.f32 %v8856_v9, %v10352_v10  ;;  %v10354_v9 = vld [vmem:[#allocation12_spill] sm:$0xff] }
 0x213   : > { %v2458_v27 = vmax.f32 %v2350_v11, 0.0  ;;  %v2352_v16 = vadd.f32 %v2351_v17, %v2159_v58 }
 0x214   : > { %v2355_v53 = vpop.f32.mrf.mxu1 }
 0x215   : > { %v2504_v36 = vpack.c.bf16 %v2458_v27, %v2456_v40  ;;  %v2459_v30 = vmax.f32 %v2352_v16, 0.0  ;;  %v2356_v61 = vadd.f32 %v2355_v53, %v2163_v60  ;;  %v1996_v53 = vadd.f32 %v8691_v37, %v10354_v9 }
 0x216   : > { %v2357_v32 = vpop.f32.mrf.mxu1 }
 0x217   : > { %v2505_v49 = vpack.c.bf16 %v2459_v30, %v2457_v41  ;;  %v2358_v31 = vadd.f32 %v2357_v32, %v2165_v23  ;;  %v2460_v43 = vmax.f32 %v2356_v61, 0.0  ;;  %v7575_v41 = vld [vmem:[%s10213_s3] sm:$0xff]   ;;  %v10355_v32 = vld [vmem:[#allocation61_spill] sm:$0xff]  ;;  %v2189_v37 = vadd.f32 %v8894_v38, %v1996_v53  ;;  %v10364_v53 = vld [vmem:[#allocation68_spill] sm:$0xff] }
 0x218   : > { %v2359_v20 = vpop.f32.mrf.mxu1  ;;  %v2185_v6 = vadd.f32 %v8880_v33, %v10355_v32  ;;  %v10356_v23 = vld [vmem:[#allocation62_spill] sm:$0xff]  ;;  %7121 = vmatprep.subr.bf16.mxu1 %v7575_v41  ;;  %v2193_v33 = vadd.f32 %v8900_v1, %v8694_v59 }
 0x219   : > { %v2360_v21 = vadd.f32 %v2359_v20, %v2167_v47  ;;  %2745 = vmatprep.mubr.bf16.mxu0 %v2505_v49  ;;  %v2461_v56 = vmax.f32 %v2358_v31, 0.0  ;;  %v2187_v63 = vadd.f32 %v8888_v15, %v10356_v23  ;;  %7122 = vmatpush3.bf16.msra.mxu1 %v7575_v41 }
 0x21a   : > { %v2361_v42 = vpop.f32.mrf.mxu1  ;;  %2746 = vmatmul.mubr.bf16.gmra.mxu0 %v2504_v36  ;;  %v2208_v36 = vpop.f32.mrf.mxu0 }
 0x21b   : > { %v2462_v35 = vmax.f32 %v2360_v21, 0.0  ;;  %v2362_v54 = vadd.f32 %v2361_v42, %v2169_v44 }
 0x21c   : > { %v2365_v48 = vpop.f32.mrf.mxu1  ;;  %v2212_v44 = vpop.f32.mrf.mxu0 }
 0x21d   : > { %v2506_v29 = vpack.c.bf16 %v2462_v35, %v2460_v43  ;;  %v2463_v13 = vmax.f32 %v2362_v54, 0.0  ;;  %v2366_v62 = vadd.f32 %v2365_v48, %v2173_v39  ;;  %v10357_v35 = vld [vmem:[#allocation15_spill] sm:$0xff]  ;;  %v10358_v54 = vld [vmem:[#allocation65_spill] sm:$0xff] }
 0x21e   : > { %v2367_v19 = vpop.f32.mrf.mxu1  ;;  %v2006_v4 = vadd.f32 %v10358_v54, %v10357_v35  ;;  %v2214_v38 = vpop.f32.mrf.mxu0 }
 0x21f   : > { %v2507_v22 = vpack.c.bf16 %v2463_v13, %v2461_v56  ;;  %v2368_v5 = vadd.f32 %v2367_v19, %v2175_v28  ;;  %v2464_v40 = vmax.f32 %v2366_v62, 0.0  ;;  %v10359_v56 = vld [vmem:[#allocation63_spill] sm:$0xff]  ;;  %v10360_v13 = vld [vmem:[#allocation64_spill] sm:$0xff] }
 0x220   : > { %v2369_v58 = vpop.f32.mrf.mxu1  ;;  %v2197_v19 = vadd.f32 %v8913_v14, %v10360_v13  ;;  %v2199_v59 = vadd.f32 %v8919_v8, %v2006_v4  ;;  %v2216_v62 = vpop.f32.mrf.mxu0  ;;  %v10369_v13 = vld [vmem:[#allocation72_spill] sm:$0xff] }
 0x221   : > { %v2370_v11 = vadd.f32 %v2369_v58, %v2177_v55  ;;  %2753 = vmatprep.mubr.bf16.mxu0 %v2507_v22  ;;  %v2465_v46 = vmax.f32 %v2368_v5, 0.0 }
 0x222   : > { %v2371_v17 = vpop.f32.mrf.mxu1  ;;  %2754 = vmatmul.mubr.bf16.gmra.mxu0 %v2506_v29  ;;  %v2195_v29 = vadd.f32 %v8906_v52, %v10359_v56  ;;  %v2218_v8 = vpop.f32.mrf.mxu0 }
 0x223   : > { %v2466_v27 = vmax.f32 %v2370_v11, 0.0  ;;  %v2372_v16 = vadd.f32 %v2371_v17, %v2179_v3  ;;  %v10361_v11 = vld [vmem:[#allocation66_spill] sm:$0xff] }
 0x224   : > { %v2375_v60 = vpop.f32.mrf.mxu1  ;;  %v2203_v52 = vadd.f32 %v8926_v7, %v10361_v11 }
 0x225   : > { %v2508_v34 = vpack.c.bf16 %v2466_v27, %v2464_v40  ;;  %v2467_v0 = vmax.f32 %v2372_v16, 0.0  ;;  %v2376_v51 = vadd.f32 %v2375_v60, %v2183_v12  ;;  %v10362_v40 = vld [vmem:[#allocation18_spill] sm:$0xff]  ;;  %v10363_v60 = vld [vmem:[#allocation67_spill] sm:$0xff] }
 0x226   : > { %v2377_v30 = vpop.f32.mrf.mxu1  ;;  %v2016_v14 = vadd.f32 %v8724_v50, %v10362_v40  ;;  %v2205_v9 = vadd.f32 %v8932_v2, %v10363_v60  ;;  %v10365_v2 = vld [vmem:[#allocation21_spill] sm:$0xff] }
 0x227   : > { %v2509_v47 = vpack.c.bf16 %v2467_v0, %v2465_v46  ;;  %v2378_v49 = vadd.f32 %v2377_v30, %v2185_v6  ;;  %v2468_v21 = vmax.f32 %v2376_v51, 0.0  ;;  %v2207_v46 = vadd.f32 %v8939_v24, %v10364_v53  ;;  %v2222_v6 = vpop.f32.mrf.mxu0 }
 0x228   : > { %v2379_v61 = vpop.f32.mrf.mxu1  ;;  %v2209_v30 = vadd.f32 %v2208_v36, %v2016_v14 }
 0x229   : > { %v2380_v20 = vadd.f32 %v2379_v61, %v2187_v63  ;;  %2761 = vmatprep.mubr.bf16.mxu0 %v2509_v47  ;;  %v2469_v39 = vmax.f32 %v2378_v49, 0.0  ;;  %v2213_v47 = vadd.f32 %v2212_v44, %v8727_v18 }
 0x22a   : > { %v2381_v31 = vpop.f32.mrf.mxu1  ;;  %2762 = vmatmul.mubr.bf16.gmra.mxu0 %v2508_v34 }
 0x22b   : > { %v2470_v42 = vmax.f32 %v2380_v20, 0.0  ;;  %v2382_v43 = vadd.f32 %v2381_v31, %v2189_v37  ;;  %v10366_v37 = vld [vmem:[#allocation71_spill] sm:$0xff] }
 0x22c   : > { %v2385_v15 = vpop.f32.mrf.mxu1  ;;  %v2026_v49 = vadd.f32 %v10366_v37, %v10365_v2 }
 0x22d   : > { %v2510_v48 = vpack.c.bf16 %v2470_v42, %v2468_v21  ;;  %v2471_v45 = vmax.f32 %v2382_v43, 0.0  ;;  %v2386_v26 = vadd.f32 %v2385_v15, %v2193_v33  ;;  %v2224_v21 = vpop.f32.mrf.mxu0  ;;  %v10367_v42 = vld [vmem:[#allocation69_spill] sm:$0xff]  ;;  %v10368_v33 = vld [vmem:[#allocation70_spill] sm:$0xff] }
 0x22e   : > { %v2387_v57 = vpop.f32.mrf.mxu1  ;;  %v2215_v43 = vadd.f32 %v2214_v38, %v10367_v42  ;;  %v2217_v15 = vadd.f32 %v2216_v62, %v10368_v33  ;;  %v10371_v38 = vld [vmem:[#allocation75_spill] sm:$0xff] }
 0x22f   : > { %v2511_v28 = vpack.c.bf16 %v2471_v45, %v2469_v39  ;;  %v2388_v1 = vadd.f32 %v2387_v57, %v2195_v29  ;;  %v2472_v58 = vmax.f32 %v2386_v26, 0.0  ;;  %v2219_v39 = vadd.f32 %v2218_v8, %v2026_v49  ;;  %v2226_v18 = vpop.f32.mrf.mxu0 }
 0x230   : > { %v2389_v10 = vpop.f32.mrf.mxu1 }
 0x231   : > { %v2390_v55 = vadd.f32 %v2389_v10, %v2197_v19  ;;  %2769 = vmatprep.mubr.bf16.mxu0 %v2511_v28  ;;  %v2473_v27 = vmax.f32 %v2388_v1, 0.0  ;;  %v2223_v19 = vadd.f32 %v2222_v6, %v10369_v13  ;;  %v10370_v28 = vld [vmem:[#allocation24_spill] sm:$0xff]  ;;  %v2228_v62 = vpop.f32.mrf.mxu0  ;;  %v7578_v13 = vld [vmem:[%s10214_s4 + $0x28] sm:$0xff]  }
 0x232   : > { %v2391_v22 = vpop.f32.mrf.mxu1  ;;  %2770 = vmatmul.mubr.bf16.gmra.mxu0 %v2510_v48  ;;  %v2036_v10 = vadd.f32 %v10371_v38, %v10370_v28 }
 0x233   : > { %v2474_v3 = vmax.f32 %v2390_v55, 0.0  ;;  %v2392_v5 = vadd.f32 %v2391_v22, %v2199_v59 }
 0x234   : > { %v2395_v17 = vpop.f32.mrf.mxu1  ;;  %v2229_v14 = vadd.f32 %v2228_v62, %v2036_v10 }
 0x235   : > { %v2512_v16 = vpack.c.bf16 %v2474_v3, %v2472_v58  ;;  %v2475_v25 = vmax.f32 %v2392_v5, 0.0  ;;  %v2396_v34 = vadd.f32 %v2395_v17, %v2203_v52  ;;  %v10372_v58 = vld [vmem:[#allocation73_spill] sm:$0xff]  ;;  %v10373_v5 = vld [vmem:[#allocation74_spill] sm:$0xff] }
 0x236   : > { %v2397_v12 = vpop.f32.mrf.mxu1  ;;  %v2225_v3 = vadd.f32 %v2224_v21, %v10372_v58  ;;  %v2227_v11 = vadd.f32 %v2226_v18, %v10373_v5  ;;  %v7580_v5 = vld [vmem:[%s10214_s4 + $0x18] sm:$0xff]  }
 0x237   : > { %v2513_v0 = vpack.c.bf16 %v2475_v25, %v2473_v27  ;;  %v2398_v7 = vadd.f32 %v2397_v12, %v2205_v9  ;;  %v2476_v23 = vmax.f32 %v2396_v34, 0.0 }
 0x238   : > { %v2399_v41 = vpop.f32.mrf.mxu1 }
 0x239   : > { %v2400_v32 = vadd.f32 %v2399_v41, %v2207_v46  ;;  %2777 = vmatprep.mubr.bf16.mxu0 %v2513_v0  ;;  %v2477_v24 = vmax.f32 %v2398_v7, 0.0  ;;  %v10374_v0 = vmov 0  }
 0x23a   : > { %v2401_v50 = vpop.f32.mrf.mxu1  ;;  %2778 = vmatmul.mubr.bf16.gmra.mxu0 %v2512_v16 }
 0x23b   : > { %v2478_v63 = vmax.f32 %v2400_v32, 0.0  ;;  %v2402_v51 = vadd.f32 %v2401_v50, %v2209_v30  ;;  %v8984_v32 = vld [vmem:[%s10217_s7 + $0x1] ss:$0 sm:$0xff] }
 0x23c   : > { %v2405_v61 = vpop.f32.mrf.mxu1 }
 0x23d   : > { %v2514_v20 = vpack.c.bf16 %v2478_v63, %v2476_v23  ;;  %v2479_v31 = vmax.f32 %v2402_v51, 0.0  ;;  %v2406_v35 = vadd.f32 %v2405_v61, %v2213_v47  ;;  %v7576_v51 = vld [vmem:[%s10214_s4 + $0x38] sm:$0xff]  }
 0x23e   : > { %v2407_v36 = vpop.f32.mrf.mxu1  ;;  %7155 = vmatprep.subr.bf16.mxu1 %v7576_v51 }
 0x23f   : > { %v2515_v54 = vpack.c.bf16 %v2479_v31, %v2477_v24  ;;  %v2408_v48 = vadd.f32 %v2407_v36, %v2215_v43  ;;  %v2480_v57 = vmax.f32 %v2406_v35, 0.0 }
 0x240   : > { %v2409_v4 = vpop.f32.mrf.mxu1 }
 0x241   : > { %v2410_v45 = vadd.f32 %v2409_v4, %v2217_v15  ;;  %2785 = vmatprep.mubr.bf16.mxu0 %v2515_v54  ;;  %v2481_v59 = vmax.f32 %v2408_v48, 0.0 }
 0x242   : > { %v2411_v44 = vpop.f32.mrf.mxu1  ;;  %2786 = vmatmul.mubr.bf16.gmra.mxu0 %v2514_v20 }
 0x243   : > { %v2482_v56 = vmax.f32 %v2410_v45, 0.0  ;;  %v2412_v29 = vadd.f32 %v2411_v44, %v2219_v39  ;;  %v7577_v45 = vld [vmem:[%s10214_s4 + $0x30] sm:$0xff]  }
 0x244   : > { %v2415_v26 = vpop.f32.mrf.mxu1 }
 0x245   : > { %v2516_v1 = vpack.c.bf16 %v2482_v56, %v2480_v57  ;;  %v2483_v55 = vmax.f32 %v2412_v29, 0.0  ;;  %v2416_v52 = vadd.f32 %v2415_v26, %v2223_v19 }
 0x246   : > { %v2417_v22 = vpop.f32.mrf.mxu1 }
 0x247   : > { %v2517_v17 = vpack.c.bf16 %v2483_v55, %v2481_v59  ;;  %v2418_v27 = vadd.f32 %v2417_v22, %v2225_v3  ;;  %v2484_v8 = vmax.f32 %v2416_v52, 0.0 }
 0x248   : > { %v2419_v40 = vpop.f32.mrf.mxu1 }
 0x249   : > { %v2420_v16 = vadd.f32 %v2419_v40, %v2227_v11  ;;  %2793 = vmatprep.mubr.bf16.mxu0 %v2517_v17  ;;  %v2485_v9 = vmax.f32 %v2418_v27, 0.0 }
 0x24a   : > { %v2421_v25 = vpop.f32.mrf.mxu1  ;;  %2794 = vmatmul.mubr.bf16.gmra.mxu0 %v2516_v1  ;;  %v7579_v1 = vld [vmem:[%s10214_s4 + $0x20] sm:$0xff]  }
 0x24b   : > { %v2486_v12 = vmax.f32 %v2420_v16, 0.0  ;;  %v2422_v60 = vadd.f32 %v2421_v25, %v2229_v14  ;;  %v7581_v16 = vld [vmem:[%s10214_s4 + $0x10] sm:$0xff]  }
 0x24d   : > { %v2518_v53 = vpack.c.bf16 %v2486_v12, %v2484_v8  ;;  %v2487_v46 = vmax.f32 %v2422_v60, 0.0 }
 0x24f   : > { %v2519_v34 = vpack.c.bf16 %v2487_v46, %v2485_v9 }
 0x251   : > { %2801 = vmatprep.mubr.bf16.mxu0 %v2519_v34 }
 0x252   : > { %2802 = vmatmul.mubr.bf16.gmra.mxu0 %v2518_v53  ;;  %v7582_v53 = vld [vmem:[%s10214_s4 + $0x8] sm:$0xff]  }
 0x253   : > { %3547 = vmatprep.mubr.bf16.mxu0 %v10374_v0 }
 0x29a   : > { %v6851_v41 = vpop.f32.mrf.mxu0 }
 0x29c   : > { %v6852_v30 = vpop.f32.mrf.mxu0 }
 0x29d   : > { %v6853_v7 = vadd.f32 %v6852_v30, %v6851_v41 }
 0x29e   : > { %v6854_v6 = vpop.f32.mrf.mxu0 }
 0x29f   : > { %v2684_v23 = vadd.f32 %v6853_v7, %v8984_v32 }
 0x2a0   : > { %v6855_v50 = vpop.f32.mrf.mxu0 }
 0x2a1   : > { %v6856_v63 = vadd.f32 %v6855_v50, %v6854_v6  ;;  %v2810_v37 = vmax.f32 %v2684_v23, 0.0 }
 0x2a2   : > { %v6857_v47 = vpop.f32.mrf.mxu0 }
 0x2a3   : > { %v2687_v61 = vadd.f32 %v6856_v63, %v8984_v32 }
 0x2a4   : > { %v6858_v2 = vpop.f32.mrf.mxu0 }
 0x2a5   : > { %v2811_v49 = vmax.f32 %v2687_v61, 0.0  ;;  %v6859_v24 = vadd.f32 %v6858_v2, %v6857_v47 }
 0x2a6   : > { %v6860_v20 = vpop.f32.mrf.mxu0 }
 0x2a7   : > { %v2842_v31 = vpack.c.bf16 %v2811_v49, %v2810_v37  ;;  %v2692_v36 = vadd.f32 %v6859_v24, %v8984_v32 }
 0x2a8   : > { %v6861_v21 = vpop.f32.mrf.mxu0 }
 0x2a9   : > { %v6862_v42 = vadd.f32 %v6861_v21, %v6860_v20  ;;  %7123 = vmatprep.mubr.bf16.mxu1 %v2842_v31  ;;  %v2812_v35 = vmax.f32 %v2692_v36, 0.0 }
 0x2aa   : > { %v6863_v43 = vpop.f32.mrf.mxu0 }
 0x2ab   : > { %v2695_v33 = vadd.f32 %v6862_v42, %v8984_v32 }
 0x2ac   : > { %v6864_v15 = vpop.f32.mrf.mxu0 }
 0x2ad   : > { %v2813_v54 = vmax.f32 %v2695_v33, 0.0  ;;  %v6865_v4 = vadd.f32 %v6864_v15, %v6863_v43 }
 0x2ae   : > { %v6866_v39 = vpop.f32.mrf.mxu0 }
 0x2af   : > { %v2843_v48 = vpack.c.bf16 %v2813_v54, %v2812_v35  ;;  %v2700_v44 = vadd.f32 %v6865_v4, %v8984_v32 }
 0x2b0   : > { %v6867_v18 = vpop.f32.mrf.mxu0 }
 0x2b1   : > { %v6868_v57 = vadd.f32 %v6867_v18, %v6866_v39  ;;  %7124 = vmatmul.mubr.bf16.vlgmr.msra.gmra.mxu1 %v2843_v48  ;;  %v2814_v26 = vmax.f32 %v2700_v44, 0.0 }
 0x2b2   : > { %v6869_v56 = vpop.f32.mrf.mxu0  ;;  %7156 = vmatpush3.bf16.msra.mxu1 %v7576_v51 }
 0x2b3   : > { %v2703_v29 = vadd.f32 %v6868_v57, %v8984_v32  ;;  %7157 = vmatprep.subr.bf16.mxu1 %v7577_v45 }
 0x2b4   : > { %v6870_v19 = vpop.f32.mrf.mxu0 }
 0x2b5   : > { %v2815_v28 = vmax.f32 %v2703_v29, 0.0  ;;  %v6871_v38 = vadd.f32 %v6870_v19, %v6869_v56 }
 0x2b6   : > { %v6872_v10 = vpop.f32.mrf.mxu0  ;;  %7158 = vmatpush3.bf16.msra.mxu1 %v7577_v45 }
 0x2b7   : > { %v2844_v59 = vpack.c.bf16 %v2815_v28, %v2814_v26  ;;  %7159 = vmatprep.subr.bf16.mxu1 %v7578_v13  ;;  %v2708_v62 = vadd.f32 %v6871_v38, %v8984_v32 }
 0x2b8   : > { %v6873_v55 = vpop.f32.mrf.mxu0 }
 0x2b9   : > { %v6874_v22 = vadd.f32 %v6873_v55, %v6872_v10  ;;  %7127 = vmatprep.mubr.bf16.mxu1 %v2844_v59  ;;  %v2816_v52 = vmax.f32 %v2708_v62, 0.0 }
 0x2ba   : > { %v6875_v58 = vpop.f32.mrf.mxu0  ;;  %7160 = vmatpush3.bf16.msra.mxu1 %v7578_v13 }
 0x2bb   : > { %v2711_v3 = vadd.f32 %v6874_v22, %v8984_v32  ;;  %7161 = vmatprep.subr.bf16.mxu1 %v7579_v1 }
 0x2bc   : > { %v6876_v11 = vpop.f32.mrf.mxu0 }
 0x2bd   : > { %v2817_v17 = vmax.f32 %v2711_v3, 0.0  ;;  %v6877_v40 = vadd.f32 %v6876_v11, %v6875_v58 }
 0x2be   : > { %v6878_v14 = vpop.f32.mrf.mxu0  ;;  %7162 = vmatpush3.bf16.msra.mxu1 %v7579_v1 }
 0x2bf   : > { %v2845_v27 = vpack.c.bf16 %v2817_v17, %v2816_v52  ;;  %7163 = vmatprep.subr.bf16.mxu1 %v7580_v5  ;;  %v2716_v8 = vadd.f32 %v6877_v40, %v8984_v32 }
 0x2c0   : > { %v6879_v25 = vpop.f32.mrf.mxu0 }
 0x2c1   : > { %v6880_v12 = vadd.f32 %v6879_v25, %v6878_v14  ;;  %7128 = vmatmul.mubr.bf16.gmra.mxu1 %v2845_v27  ;;  %v2818_v34 = vmax.f32 %v2716_v8, 0.0 }
 0x2c2   : > { %v6881_v60 = vpop.f32.mrf.mxu0  ;;  %7164 = vmatpush3.bf16.msra.mxu1 %v7580_v5 }
 0x2c3   : > { %v2719_v9 = vadd.f32 %v6880_v12, %v8984_v32  ;;  %7165 = vmatprep.subr.bf16.mxu1 %v7581_v16 }
 0x2c4   : > { %v6882_v46 = vpop.f32.mrf.mxu0 }
 0x2c5   : > { %v2819_v41 = vmax.f32 %v2719_v9, 0.0  ;;  %v6883_v30 = vadd.f32 %v6882_v46, %v6881_v60 }
 0x2c6   : > { %v6884_v7 = vpop.f32.mrf.mxu0  ;;  %7166 = vmatpush3.bf16.msra.mxu1 %v7581_v16 }
 0x2c7   : > { %v2846_v6 = vpack.c.bf16 %v2819_v41, %v2818_v34  ;;  %7167 = vmatprep.subr.bf16.mxu1 %v7582_v53  ;;  %v2724_v23 = vadd.f32 %v6883_v30, %v8984_v32 }
 0x2c8   : > { %v6885_v50 = vpop.f32.mrf.mxu0 }
 0x2c9   : > { %v6886_v63 = vadd.f32 %v6885_v50, %v6884_v7  ;;  %7131 = vmatprep.mubr.bf16.mxu1 %v2846_v6  ;;  %v2820_v2 = vmax.f32 %v2724_v23, 0.0 }
 0x2ca   : > { %v6887_v51 = vpop.f32.mrf.mxu0  ;;  %7168 = vmatpush3.bf16.msra.mxu1 %v7582_v53 }
 0x2cb   : > { %v2727_v47 = vadd.f32 %v6886_v63, %v8984_v32 }
 0x2cc   : > { %v6888_v61 = vpop.f32.mrf.mxu0 }
 0x2cd   : > { %v2821_v37 = vmax.f32 %v2727_v47, 0.0  ;;  %v6889_v49 = vadd.f32 %v6888_v61, %v6887_v51 }
 0x2ce   : > { %v6890_v24 = vpop.f32.mrf.mxu0 }
 0x2cf   : > { %v2847_v20 = vpack.c.bf16 %v2821_v37, %v2820_v2  ;;  %v2732_v21 = vadd.f32 %v6889_v49, %v8984_v32  ;;  %v7583_v37 = vld [vmem:[%s10214_s4] sm:$0xff]  }
 0x2d0   : > { %v6891_v31 = vpop.f32.mrf.mxu0  ;;  %7169 = vmatprep.subr.bf16.mxu1 %v7583_v37 }
 0x2d1   : > { %v6892_v36 = vadd.f32 %v6891_v31, %v6890_v24  ;;  %7132 = vmatmul.mubr.bf16.gmra.mxu1 %v2847_v20  ;;  %v2822_v15 = vmax.f32 %v2732_v21, 0.0 }
 0x2d2   : > { %v6893_v42 = vpop.f32.mrf.mxu0  ;;  %7170 = vmatpush3.bf16.msra.mxu1 %v7583_v37 }
 0x2d3   : > { %v2735_v43 = vadd.f32 %v6892_v36, %v8984_v32 }
 0x2d4   : > { %v6894_v33 = vpop.f32.mrf.mxu0 }
 0x2d5   : > { %v2823_v35 = vmax.f32 %v2735_v43, 0.0  ;;  %v6895_v54 = vadd.f32 %v6894_v33, %v6893_v42 }
 0x2d6   : > { %v6896_v4 = vpop.f32.mrf.mxu0 }
 0x2d7   : > { %v2848_v39 = vpack.c.bf16 %v2823_v35, %v2822_v15  ;;  %v2740_v45 = vadd.f32 %v6895_v54, %v8984_v32 }
 0x2d8   : > { %v6897_v48 = vpop.f32.mrf.mxu0 }
 0x2d9   : > { %v6898_v18 = vadd.f32 %v6897_v48, %v6896_v4  ;;  %7135 = vmatprep.mubr.bf16.mxu1 %v2848_v39  ;;  %v2824_v29 = vmax.f32 %v2740_v45, 0.0 }
 0x2da   : > { %v6899_v44 = vpop.f32.mrf.mxu0 }
 0x2db   : > { %v2743_v57 = vadd.f32 %v6898_v18, %v8984_v32 }
 0x2dc   : > { %v6900_v56 = vpop.f32.mrf.mxu0 }
 0x2dd   : > { %v2825_v13 = vmax.f32 %v2743_v57, 0.0  ;;  %v6901_v19 = vadd.f32 %v6900_v56, %v6899_v44 }
 0x2de   : > { %v6902_v26 = vpop.f32.mrf.mxu0 }
 0x2df   : > { %v2849_v28 = vpack.c.bf16 %v2825_v13, %v2824_v29  ;;  %v2748_v10 = vadd.f32 %v6901_v19, %v8984_v32 }
 0x2e0   : > { %v6903_v38 = vpop.f32.mrf.mxu0 }
 0x2e1   : > { %v6904_v59 = vadd.f32 %v6903_v38, %v6902_v26  ;;  %7136 = vmatmul.mubr.bf16.gmra.mxu1 %v2849_v28  ;;  %v2826_v22 = vmax.f32 %v2748_v10, 0.0 }
 0x2e2   : > { %v6905_v1 = vpop.f32.mrf.mxu0 }
 0x2e3   : > { %v2751_v55 = vadd.f32 %v6904_v59, %v8984_v32 }
 0x2e4   : > { %v6906_v62 = vpop.f32.mrf.mxu0 }
 0x2e5   : > { %v2827_v58 = vmax.f32 %v2751_v55, 0.0  ;;  %v6907_v3 = vadd.f32 %v6906_v62, %v6905_v1 }
 0x2e6   : > { %v6908_v5 = vpop.f32.mrf.mxu0 }
 0x2e7   : > { %v2850_v11 = vpack.c.bf16 %v2827_v58, %v2826_v22  ;;  %v2756_v17 = vadd.f32 %v6907_v3, %v8984_v32 }
 0x2e8   : > { %v6909_v52 = vpop.f32.mrf.mxu0 }
 0x2e9   : > { %v6910_v40 = vadd.f32 %v6909_v52, %v6908_v5  ;;  %7139 = vmatprep.mubr.bf16.mxu1 %v2850_v11  ;;  %v2828_v25 = vmax.f32 %v2756_v17, 0.0 }
 0x2ea   : > { %v6911_v14 = vpop.f32.mrf.mxu0 }
 0x2eb   : > { %v2759_v27 = vadd.f32 %v6910_v40, %v8984_v32 }
 0x2ec   : > { %v6912_v16 = vpop.f32.mrf.mxu0 }
 0x2ed   : > { %v2829_v8 = vmax.f32 %v2759_v27, 0.0  ;;  %v6913_v12 = vadd.f32 %v6912_v16, %v6911_v14 }
 0x2ee   : > { %v6914_v60 = vpop.f32.mrf.mxu0 }
 0x2ef   : > { %v2851_v9 = vpack.c.bf16 %v2829_v8, %v2828_v25  ;;  %v2764_v46 = vadd.f32 %v6913_v12, %v8984_v32 }
 0x2f0   : > { %v6915_v53 = vpop.f32.mrf.mxu0 }
 0x2f1   : > { %v6916_v34 = vadd.f32 %v6915_v53, %v6914_v60  ;;  %7140 = vmatmul.mubr.bf16.gmra.mxu1 %v2851_v9  ;;  %v2830_v6 = vmax.f32 %v2764_v46, 0.0  ;;  %v7584_v46 = vld [vmem:[%s10215_s5 + $0x70] ss:$8 sps:$4 sm:$0xff]  }
 0x2f2   : > { %v6917_v41 = vpop.f32.mrf.mxu0 }
 0x2f3   : > { %v2767_v30 = vadd.f32 %v6916_v34, %v8984_v32  ;;  %v7586_v34 = vld [vmem:[%s10215_s5 + $0x74] ss:$8 sps:$4 sm:$0xff]  }
 0x2f4   : > { %v6918_v7 = vpop.f32.mrf.mxu0  ;;  %3515 = vmatprep.subr.bf16.mxu0 %v7586_v34 }
 0x2f5   : > { %v2831_v50 = vmax.f32 %v2767_v30, 0.0  ;;  %v6919_v23 = vadd.f32 %v6918_v7, %v6917_v41  ;;  %3516 = vmatpush1.bf16.msra.mxu0 %v7584_v46  ;;  %v7587_v41 = vld [vmem:[%s10215_s5 + $0x60] ss:$8 sps:$4 sm:$0xff]   ;;  %v7590_v30 = vld [vmem:[%s10215_s5 + $0x50] ss:$8 sps:$4 sm:$0xff]  }
 0x2f6   : > { %v6920_v63 = vpop.f32.mrf.mxu0  ;;  %v7592_v7 = vld [vmem:[%s10215_s5 + $0x54] ss:$8 sps:$4 sm:$0xff]  }
 0x2f7   : > { %v2852_v51 = vpack.c.bf16 %v2831_v50, %v2830_v6  ;;  %v2772_v61 = vadd.f32 %v6919_v23, %v8984_v32  ;;  %v7593_v6 = vld [vmem:[%s10215_s5 + $0x40] ss:$8 sps:$4 sm:$0xff]   ;;  %v7595_v50 = vld [vmem:[%s10215_s5 + $0x44] ss:$8 sps:$4 sm:$0xff]   ;;  %v7598_v23 = vld [vmem:[%s10215_s5 + $0x34] ss:$8 sps:$4 sm:$0xff]  }
 0x2f8   : > { %v6921_v47 = vpop.f32.mrf.mxu0 }
 0x2f9   : > { %v6922_v2 = vadd.f32 %v6921_v47, %v6920_v63  ;;  %7143 = vmatprep.mubr.bf16.mxu1 %v2852_v51  ;;  %v2832_v31 = vmax.f32 %v2772_v61, 0.0  ;;  %v7596_v51 = vld [vmem:[%s10215_s5 + $0x30] ss:$8 sps:$4 sm:$0xff]   ;;  %v7601_v61 = vld [vmem:[%s10215_s5 + $0x24] ss:$8 sps:$4 sm:$0xff]  }
 0x2fa   : > { %v6923_v49 = vpop.f32.mrf.mxu0 }
 0x2fb   : > { %v2775_v24 = vadd.f32 %v6922_v2, %v8984_v32  ;;  %v9078_v2 = vld [vmem:[%s10217_s7 + $0x2] ss:$0 sm:$0xff] }
 0x2fc   : > { %v6924_v20 = vpop.f32.mrf.mxu0 }
 0x2fd   : > { %v2833_v21 = vmax.f32 %v2775_v24, 0.0  ;;  %v6925_v36 = vadd.f32 %v6924_v20, %v6923_v49  ;;  %v7599_v20 = vld [vmem:[%s10215_s5 + $0x20] ss:$8 sps:$4 sm:$0xff]  }
 0x2fe   : > { %v6926_v42 = vpop.f32.mrf.mxu0 }
 0x2ff   : > { %v2853_v43 = vpack.c.bf16 %v2833_v21, %v2832_v31  ;;  %v2780_v15 = vadd.f32 %v6925_v36, %v8984_v32  ;;  %v7604_v36 = vld [vmem:[%s10215_s5 + $0x14] ss:$8 sps:$4 sm:$0xff]  }
 0x300   : > { %v6927_v33 = vpop.f32.mrf.mxu0 }
 0x301   : > { %v6928_v35 = vadd.f32 %v6927_v33, %v6926_v42  ;;  %7144 = vmatmul.mubr.bf16.gmra.mxu1 %v2853_v43  ;;  %v2834_v48 = vmax.f32 %v2780_v15, 0.0 }
 0x302   : > { %v6929_v54 = vpop.f32.mrf.mxu0 }
 0x303   : > { %v2783_v4 = vadd.f32 %v6928_v35, %v8984_v32  ;;  %v7602_v35 = vld [vmem:[%s10215_s5 + $0x10] ss:$8 sps:$4 sm:$0xff]  }
 0x304   : > { %v6930_v39 = vpop.f32.mrf.mxu0 }
 0x305   : > { %v2835_v45 = vmax.f32 %v2783_v4, 0.0  ;;  %v6931_v18 = vadd.f32 %v6930_v39, %v6929_v54  ;;  %v7607_v4 = vld [vmem:[%s10215_s5 + $0x4] ss:$8 sps:$4 sm:$0xff]  }
 0x306   : > { %v6932_v44 = vpop.f32.mrf.mxu0 }
 0x307   : > { %v2854_v57 = vpack.c.bf16 %v2835_v45, %v2834_v48  ;;  %v2788_v29 = vadd.f32 %v6931_v18, %v8984_v32  ;;  %v7605_v45 = vld [vmem:[%s10215_s5] ss:$8 sps:$4 sm:$0xff]  }
 0x308   : > { %v6933_v56 = vpop.f32.mrf.mxu0 }
 0x309   : > { %v6934_v13 = vadd.f32 %v6933_v56, %v6932_v44  ;;  %7147 = vmatprep.mubr.bf16.mxu1 %v2854_v57  ;;  %v2836_v38 = vmax.f32 %v2788_v29, 0.0 }
 0x30a   : > { %v6935_v19 = vpop.f32.mrf.mxu0 }
 0x30b   : > { %v2791_v26 = vadd.f32 %v6934_v13, %v8984_v32 }
 0x30c   : > { %v6936_v28 = vpop.f32.mrf.mxu0 }
 0x30d   : > { %v2837_v10 = vmax.f32 %v2791_v26, 0.0  ;;  %v6937_v59 = vadd.f32 %v6936_v28, %v6935_v19 }
 0x30e   : > { %v6938_v1 = vpop.f32.mrf.mxu0 }
 0x30f   : > { %v2855_v55 = vpack.c.bf16 %v2837_v10, %v2836_v38  ;;  %v2796_v22 = vadd.f32 %v6937_v59, %v8984_v32 }
 0x310   : > { %v6939_v62 = vpop.f32.mrf.mxu0 }
 0x311   : > { %v6940_v58 = vadd.f32 %v6939_v62, %v6938_v1  ;;  %7148 = vmatmul.mubr.bf16.gmra.mxu1 %v2855_v55  ;;  %v2838_v52 = vmax.f32 %v2796_v22, 0.0 }
 0x312   : > { %v6941_v3 = vpop.f32.mrf.mxu0 }
 0x313   : > { %v2799_v5 = vadd.f32 %v6940_v58, %v8984_v32 }
 0x314   : > { %v6942_v11 = vpop.f32.mrf.mxu0 }
 0x315   : > { %v2839_v17 = vmax.f32 %v2799_v5, 0.0  ;;  %v6943_v40 = vadd.f32 %v6942_v11, %v6941_v3 }
 0x316   : > { %v6944_v14 = vpop.f32.mrf.mxu0 }
 0x317   : > { %v2856_v27 = vpack.c.bf16 %v2839_v17, %v2838_v52  ;;  %v2804_v25 = vadd.f32 %v6943_v40, %v8984_v32 }
 0x318   : > { %v6945_v16 = vpop.f32.mrf.mxu0 }
 0x319   : > { %v6946_v8 = vadd.f32 %v6945_v16, %v6944_v14  ;;  %7151 = vmatprep.mubr.bf16.mxu1 %v2856_v27  ;;  %v2840_v60 = vmax.f32 %v2804_v25, 0.0 }
 0x31b   : > { %v2807_v12 = vadd.f32 %v6946_v8, %v8984_v32  ;;  %v7589_v32 = vld [vmem:[%s10215_s5 + $0x64] ss:$8 sps:$4 sm:$0xff]  }
 0x31c   : > { %3517 = vmatprep.subr.bf16.mxu0 %v7589_v32 }
 0x31d   : > { %v2841_v9 = vmax.f32 %v2807_v12, 0.0  ;;  %3518 = vmatpush1.bf16.msra.mxu0 %v7587_v41 }
 0x31e   : > { %3519 = vmatprep.subr.bf16.mxu0 %v7592_v7 }
 0x31f   : > { %v2857_v53 = vpack.c.bf16 %v2841_v9, %v2840_v60 }
 0x321   : > { %7152 = vmatmul.mubr.bf16.gmra.mxu1 %v2857_v53  ;;  %3520 = vmatpush1.bf16.msra.mxu0 %v7590_v30 }
 0x322   : > { %3521 = vmatprep.subr.bf16.mxu0 %v7595_v50 }
 0x325   : > { %3522 = vmatpush1.bf16.msra.mxu0 %v7593_v6 }
 0x326   : > { %3523 = vmatprep.subr.bf16.mxu0 %v7598_v23 }
 0x329   : > { %3524 = vmatpush1.bf16.msra.mxu0 %v7596_v51 }
 0x32a   : > { %3525 = vmatprep.subr.bf16.mxu0 %v7601_v61 }
 0x32d   : > { %3526 = vmatpush1.bf16.msra.mxu0 %v7599_v20 }
 0x32e   : > { %3527 = vmatprep.subr.bf16.mxu0 %v7604_v36 }
 0x331   : > { %3528 = vmatpush1.bf16.msra.mxu0 %v7602_v35 }
 0x332   : > { %3529 = vmatprep.subr.bf16.mxu0 %v7607_v4 }
 0x335   : > { %3530 = vmatpush1.bf16.msra.mxu0 %v7605_v45 }
 0x371   : > { %v7125_v63 = vpop.f32.mrf.mxu1 }
 0x372   : > { %v2966_v31 = vadd.f32 %v7125_v63, %v9078_v2 }
 0x373   : > { %v2957_v47 = vpop.f32.mrf.mxu1 }
 0x374   : > { %v2958_v49 = vadd.f32 %v2957_v47, %v9078_v2  ;;  %v3086_v54 = vmax.f32 %v2966_v31, 0.0 }
 0x375   : > { %v7126_v37 = vpop.f32.mrf.mxu1 }
 0x376   : > { %v2969_v24 = vadd.f32 %v7126_v37, %v9078_v2  ;;  %v3084_v33 = vmax.f32 %v2958_v49, 0.0 }
 0x377   : > { %v2960_v21 = vpop.f32.mrf.mxu1 }
 0x378   : > { %v2961_v42 = vadd.f32 %v2960_v21, %v9078_v2  ;;  %v3087_v43 = vmax.f32 %v2969_v24, 0.0 }
 0x37a   : > { %v3085_v15 = vmax.f32 %v2961_v42, 0.0  ;;  %v3117_v48 = vpack.c.bf16 %v3087_v43, %v3086_v54 }
 0x37c   : > { %v3116_v39 = vpack.c.bf16 %v3085_v15, %v3084_v33 }
 0x37e   : > { %7171 = vmatprep.mubr.bf16.mxu1 %v3116_v39 }
 0x37f   : > { %7172 = vmatmul.mubr.bf16.vlgmr.msra.gmra.mxu1 %v3117_v48 }
 0x381   : > { %v7129_v18 = vpop.f32.mrf.mxu1 }
 0x382   : > { %v2982_v13 = vadd.f32 %v7129_v18, %v9078_v2 }
 0x383   : > { %v2973_v44 = vpop.f32.mrf.mxu1 }
 0x384   : > { %v2974_v56 = vadd.f32 %v2973_v44, %v9078_v2  ;;  %v3090_v59 = vmax.f32 %v2982_v13, 0.0 }
 0x385   : > { %v7130_v57 = vpop.f32.mrf.mxu1 }
 0x386   : > { %v2985_v29 = vadd.f32 %v7130_v57, %v9078_v2  ;;  %v3088_v38 = vmax.f32 %v2974_v56, 0.0 }
 0x387   : > { %v2976_v19 = vpop.f32.mrf.mxu1 }
 0x388   : > { %v2977_v26 = vadd.f32 %v2976_v19, %v9078_v2  ;;  %v3091_v28 = vmax.f32 %v2985_v29, 0.0 }
 0x38a   : > { %v3089_v10 = vmax.f32 %v2977_v26, 0.0  ;;  %v3119_v55 = vpack.c.bf16 %v3091_v28, %v3090_v59 }
 0x38c   : > { %v3118_v1 = vpack.c.bf16 %v3089_v10, %v3088_v38 }
 0x38e   : > { %7175 = vmatprep.mubr.bf16.mxu1 %v3118_v1 }
 0x38f   : > { %7176 = vmatmul.mubr.bf16.gmra.mxu1 %v3119_v55 }
 0x391   : > { %v7133_v62 = vpop.f32.mrf.mxu1 }
 0x392   : > { %v2998_v11 = vadd.f32 %v7133_v62, %v9078_v2 }
 0x393   : > { %v2989_v22 = vpop.f32.mrf.mxu1 }
 0x394   : > { %v2990_v3 = vadd.f32 %v2989_v22, %v9078_v2  ;;  %v3094_v16 = vmax.f32 %v2998_v11, 0.0 }
 0x395   : > { %v7134_v58 = vpop.f32.mrf.mxu1 }
 0x396   : > { %v3001_v5 = vadd.f32 %v7134_v58, %v9078_v2  ;;  %v3092_v14 = vmax.f32 %v2990_v3, 0.0 }
 0x397   : > { %v2992_v52 = vpop.f32.mrf.mxu1 }
 0x398   : > { %v2993_v17 = vadd.f32 %v2992_v52, %v9078_v2  ;;  %v3095_v40 = vmax.f32 %v3001_v5, 0.0 }
 0x39a   : > { %v3093_v27 = vmax.f32 %v2993_v17, 0.0  ;;  %v3121_v8 = vpack.c.bf16 %v3095_v40, %v3094_v16 }
 0x39c   : > { %v3120_v25 = vpack.c.bf16 %v3093_v27, %v3092_v14 }
 0x39e   : > { %7179 = vmatprep.mubr.bf16.mxu1 %v3120_v25 }
 0x39f   : > { %7180 = vmatmul.mubr.bf16.gmra.mxu1 %v3121_v8 }
 0x3a1   : > { %v7137_v12 = vpop.f32.mrf.mxu1 }
 0x3a2   : > { %v3014_v34 = vadd.f32 %v7137_v12, %v9078_v2 }
 0x3a3   : > { %v3005_v60 = vpop.f32.mrf.mxu1 }
 0x3a4   : > { %v3006_v53 = vadd.f32 %v3005_v60, %v9078_v2  ;;  %v3098_v50 = vmax.f32 %v3014_v34, 0.0 }
 0x3a5   : > { %v7138_v9 = vpop.f32.mrf.mxu1 }
 0x3a6   : > { %v3017_v46 = vadd.f32 %v7138_v9, %v9078_v2  ;;  %v3096_v7 = vmax.f32 %v3006_v53, 0.0 }
 0x3a7   : > { %v3008_v41 = vpop.f32.mrf.mxu1 }
 0x3a8   : > { %v3009_v32 = vadd.f32 %v3008_v41, %v9078_v2  ;;  %v3099_v30 = vmax.f32 %v3017_v46, 0.0 }
 0x3aa   : > { %v3097_v6 = vmax.f32 %v3009_v32, 0.0  ;;  %v3123_v63 = vpack.c.bf16 %v3099_v30, %v3098_v50  ;;  %v7610_v30 = vld [vmem:[%s10216_s6 + $0x194] ss:$28 sps:$4 sm:$0xff]   ;;  %v9133_v50 = vld [vmem:[%s10217_s7 + $0x3] ss:$0 sm:$0xff] }
 0x3ab   : > { %4741 = vmatprep.subr.bf16.mxu0 %v7610_v30  ;;  %v7670_v30 = vld [vmem:[%s10216_s6 + $0x34c] ss:$28 sps:$4 sm:$0xff]  }
 0x3ac   : > { %v3122_v23 = vpack.c.bf16 %v3097_v6, %v3096_v7 }
 0x3ae   : > { %7183 = vmatprep.mubr.bf16.mxu1 %v3122_v23 }
 0x3af   : > { %7184 = vmatmul.mubr.bf16.gmra.mxu1 %v3123_v63 }
 0x3b1   : > { %v7141_v51 = vpop.f32.mrf.mxu1 }
 0x3b2   : > { %v3030_v24 = vadd.f32 %v7141_v51, %v9078_v2  ;;  %v7632_v51 = vld [vmem:[%s10216_s6 + $0x188] ss:$28 sps:$4 sm:$0xff]  }
 0x3b3   : > { %v3021_v47 = vpop.f32.mrf.mxu1 }
 0x3b4   : > { %v3022_v37 = vadd.f32 %v3021_v47, %v9078_v2  ;;  %v3102_v43 = vmax.f32 %v3030_v24, 0.0 }
 0x3b5   : > { %v7142_v61 = vpop.f32.mrf.mxu1 }
 0x3b6   : > { %v3033_v49 = vadd.f32 %v7142_v61, %v9078_v2  ;;  %v3100_v36 = vmax.f32 %v3022_v37, 0.0  ;;  %v7634_v61 = vld [vmem:[%s10216_s6 + $0x18c] ss:$28 sps:$4 sm:$0xff]   ;;  %v7640_v37 = vld [vmem:[%s10216_s6 + $0x154] ss:$28 sps:$4 sm:$0xff]  }
 0x3b7   : > { %v3024_v20 = vpop.f32.mrf.mxu1  ;;  %4548 = vmatprep.subr.bf16.mxu1 %v7634_v61 }
 0x3b8   : > { %v3025_v31 = vadd.f32 %v3024_v20, %v9078_v2  ;;  %v3103_v21 = vmax.f32 %v3033_v49, 0.0  ;;  %v7608_v20 = vld [vmem:[%s10216_s6 + $0x190] ss:$28 sps:$4 sm:$0xff]   ;;  %4549 = vmatpush1.bf16.msra.mxu1 %v7632_v51  ;;  %v7668_v51 = vld [vmem:[%s10216_s6 + $0x348] ss:$28 sps:$4 sm:$0xff]  }
 0x3b9   : > { %4550 = vmatprep.subr.bf16.mxu1 %v7640_v37 }
 0x3ba   : > { %v3101_v42 = vmax.f32 %v3025_v31, 0.0  ;;  %v3125_v15 = vpack.c.bf16 %v3103_v21, %v3102_v43  ;;  %v7643_v43 = vld [vmem:[%s10216_s6 + $0x11c] ss:$28 sps:$4 sm:$0xff]  }
 0x3bc   : > { %v3124_v33 = vpack.c.bf16 %v3101_v42, %v3100_v36  ;;  %v7613_v36 = vld [vmem:[%s10216_s6 + $0x15c] ss:$28 sps:$4 sm:$0xff]   ;;  %v7638_v42 = vld [vmem:[%s10216_s6 + $0x150] ss:$28 sps:$4 sm:$0xff]  }
 0x3bd   : > { %4551 = vmatpush1.bf16.msra.mxu1 %v7638_v42 }
 0x3be   : > { %7187 = vmatprep.mubr.bf16.mxu1 %v3124_v33  ;;  %4552 = vmatprep.subr.bf16.mxu1 %v7643_v43  ;;  %v7644_v43 = vld [vmem:[%s10216_s6 + $0x318] ss:$28 sps:$4 sm:$0xff]  }
 0x3bf   : > { %7188 = vmatmul.mubr.bf16.gmra.mxu1 %v3125_v15  ;;  %v7611_v15 = vld [vmem:[%s10216_s6 + $0x158] ss:$28 sps:$4 sm:$0xff]  }
 0x3c1   : > { %v7145_v35 = vpop.f32.mrf.mxu1 }
 0x3c2   : > { %v3046_v45 = vadd.f32 %v7145_v35, %v9078_v2 }
 0x3c3   : > { %v3037_v54 = vpop.f32.mrf.mxu1 }
 0x3c4   : > { %v3038_v39 = vadd.f32 %v3037_v54, %v9078_v2  ;;  %v3106_v13 = vmax.f32 %v3046_v45, 0.0  ;;  %v7616_v54 = vld [vmem:[%s10216_s6 + $0x124] ss:$28 sps:$4 sm:$0xff]  }
 0x3c5   : > { %v7146_v4 = vpop.f32.mrf.mxu1 }
 0x3c6   : > { %v3049_v48 = vadd.f32 %v7146_v4, %v9078_v2  ;;  %v3104_v56 = vmax.f32 %v3038_v39, 0.0  ;;  %v7641_v4 = vld [vmem:[%s10216_s6 + $0x118] ss:$28 sps:$4 sm:$0xff]  }
 0x3c7   : > { %v3040_v18 = vpop.f32.mrf.mxu1  ;;  %4553 = vmatpush1.bf16.msra.mxu1 %v7641_v4  ;;  %v7685_v4 = vld [vmem:[%s10216_s6 + $0x2a4] ss:$28 sps:$4 sm:$0xff]  }
 0x3c8   : > { %v3041_v44 = vadd.f32 %v3040_v18, %v9078_v2  ;;  %v3107_v57 = vmax.f32 %v3049_v48, 0.0  ;;  %v7649_v48 = vld [vmem:[%s10216_s6 + $0xe4] ss:$28 sps:$4 sm:$0xff]  }
 0x3c9   : > { %4554 = vmatprep.subr.bf16.mxu1 %v7649_v48 }
 0x3ca   : > { %v3105_v29 = vmax.f32 %v3041_v44, 0.0  ;;  %v3127_v26 = vpack.c.bf16 %v3107_v57, %v3106_v13  ;;  %v7614_v44 = vld [vmem:[%s10216_s6 + $0x120] ss:$28 sps:$4 sm:$0xff]  }
 0x3cc   : > { %v3126_v19 = vpack.c.bf16 %v3105_v29, %v3104_v56  ;;  %v7619_v56 = vld [vmem:[%s10216_s6 + $0xec] ss:$28 sps:$4 sm:$0xff]   ;;  %v7647_v29 = vld [vmem:[%s10216_s6 + $0xe0] ss:$28 sps:$4 sm:$0xff]  }
 0x3cd   : > { %4555 = vmatpush1.bf16.msra.mxu1 %v7647_v29  ;;  %v7688_v29 = vld [vmem:[%s10216_s6 + $0x26c] ss:$28 sps:$4 sm:$0xff]  }
 0x3ce   : > { %7191 = vmatprep.mubr.bf16.mxu1 %v3126_v19  ;;  %v7652_v19 = vld [vmem:[%s10216_s6 + $0xac] ss:$28 sps:$4 sm:$0xff]  }
 0x3cf   : > { %7192 = vmatmul.mubr.bf16.gmra.mxu1 %v3127_v26  ;;  %4556 = vmatprep.subr.bf16.mxu1 %v7652_v19 }
 0x3d1   : > { %v7149_v28 = vpop.f32.mrf.mxu1 }
 0x3d2   : > { %v3062_v55 = vadd.f32 %v7149_v28, %v9078_v2 }
 0x3d3   : > { %v3053_v38 = vpop.f32.mrf.mxu1 }
 0x3d4   : > { %v3054_v59 = vadd.f32 %v3053_v38, %v9078_v2  ;;  %v3110_v11 = vmax.f32 %v3062_v55, 0.0  ;;  %v7617_v38 = vld [vmem:[%s10216_s6 + $0xe8] ss:$28 sps:$4 sm:$0xff]   ;;  %v7658_v55 = vld [vmem:[%s10216_s6 + $0x74] ss:$28 sps:$4 sm:$0xff]  }
 0x3d5   : > { %v7150_v10 = vpop.f32.mrf.mxu1 }
 0x3d6   : > { %v3065_v1 = vadd.f32 %v7150_v10, %v9078_v2  ;;  %v3108_v3 = vmax.f32 %v3054_v59, 0.0  ;;  %v7622_v59 = vld [vmem:[%s10216_s6 + $0xb4] ss:$28 sps:$4 sm:$0xff]  }
 0x3d7   : > { %v3056_v62 = vpop.f32.mrf.mxu1 }
 0x3d8   : > { %v3057_v22 = vadd.f32 %v3056_v62, %v9078_v2  ;;  %v3111_v58 = vmax.f32 %v3065_v1, 0.0  ;;  %v7650_v1 = vld [vmem:[%s10216_s6 + $0xa8] ss:$28 sps:$4 sm:$0xff]  }
 0x3d9   : > { %4557 = vmatpush1.bf16.msra.mxu1 %v7650_v1 }
 0x3da   : > { %v3109_v5 = vmax.f32 %v3057_v22, 0.0  ;;  %v3129_v17 = vpack.c.bf16 %v3111_v58, %v3110_v11  ;;  %v7620_v58 = vld [vmem:[%s10216_s6 + $0xb0] ss:$28 sps:$4 sm:$0xff]   ;;  %v7625_v11 = vld [vmem:[%s10216_s6 + $0x7c] ss:$28 sps:$4 sm:$0xff]   ;;  %4558 = vmatprep.subr.bf16.mxu1 %v7658_v55 }
 0x3db   : > { %v7671_v55 = vld [vmem:[%s10216_s6 + $0x270] ss:$28 sps:$4 sm:$0xff]  }
 0x3dc   : > { %v3128_v52 = vpack.c.bf16 %v3109_v5, %v3108_v3 }
 0x3de   : > { %7195 = vmatprep.mubr.bf16.mxu1 %v3128_v52  ;;  %v7656_v52 = vld [vmem:[%s10216_s6 + $0x70] ss:$28 sps:$4 sm:$0xff]  }
 0x3df   : > { %7196 = vmatmul.mubr.bf16.gmra.mxu1 %v3129_v17  ;;  %v7661_v17 = vld [vmem:[%s10216_s6 + $0x3c] ss:$28 sps:$4 sm:$0xff]  }
 0x3e0   : > { %4559 = vmatpush1.bf16.msra.mxu1 %v7656_v52  ;;  %v7691_v52 = vld [vmem:[%s10216_s6 + $0x204] ss:$28 sps:$4 sm:$0xff]  }
 0x3e1   : > { %v7153_v40 = vpop.f32.mrf.mxu1  ;;  %4560 = vmatprep.subr.bf16.mxu1 %v7661_v17 }
 0x3e2   : > { %v3078_v8 = vadd.f32 %v7153_v40, %v9078_v2 }
 0x3e3   : > { %v3069_v14 = vpop.f32.mrf.mxu1 }
 0x3e4   : > { %v3070_v16 = vadd.f32 %v3069_v14, %v9078_v2  ;;  %v3114_v34 = vmax.f32 %v3078_v8, 0.0  ;;  %v7623_v14 = vld [vmem:[%s10216_s6 + $0x78] ss:$28 sps:$4 sm:$0xff]  }
 0x3e5   : > { %v7154_v27 = vpop.f32.mrf.mxu1 }
 0x3e6   : > { %v3081_v25 = vadd.f32 %v7154_v27, %v9078_v2  ;;  %v3112_v53 = vmax.f32 %v3070_v16, 0.0  ;;  %v7628_v16 = vld [vmem:[%s10216_s6 + $0x44] ss:$28 sps:$4 sm:$0xff]  }
 0x3e7   : > { %v3072_v12 = vpop.f32.mrf.mxu1 }
 0x3e8   : > { %v3073_v60 = vadd.f32 %v3072_v12, %v9078_v2  ;;  %v3115_v9 = vmax.f32 %v3081_v25, 0.0  ;;  %v7659_v25 = vld [vmem:[%s10216_s6 + $0x38] ss:$28 sps:$4 sm:$0xff]   ;;  %v7667_v12 = vld [vmem:[%s10216_s6 + $0x4] ss:$28 sps:$4 sm:$0xff]  }
 0x3e9   : > { %4561 = vmatpush1.bf16.msra.mxu1 %v7659_v25 }
 0x3ea   : > { %v3113_v46 = vmax.f32 %v3073_v60, 0.0  ;;  %v3131_v32 = vpack.c.bf16 %v3115_v9, %v3114_v34  ;;  %v7631_v34 = vld [vmem:[%s10216_s6 + $0xc] ss:$28 sps:$4 sm:$0xff]   ;;  %4562 = vmatprep.subr.bf16.mxu1 %v7667_v12 }
 0x3ec   : > { %v3130_v41 = vpack.c.bf16 %v3113_v46, %v3112_v53  ;;  %v7626_v53 = vld [vmem:[%s10216_s6 + $0x40] ss:$28 sps:$4 sm:$0xff]  }
 0x3ee   : > { %7199 = vmatprep.mubr.bf16.mxu1 %v3130_v41  ;;  %v7665_v41 = vld [vmem:[%s10216_s6] ss:$28 sps:$4 sm:$0xff]  }
 0x3ef   : > { %7200 = vmatmul.mubr.bf16.gmra.mxu1 %v3131_v32 }
 0x3f0   : > { %4563 = vmatpush1.bf16.msra.mxu1 %v7665_v41 }
 0x3f1   : > { %4564 = vmatprep.subr.bf16.mxu1 %v7670_v30  ;;  %v7692_v30 = vld [vmem:[%s10216_s6 + $0x230] ss:$28 sps:$4 sm:$0xff]  }
 0x3f4   : > { %4565 = vmatpush2.bf16.msra.mxu1 %v7668_v51  ;;  %v7695_v51 = vld [vmem:[%s10216_s6 + $0x1f8] ss:$28 sps:$4 sm:$0xff]  }
 0x43f   : > { %v7173_v7 = vpop.f32.mrf.mxu1 }
 0x440   : > { %v3240_v33 = vadd.f32 %v7173_v7, %v9133_v50 }
 0x441   : > { %v3231_v6 = vpop.f32.mrf.mxu1 }
 0x442   : > { %v3232_v23 = vadd.f32 %v3231_v6, %v9133_v50  ;;  %v3360_v45 = vmax.f32 %v3240_v33, 0.0 }
 0x443   : > { %v7174_v2 = vpop.f32.mrf.mxu1 }
 0x444   : > { %v3358_v49 = vmax.f32 %v3232_v23, 0.0  ;;  %v3243_v31 = vadd.f32 %v7174_v2, %v9133_v50  ;;  %v7629_v2 = vld [vmem:[%s10216_s6 + $0x8] ss:$28 sps:$4 sm:$0xff]  }
 0x445   : > { %v3234_v63 = vpop.f32.mrf.mxu1 }
 0x446   : > { %v3235_v47 = vadd.f32 %v3234_v63, %v9133_v50  ;;  %v3361_v35 = vmax.f32 %v3243_v31, 0.0  ;;  %v7637_v63 = vld [vmem:[%s10216_s6 + $0x354] ss:$28 sps:$4 sm:$0xff]   ;;  %v7646_v31 = vld [vmem:[%s10216_s6 + $0x31c] ss:$28 sps:$4 sm:$0xff]  }
 0x448   : > { %v3359_v24 = vmax.f32 %v3235_v47, 0.0  ;;  %v3391_v57 = vpack.c.bf16 %v3361_v35, %v3360_v45  ;;  %v7676_v47 = vld [vmem:[%s10216_s6 + $0x314] ss:$28 sps:$4 sm:$0xff]   ;;  %v7653_v45 = vld [vmem:[%s10216_s6 + $0x2e0] ss:$28 sps:$4 sm:$0xff]  }
 0x449   : > { %4566 = vmatprep.subr.bf16.mxu1 %v7676_v47  ;;  %v7677_v35 = vld [vmem:[%s10216_s6 + $0x2d8] ss:$28 sps:$4 sm:$0xff]  }
 0x44a   : > { %v3390_v21 = vpack.c.bf16 %v3359_v24, %v3358_v49  ;;  %v7635_v49 = vld [vmem:[%s10216_s6 + $0x350] ss:$28 sps:$4 sm:$0xff]  }
 0x44c   : > { %3548 = vmatmul.mubr.bf16.vlgmr.msra.gmra.mxu0 %v3390_v21  ;;  %v7674_v21 = vld [vmem:[%s10216_s6 + $0x310] ss:$28 sps:$4 sm:$0xff]  }
 0x44d   : > { %3557 = vmatprep.mubr.bf16.mxu0 %v10374_v0  ;;  %4742 = vmatpush1.bf16.msra.mxu0 %v7608_v20 }
 0x44e   : > { %4743 = vmatprep.subr.bf16.mxu0 %v7613_v36  ;;  %v7679_v36 = vld [vmem:[%s10216_s6 + $0x2dc] ss:$28 sps:$4 sm:$0xff]   ;;  %4567 = vmatpush2.bf16.msra.mxu1 %v7674_v21 }
 0x44f   : > { %v7177_v39 = vpop.f32.mrf.mxu1  ;;  %4568 = vmatprep.subr.bf16.mxu1 %v7679_v36  ;;  %v7701_v21 = vld [vmem:[%s10216_s6 + $0x1c0] ss:$28 sps:$4 sm:$0xff]  }
 0x450   : > { %v3256_v40 = vadd.f32 %v7177_v39, %v9133_v50 }
 0x451   : > { %v3247_v18 = vpop.f32.mrf.mxu1  ;;  %4744 = vmatpush1.bf16.msra.mxu0 %v7611_v15  ;;  %v7655_v15 = vld [vmem:[%s10216_s6 + $0x2e4] ss:$28 sps:$4 sm:$0xff]  }
 0x452   : > { %4745 = vmatprep.subr.bf16.mxu0 %v7616_v54  ;;  %v3248_v26 = vadd.f32 %v3247_v18, %v9133_v50  ;;  %v3364_v60 = vmax.f32 %v3256_v40, 0.0  ;;  %4569 = vmatpush2.bf16.msra.mxu1 %v7677_v35 }
 0x453   : > { %v7178_v13 = vpop.f32.mrf.mxu1  ;;  %4570 = vmatprep.subr.bf16.mxu1 %v7685_v4 }
 0x454   : > { %3558 = vmatmul.mubr.bf16.gmra.mxu0 %v3391_v57  ;;  %v3362_v62 = vmax.f32 %v3248_v26, 0.0  ;;  %v3259_v3 = vadd.f32 %v7178_v13, %v9133_v50  ;;  %v7683_v57 = vld [vmem:[%s10216_s6 + $0x2a0] ss:$28 sps:$4 sm:$0xff]   ;;  %v7662_v26 = vld [vmem:[%s10216_s6 + $0x2a8] ss:$28 sps:$4 sm:$0xff]  }
 0x455   : > { %v3250_v28 = vpop.f32.mrf.mxu1  ;;  %3567 = vmatprep.mubr.bf16.mxu0 %v10374_v0  ;;  %4746 = vmatpush1.bf16.msra.mxu0 %v7614_v44  ;;  %v7664_v44 = vld [vmem:[%s10216_s6 + $0x2ac] ss:$28 sps:$4 sm:$0xff]  }
 0x456   : > { %v3251_v10 = vadd.f32 %v3250_v28, %v9133_v50  ;;  %4747 = vmatprep.subr.bf16.mxu0 %v7619_v56  ;;  %v3365_v27 = vmax.f32 %v3259_v3, 0.0  ;;  %4571 = vmatpush2.bf16.msra.mxu1 %v7683_v57 }
 0x457   : > { %4572 = vmatprep.subr.bf16.mxu1 %v7688_v29 }
 0x458   : > { %v3363_v22 = vmax.f32 %v3251_v10, 0.0  ;;  %v3393_v46 = vpack.c.bf16 %v3365_v27, %v3364_v60  ;;  %v7686_v10 = vld [vmem:[%s10216_s6 + $0x268] ss:$28 sps:$4 sm:$0xff]   ;;  %v7689_v27 = vld [vmem:[%s10216_s6 + $0x200] ss:$28 sps:$4 sm:$0xff]  }
 0x459   : > { %4748 = vmatpush1.bf16.msra.mxu0 %v7617_v38  ;;  %v7673_v38 = vld [vmem:[%s10216_s6 + $0x274] ss:$28 sps:$4 sm:$0xff]  }
 0x45a   : > { %v3392_v5 = vpack.c.bf16 %v3363_v22, %v3362_v62  ;;  %4749 = vmatprep.subr.bf16.mxu0 %v7622_v59  ;;  %4573 = vmatpush2.bf16.msra.mxu1 %v7686_v10 }
 0x45c   : > { %3568 = vmatmul.mubr.bf16.gmra.mxu0 %v3392_v5  ;;  %v7680_v5 = vld [vmem:[%s10216_s6 + $0x238] ss:$28 sps:$4 sm:$0xff]  }
 0x45d   : > { %3577 = vmatprep.mubr.bf16.mxu0 %v10374_v0  ;;  %4750 = vmatpush1.bf16.msra.mxu0 %v7620_v58  ;;  %v7682_v58 = vld [vmem:[%s10216_s6 + $0x23c] ss:$28 sps:$4 sm:$0xff]  }
 0x45e   : > { %4751 = vmatprep.subr.bf16.mxu0 %v7625_v11 }
 0x45f   : > { %v7181_v8 = vpop.f32.mrf.mxu1 }
 0x460   : > { %v3272_v42 = vadd.f32 %v7181_v8, %v9133_v50 }
 0x461   : > { %v3263_v9 = vpop.f32.mrf.mxu1  ;;  %4752 = vmatpush1.bf16.msra.mxu0 %v7623_v14 }
 0x462   : > { %4753 = vmatprep.subr.bf16.mxu0 %v7628_v16  ;;  %v3264_v7 = vadd.f32 %v3263_v9, %v9133_v50  ;;  %v3368_v39 = vmax.f32 %v3272_v42, 0.0 }
 0x463   : > { %v7182_v32 = vpop.f32.mrf.mxu1 }
 0x464   : > { %3578 = vmatmul.mubr.bf16.gmra.mxu0 %v3393_v46  ;;  %v3366_v61 = vmax.f32 %v3264_v7, 0.0  ;;  %v3275_v24 = vadd.f32 %v7182_v32, %v9133_v50  ;;  %v7694_v32 = vld [vmem:[%s10216_s6 + $0x234] ss:$28 sps:$4 sm:$0xff]  }
 0x465   : > { %v3266_v6 = vpop.f32.mrf.mxu1  ;;  %3587 = vmatprep.mubr.bf16.mxu0 %v10374_v0  ;;  %4754 = vmatpush1.bf16.msra.mxu0 %v7626_v53 }
 0x466   : > { %v3267_v23 = vadd.f32 %v3266_v6, %v9133_v50  ;;  %4755 = vmatprep.subr.bf16.mxu0 %v7631_v34  ;;  %v3369_v33 = vmax.f32 %v3275_v24, 0.0  ;;  %4574 = vmatprep.subr.bf16.mxu1 %v7694_v32  ;;  %v7703_v24 = vld [vmem:[%s10216_s6 + $0x1c4] ss:$28 sps:$4 sm:$0xff]  }
 0x467   : > { %4575 = vmatpush2.bf16.msra.mxu1 %v7692_v30 }
 0x468   : > { %v3367_v37 = vmax.f32 %v3267_v23, 0.0  ;;  %v3395_v18 = vpack.c.bf16 %v3369_v33, %v3368_v39  ;;  %v7697_v23 = vld [vmem:[%s10216_s6 + $0x1fc] ss:$28 sps:$4 sm:$0xff]  }
 0x469   : > { %4756 = vmatpush1.bf16.msra.mxu0 %v7629_v2  ;;  %4576 = vmatprep.subr.bf16.mxu1 %v7697_v23  ;;  %v7704_v39 = vld [vmem:[%s10216_s6 + $0x360] ss:$28 sps:$4 sm:$0xff]  }
 0x46a   : > { %v3394_v20 = vpack.c.bf16 %v3367_v37, %v3366_v61  ;;  %4757 = vmatprep.subr.bf16.mxu0 %v7637_v63 }
 0x46b   : > { %4577 = vmatpush2.bf16.msra.mxu1 %v7695_v51 }
 0x46c   : > { %3588 = vmatmul.mubr.bf16.gmra.mxu0 %v3394_v20  ;;  %4578 = vmatprep.subr.bf16.mxu1 %v7703_v24  ;;  %v7706_v24 = vld [vmem:[%s10216_s6 + $0x198] ss:$28 sps:$4 sm:$0xff]  }
 0x46d   : > { %3597 = vmatprep.mubr.bf16.mxu0 %v10374_v0  ;;  %4758 = vmatpush2.bf16.msra.mxu0 %v7635_v49  ;;  %v7700_v49 = vld [vmem:[%s10216_s6 + $0x1cc] ss:$28 sps:$4 sm:$0xff]  }
 0x46e   : > { %4759 = vmatprep.subr.bf16.mxu0 %v7646_v31  ;;  %v7698_v31 = vld [vmem:[%s10216_s6 + $0x1c8] ss:$28 sps:$4 sm:$0xff]  }
 0x46f   : > { %v7185_v54 = vpop.f32.mrf.mxu1  ;;  %4579 = vmatpush2.bf16.msra.mxu1 %v7701_v21  ;;  %v7711_v21 = vld [vmem:[%s10216_s6 + $0x164] ss:$28 sps:$4 sm:$0xff]  }
 0x470   : > { %v3288_v3 = vadd.f32 %v7185_v54, %v9133_v50 }
 0x471   : > { %v3279_v48 = vpop.f32.mrf.mxu1  ;;  %4760 = vmatpush2.bf16.msra.mxu0 %v7644_v43 }
 0x472   : > { %4761 = vmatprep.subr.bf16.mxu0 %v7655_v15  ;;  %v3280_v13 = vadd.f32 %v3279_v48, %v9133_v50  ;;  %v3372_v40 = vmax.f32 %v3288_v3, 0.0 }
 0x473   : > { %v7186_v56 = vpop.f32.mrf.mxu1 }
 0x474   : > { %3598 = vmatmul.mubr.bf16.gmra.mxu0 %v3395_v18  ;;  %v3370_v59 = vmax.f32 %v3280_v13, 0.0  ;;  %v3291_v62 = vadd.f32 %v7186_v56, %v9133_v50 }
 0x475   : > { %v3282_v19 = vpop.f32.mrf.mxu1  ;;  %3607 = vmatprep.mubr.bf16.mxu0 %v10374_v0  ;;  %4762 = vmatpush2.bf16.msra.mxu0 %v7653_v45  ;;  %v7708_v45 = vld [vmem:[%s10216_s6 + $0x19c] ss:$28 sps:$4 sm:$0xff]  }
 0x476   : > { %v3283_v28 = vadd.f32 %v3282_v19, %v9133_v50  ;;  %4763 = vmatprep.subr.bf16.mxu0 %v7664_v44  ;;  %v3373_v11 = vmax.f32 %v3291_v62, 0.0  ;;  %4934 = vmatprep.subr.bf16.mxu1 %v7708_v45  ;;  %v7716_v45 = vld [vmem:[%s10216_s6 + $0x12c] ss:$28 sps:$4 sm:$0xff]  }
 0x478   : > { %v3371_v1 = vmax.f32 %v3283_v28, 0.0  ;;  %v3397_v16 = vpack.c.bf16 %v3373_v11, %v3372_v40 }
 0x479   : > { %4764 = vmatpush2.bf16.msra.mxu0 %v7662_v26 }
 0x47a   : > { %v3396_v22 = vpack.c.bf16 %v3371_v1, %v3370_v59  ;;  %4765 = vmatprep.subr.bf16.mxu0 %v7673_v38 }
 0x47c   : > { %3608 = vmatmul.mubr.bf16.gmra.mxu0 %v3396_v22 }
 0x47d   : > { %3617 = vmatprep.mubr.bf16.mxu0 %v10374_v0  ;;  %4766 = vmatpush2.bf16.msra.mxu0 %v7671_v55 }
 0x47e   : > { %4767 = vmatprep.subr.bf16.mxu0 %v7682_v58 }
 0x47f   : > { %v7189_v17 = vpop.f32.mrf.mxu1 }
 0x480   : > { %v3304_v41 = vadd.f32 %v7189_v17, %v9133_v50 }
 0x481   : > { %v3295_v14 = vpop.f32.mrf.mxu1  ;;  %4768 = vmatpush2.bf16.msra.mxu0 %v7680_v5 }
 0x482   : > { %4769 = vmatprep.subr.bf16.mxu0 %v7691_v52  ;;  %v3296_v8 = vadd.f32 %v3295_v14, %v9133_v50  ;;  %v3376_v2 = vmax.f32 %v3304_v41, 0.0 }
 0x483   : > { %v7190_v25 = vpop.f32.mrf.mxu1 }
 0x484   : > { %3618 = vmatmul.mubr.bf16.gmra.mxu0 %v3397_v16  ;;  %v3374_v9 = vmax.f32 %v3296_v8, 0.0  ;;  %v3307_v46 = vadd.f32 %v7190_v25, %v9133_v50 }
 0x485   : > { %v3298_v12 = vpop.f32.mrf.mxu1  ;;  %3627 = vmatprep.mubr.bf16.mxu0 %v10374_v0  ;;  %4770 = vmatpush2.bf16.msra.mxu0 %v7689_v27 }
 0x486   : > { %v3299_v60 = vadd.f32 %v3298_v12, %v9133_v50  ;;  %v3377_v7 = vmax.f32 %v3307_v46, 0.0  ;;  %4771 = vmatprep.subr.bf16.mxu0 %v7700_v49  ;;  %v6446_v12 = vld [vmem:[%s10217_s7 + $0x4] ss:$8 sm:$0x3]  ;;  %v7705_v49 = vld [vmem:[%s10216_s6 + $0x1a0] ss:$28 sps:$4 sm:$0xff]  }
 0x487   : > { %v10376_v46 = vld [vmem:[#allocation3_spill] sm:$0xff] }
 0x488   : > { %v3375_v53 = vmax.f32 %v3299_v60, 0.0  ;;  %v3399_v47 = vpack.c.bf16 %v3377_v7, %v3376_v2 }
 0x489   : > { %4772 = vmatpush2.bf16.msra.mxu0 %v7698_v31 }
 0x48a   : > { %v3398_v34 = vpack.c.bf16 %v3375_v53, %v3374_v9  ;;  %6995 = vmatprep.subr.bf16.mxu0 %v7704_v39  ;;  %v10375_v9 = vld [vmem:[#allocation4_spill] sm:$0xff] }
 0x48b   : > { %v9381_v53 = vrot.slane %v6446_v12, %v10375_v9 }
 0x48c   : > { %3628 = vmatmul.mubr.bf16.gmra.mxu0 %v3398_v34  ;;  %v9384_v34 = vrot.slane %v6446_v12, %v10376_v46  ;;  %v7722_v12 = vld [vmem:[%s10216_s6 + $0xb8] ss:$28 sps:$4 sm:$0xff]  }
 0x48d   : > { %3637 = vmatprep.mubr.bf16.mxu0 %v10374_v0 }
 0x48f   : > { %v7193_v6 = vpop.f32.mrf.mxu1 }
 0x490   : > { %v3320_v35 = vadd.f32 %v7193_v6, %v9133_v50 }
 0x491   : > { %v3311_v63 = vpop.f32.mrf.mxu1 }
 0x492   : > { %v3312_v37 = vadd.f32 %v3311_v63, %v9133_v50  ;;  %v3380_v48 = vmax.f32 %v3320_v35, 0.0 }
 0x493   : > { %v7194_v61 = vpop.f32.mrf.mxu1 }
 0x494   : > { %3638 = vmatmul.mubr.bf16.gmra.mxu0 %v3399_v47  ;;  %v3378_v42 = vmax.f32 %v3312_v37, 0.0  ;;  %v3323_v33 = vadd.f32 %v7194_v61, %v9133_v50 }
 0x495   : > { %v3314_v20 = vpop.f32.mrf.mxu1  ;;  %3647 = vmatprep.mubr.bf16.mxu0 %v10374_v0 }
 0x496   : > { %v3315_v36 = vadd.f32 %v3314_v20, %v9133_v50  ;;  %v3381_v54 = vmax.f32 %v3323_v33, 0.0 }
 0x498   : > { %v3379_v43 = vmax.f32 %v3315_v36, 0.0  ;;  %v3401_v44 = vpack.c.bf16 %v3381_v54, %v3380_v48  ;;  %v7712_v36 = vld [vmem:[%s10216_s6 + $0x328] ss:$28 sps:$4 sm:$0xff]   ;;  %v7709_v54 = vld [vmem:[%s10216_s6 + $0x160] ss:$28 sps:$4 sm:$0xff]  }
 0x49a   : > { %v3400_v15 = vpack.c.bf16 %v3379_v43, %v3378_v42 }
 0x49c   : > { %3648 = vmatmul.mubr.bf16.gmra.mxu0 %v3400_v15 }
 0x49d   : > { %3657 = vmatprep.mubr.bf16.mxu0 %v10374_v0 }
 0x49f   : > { %v7197_v4 = vpop.f32.mrf.mxu1 }
 0x4a0   : > { %v3336_v10 = vadd.f32 %v7197_v4, %v9133_v50  ;;  %v7713_v4 = vld [vmem:[%s10216_s6 + $0x168] ss:$28 sps:$4 sm:$0xff]  }
 0x4a1   : > { %v3327_v18 = vpop.f32.mrf.mxu1 }
 0x4a2   : > { %v3328_v56 = vadd.f32 %v3327_v18, %v9133_v50  ;;  %v3384_v55 = vmax.f32 %v3336_v10, 0.0  ;;  %v7720_v18 = vld [vmem:[%s10216_s6 + $0x2f0] ss:$28 sps:$4 sm:$0xff]  }
 0x4a3   : > { %v7198_v57 = vpop.f32.mrf.mxu1  ;;  %v7719_v10 = vld [vmem:[%s10216_s6 + $0xf4] ss:$28 sps:$4 sm:$0xff]  }
 0x4a4   : > { %3658 = vmatmul.mubr.bf16.gmra.mxu0 %v3401_v44  ;;  %v3382_v19 = vmax.f32 %v3328_v56, 0.0  ;;  %v3339_v28 = vadd.f32 %v7198_v57, %v9133_v50 }
 0x4a5   : > { %v3330_v29 = vpop.f32.mrf.mxu1  ;;  %3667 = vmatprep.mubr.bf16.mxu0 %v10374_v0 }
 0x4a6   : > { %v3331_v13 = vadd.f32 %v3330_v29, %v9133_v50  ;;  %v3385_v59 = vmax.f32 %v3339_v28, 0.0 }
 0x4a8   : > { %v3383_v26 = vmax.f32 %v3331_v13, 0.0  ;;  %v3403_v22 = vpack.c.bf16 %v3385_v59, %v3384_v55  ;;  %v7728_v59 = vld [vmem:[%s10216_s6 + $0x2b8] ss:$28 sps:$4 sm:$0xff]  }
 0x4aa   : > { %v3402_v38 = vpack.c.bf16 %v3383_v26, %v3382_v19  ;;  %v7714_v19 = vld [vmem:[%s10216_s6 + $0x128] ss:$28 sps:$4 sm:$0xff]   ;;  %v7721_v26 = vld [vmem:[%s10216_s6 + $0x130] ss:$28 sps:$4 sm:$0xff]  }
 0x4ac   : > { %3668 = vmatmul.mubr.bf16.gmra.mxu0 %v3402_v38 }
 0x4ad   : > { %3677 = vmatprep.mubr.bf16.mxu0 %v10374_v0 }
 0x4af   : > { %v7201_v1 = vpop.f32.mrf.mxu1 }
 0x4b0   : > { %v3352_v27 = vadd.f32 %v7201_v1, %v9133_v50 }
 0x4b1   : > { %v3343_v62 = vpop.f32.mrf.mxu1 }
 0x4b2   : > { %v3344_v3 = vadd.f32 %v3343_v62, %v9133_v50  ;;  %v3388_v25 = vmax.f32 %v3352_v27, 0.0 }
 0x4b3   : > { %v7202_v58 = vpop.f32.mrf.mxu1 }
 0x4b4   : > { %3678 = vmatmul.mubr.bf16.gmra.mxu0 %v3403_v22  ;;  %v3386_v52 = vmax.f32 %v3344_v3, 0.0  ;;  %v3355_v40 = vadd.f32 %v7202_v58, %v9133_v50  ;;  %v7717_v3 = vld [vmem:[%s10216_s6 + $0xf0] ss:$28 sps:$4 sm:$0xff]  }
 0x4b5   : > { %v3346_v5 = vpop.f32.mrf.mxu1  ;;  %3687 = vmatprep.mubr.bf16.mxu0 %v10374_v0 }
 0x4b6   : > { %v3347_v11 = vadd.f32 %v3346_v5, %v9133_v50  ;;  %v3389_v16 = vmax.f32 %v3355_v40, 0.0  ;;  %v7729_v5 = vld [vmem:[%s10216_s6 + $0xf8] ss:$28 sps:$4 sm:$0xff]   ;;  %v7736_v40 = vld [vmem:[%s10216_s6 + $0x280] ss:$28 sps:$4 sm:$0xff]  }
 0x4b8   : > { %v3387_v17 = vmax.f32 %v3347_v11, 0.0  ;;  %v3405_v8 = vpack.c.bf16 %v3389_v16, %v3388_v25 }
 0x4ba   : > { %v3404_v14 = vpack.c.bf16 %v3387_v17, %v3386_v52  ;;  %v7724_v17 = vld [vmem:[%s10216_s6 + $0xbc] ss:$28 sps:$4 sm:$0xff]  }
 0x4bc   : > { %3688 = vmatmul.mubr.bf16.gmra.mxu0 %v3404_v14 }
 0x4bd   : > { %3697 = vmatprep.mubr.bf16.mxu0 %v10374_v0 }
 0x4c4   : > { %3698 = vmatmul.mubr.bf16.gmra.mxu0 %v3405_v8 }
 0x50c   : > { %v3549_v60 = vpop.f32.mrf.mxu0 }
 0x50d   : > { %v3550_v30 = vadd.f32 %v3549_v60, %v9384_v34  ;;  %v7737_v60 = vld [vmem:[%s10216_s6 + $0xc0] ss:$28 sps:$4 sm:$0xff]  }
 0x50e   : > { %v3551_v41 = vpop.f32.mrf.mxu0 }
 0x50f   : > { %v3552_v32 = vadd.f32 %v3551_v41, %v9381_v53  ;;  %v3708_v47 = vmax.f32 %v3550_v30, 0.0 }
 0x510   : > { %v3553_v50 = vpop.f32.mrf.mxu0 }
 0x511   : > { %v3554_v0 = vadd.f32 %v3553_v50, %v9384_v34  ;;  %v3709_v63 = vmax.f32 %v3552_v32, 0.0  ;;  %v7727_v32 = vld [vmem:[%s10216_s6 + $0x84] ss:$28 sps:$4 sm:$0xff]  }
 0x512   : > { %v3555_v7 = vpop.f32.mrf.mxu0 }
 0x513   : > { %v3556_v6 = vadd.f32 %v3555_v7, %v9381_v53  ;;  %v3710_v2 = vmax.f32 %v3554_v0, 0.0  ;;  %v7744_v0 = vld [vmem:[%s10216_s6 + $0x248] ss:$28 sps:$4 sm:$0xff]  }
 0x514   : > { %v3559_v23 = vpop.f32.mrf.mxu0 }
 0x515   : > { %v3711_v51 = vmax.f32 %v3556_v6, 0.0  ;;  %v9398_v20 = vpack.c.bf16 %v3710_v2, %v3708_v47  ;;  %v3560_v33 = vadd.f32 %v3559_v23, %v9384_v34 }
 0x516   : > { %v3561_v61 = vpop.f32.mrf.mxu0 }
 0x517   : > { %v9390_v37 = vpack.c.bf16 %v3711_v51, %v3709_v63  ;;  %v3562_v42 = vadd.f32 %v3561_v61, %v9381_v53  ;;  %v3712_v56 = vmax.f32 %v3560_v33, 0.0  ;;  %v7725_v63 = vld [vmem:[%s10216_s6 + $0x80] ss:$28 sps:$4 sm:$0xff]   ;;  %v7745_v51 = vld [vmem:[%s10216_s6 + $0x88] ss:$28 sps:$4 sm:$0xff]  }
 0x518   : > { %v3563_v31 = vpop.f32.mrf.mxu0  ;;  %v7730_v33 = vld [vmem:[%s10216_s6 + $0x48] ss:$28 sps:$4 sm:$0xff]  }
 0x519   : > { %v3564_v43 = vadd.f32 %v3563_v31, %v9384_v34  ;;  %4580 = vmatprep.mubr.bf16.mxu1 %v9390_v37  ;;  %4773 = vmatprep.mubr.bf16.mxu0 %v9390_v37  ;;  %v3713_v44 = vmax.f32 %v3562_v42, 0.0 }
 0x51a   : > { %v3565_v15 = vpop.f32.mrf.mxu0  ;;  %4581 = vmatmul.mubr.bf16.vlgmr.msra.gmra.mxu1 %v9398_v20  ;;  %4774 = vmatmul.mubr.bf16.vlgmr.msra.gmra.mxu0 %v9398_v20 }
 0x51b   : > { %v3566_v35 = vadd.f32 %v3565_v15, %v9381_v53  ;;  %6996 = vmatpush3.bf16.msra.mxu0 %v7705_v49  ;;  %4935 = vmatpush1.bf16.msra.mxu1 %v7706_v24  ;;  %v3714_v39 = vmax.f32 %v3564_v43, 0.0  ;;  %v7732_v49 = vld [vmem:[%s10216_s6 + $0x4c] ss:$28 sps:$4 sm:$0xff]  }
 0x51c   : > { %v3569_v48 = vpop.f32.mrf.mxu0  ;;  %4936 = vmatprep.subr.bf16.mxu1 %v7711_v21  ;;  %6997 = vmatprep.subr.bf16.mxu0 %v7712_v36  ;;  %v7752_v24 = vld [vmem:[%s10216_s6 + $0x210] ss:$28 sps:$4 sm:$0xff]  }
 0x51d   : > { %v3715_v57 = vmax.f32 %v3566_v35, 0.0  ;;  %v9434_v28 = vpack.c.bf16 %v3714_v39, %v3712_v56  ;;  %v3570_v62 = vadd.f32 %v3569_v48, %v9384_v34  ;;  %v7753_v15 = vld [vmem:[%s10216_s6 + $0x50] ss:$28 sps:$4 sm:$0xff]   ;;  %v7760_v39 = vld [vmem:[%s10216_s6 + $0x1d8] ss:$28 sps:$4 sm:$0xff]  }
 0x51e   : > { %v3571_v29 = vpop.f32.mrf.mxu0  ;;  %v7733_v56 = vld [vmem:[%s10216_s6 + $0x10] ss:$28 sps:$4 sm:$0xff]  }
 0x51f   : > { %v9426_v13 = vpack.c.bf16 %v3715_v57, %v3713_v44  ;;  %4937 = vmatpush1.bf16.msra.mxu1 %v7709_v54  ;;  %6998 = vmatpush3.bf16.msra.mxu0 %v7713_v4  ;;  %v3572_v1 = vadd.f32 %v3571_v29, %v9381_v53  ;;  %v3716_v16 = vmax.f32 %v3570_v62, 0.0  ;;  %v7735_v4 = vld [vmem:[%s10216_s6 + $0x14] ss:$28 sps:$4 sm:$0xff]  }
 0x520   : > { %v3573_v38 = vpop.f32.mrf.mxu0  ;;  %4938 = vmatprep.subr.bf16.mxu1 %v7716_v45  ;;  %6999 = vmatprep.subr.bf16.mxu0 %v7720_v18  ;;  %v7761_v29 = vld [vmem:[%s10216_s6 + $0x18] ss:$28 sps:$4 sm:$0xff]  }
 0x521   : > { %v3574_v55 = vadd.f32 %v3573_v38, %v9384_v34  ;;  %4590 = vmatprep.mubr.bf16.mxu1 %v9426_v13  ;;  %4783 = vmatprep.mubr.bf16.mxu0 %v9426_v13  ;;  %v3717_v14 = vmax.f32 %v3572_v1, 0.0  ;;  %v7740_v38 = vld [vmem:[%s10216_s6 + $0x35c] ss:$28 sps:$4 sm:$0xff]  }
 0x522   : > { %v3575_v22 = vpop.f32.mrf.mxu0  ;;  %4591 = vmatmul.mubr.bf16.gmra.mxu1 %v9434_v28  ;;  %4784 = vmatmul.mubr.bf16.gmra.mxu0 %v9434_v28 }
 0x523   : > { %v3576_v58 = vadd.f32 %v3575_v22, %v9381_v53  ;;  %4939 = vmatpush1.bf16.msra.mxu1 %v7714_v19  ;;  %7000 = vmatpush3.bf16.msra.mxu0 %v7721_v26  ;;  %v3718_v11 = vmax.f32 %v3574_v55, 0.0  ;;  %v7738_v22 = vld [vmem:[%s10216_s6 + $0x358] ss:$28 sps:$4 sm:$0xff]  }
 0x524   : > { %v3579_v52 = vpop.f32.mrf.mxu0  ;;  %4940 = vmatprep.subr.bf16.mxu1 %v7719_v10  ;;  %7001 = vmatprep.subr.bf16.mxu0 %v7728_v59 }
 0x525   : > { %v3719_v27 = vmax.f32 %v3576_v58, 0.0  ;;  %v9470_v41 = vpack.c.bf16 %v3718_v11, %v3716_v16  ;;  %v3580_v6 = vadd.f32 %v3579_v52, %v9384_v34 }
 0x526   : > { %v3581_v25 = vpop.f32.mrf.mxu0 }
 0x527   : > { %v9462_v8 = vpack.c.bf16 %v3719_v27, %v3717_v14  ;;  %4941 = vmatpush1.bf16.msra.mxu1 %v7717_v3  ;;  %7002 = vmatpush3.bf16.msra.mxu0 %v7729_v5  ;;  %v3582_v30 = vadd.f32 %v3581_v25, %v9381_v53  ;;  %v3720_v36 = vmax.f32 %v3580_v6, 0.0  ;;  %v7743_v5 = vld [vmem:[%s10216_s6 + $0x324] ss:$28 sps:$4 sm:$0xff]  }
 0x528   : > { %v3583_v50 = vpop.f32.mrf.mxu0  ;;  %4942 = vmatprep.subr.bf16.mxu1 %v7724_v17  ;;  %7003 = vmatprep.subr.bf16.mxu0 %v7736_v40  ;;  %v7741_v27 = vld [vmem:[%s10216_s6 + $0x320] ss:$28 sps:$4 sm:$0xff]  }
 0x529   : > { %v3584_v7 = vadd.f32 %v3583_v50, %v9384_v34  ;;  %4600 = vmatprep.mubr.bf16.mxu1 %v9462_v8  ;;  %4793 = vmatprep.mubr.bf16.mxu0 %v9462_v8  ;;  %v3721_v31 = vmax.f32 %v3582_v30, 0.0 }
 0x52a   : > { %v3585_v2 = vpop.f32.mrf.mxu0  ;;  %4601 = vmatmul.mubr.bf16.gmra.mxu1 %v9470_v41  ;;  %4794 = vmatmul.mubr.bf16.gmra.mxu0 %v9470_v41 }
 0x52b   : > { %v3586_v23 = vadd.f32 %v3585_v2, %v9381_v53  ;;  %4943 = vmatpush1.bf16.msra.mxu1 %v7722_v12  ;;  %7004 = vmatpush3.bf16.msra.mxu0 %v7737_v60  ;;  %v3722_v47 = vmax.f32 %v3584_v7, 0.0  ;;  %v7748_v12 = vld [vmem:[%s10216_s6 + $0x2ec] ss:$28 sps:$4 sm:$0xff]  }
 0x52c   : > { %v3589_v61 = vpop.f32.mrf.mxu0  ;;  %4944 = vmatprep.subr.bf16.mxu1 %v7727_v32  ;;  %7005 = vmatprep.subr.bf16.mxu0 %v7744_v0  ;;  %v7746_v7 = vld [vmem:[%s10216_s6 + $0x2e8] ss:$28 sps:$4 sm:$0xff]  }
 0x52d   : > { %v3723_v21 = vmax.f32 %v3586_v23, 0.0  ;;  %v9506_v35 = vpack.c.bf16 %v3722_v47, %v3720_v36  ;;  %v3590_v18 = vadd.f32 %v3589_v61, %v9384_v34  ;;  %v7751_v23 = vld [vmem:[%s10216_s6 + $0x2b4] ss:$28 sps:$4 sm:$0xff]   ;;  %v7756_v36 = vld [vmem:[%s10216_s6 + $0x27c] ss:$28 sps:$4 sm:$0xff]  }
 0x52e   : > { %v3591_v42 = vpop.f32.mrf.mxu0 }
 0x52f   : > { %v9498_v43 = vpack.c.bf16 %v3723_v21, %v3721_v31  ;;  %4945 = vmatpush1.bf16.msra.mxu1 %v7725_v63  ;;  %7006 = vmatpush3.bf16.msra.mxu0 %v7745_v51  ;;  %v3592_v48 = vadd.f32 %v3591_v42, %v9381_v53  ;;  %v3724_v1 = vmax.f32 %v3590_v18, 0.0  ;;  %v7759_v18 = vld [vmem:[%s10216_s6 + $0x244] ss:$28 sps:$4 sm:$0xff]  }
 0x530   : > { %v3593_v54 = vpop.f32.mrf.mxu0  ;;  %4946 = vmatprep.subr.bf16.mxu1 %v7732_v49  ;;  %7007 = vmatprep.subr.bf16.mxu0 %v7752_v24  ;;  %v7749_v24 = vld [vmem:[%s10216_s6 + $0x2b0] ss:$28 sps:$4 sm:$0xff]  }
 0x531   : > { %v3594_v45 = vadd.f32 %v3593_v54, %v9384_v34  ;;  %4610 = vmatprep.mubr.bf16.mxu1 %v9498_v43  ;;  %4803 = vmatprep.mubr.bf16.mxu0 %v9498_v43  ;;  %v3725_v10 = vmax.f32 %v3592_v48, 0.0 }
 0x532   : > { %v3595_v44 = vpop.f32.mrf.mxu0  ;;  %4611 = vmatmul.mubr.bf16.gmra.mxu1 %v9506_v35  ;;  %4804 = vmatmul.mubr.bf16.gmra.mxu0 %v9506_v35 }
 0x533   : > { %v3596_v57 = vadd.f32 %v3595_v44, %v9381_v53  ;;  %4947 = vmatpush1.bf16.msra.mxu1 %v7730_v33  ;;  %7008 = vmatpush3.bf16.msra.mxu0 %v7753_v15  ;;  %v3726_v19 = vmax.f32 %v3594_v45, 0.0 }
 0x534   : > { %v3599_v26 = vpop.f32.mrf.mxu0  ;;  %4948 = vmatprep.subr.bf16.mxu1 %v7735_v4  ;;  %7009 = vmatprep.subr.bf16.mxu0 %v7760_v39  ;;  %v7754_v39 = vld [vmem:[%s10216_s6 + $0x278] ss:$28 sps:$4 sm:$0xff]  }
 0x535   : > { %v3727_v59 = vmax.f32 %v3596_v57, 0.0  ;;  %v9536_v58 = vpack.c.bf16 %v3726_v19, %v3724_v1  ;;  %v3600_v17 = vadd.f32 %v3599_v26, %v9384_v34  ;;  %v7757_v26 = vld [vmem:[%s10216_s6 + $0x240] ss:$28 sps:$4 sm:$0xff]  }
 0x536   : > { %v3601_v55 = vpop.f32.mrf.mxu0 }
 0x537   : > { %v9531_v62 = vpack.c.bf16 %v3727_v59, %v3725_v10  ;;  %4949 = vmatpush1.bf16.msra.mxu1 %v7733_v56  ;;  %7010 = vmatpush3.bf16.msra.mxu0 %v7761_v29  ;;  %v3602_v11 = vadd.f32 %v3601_v55, %v9381_v53  ;;  %v3728_v32 = vmax.f32 %v3600_v17, 0.0  ;;  %v7764_v59 = vld [vmem:[%s10216_s6 + $0x20c] ss:$28 sps:$4 sm:$0xff]  }
 0x538   : > { %v3603_v3 = vpop.f32.mrf.mxu0  ;;  %4950 = vmatprep.subr.bf16.mxu1 %v7740_v38 }
 0x539   : > { %v3604_v52 = vadd.f32 %v3603_v3, %v9384_v34  ;;  %4620 = vmatprep.mubr.bf16.mxu1 %v9531_v62  ;;  %4813 = vmatprep.mubr.bf16.mxu0 %v9531_v62  ;;  %v3729_v60 = vmax.f32 %v3602_v11, 0.0  ;;  %v7762_v11 = vld [vmem:[%s10216_s6 + $0x208] ss:$28 sps:$4 sm:$0xff]  }
 0x53a   : > { %v3605_v40 = vpop.f32.mrf.mxu0  ;;  %4621 = vmatmul.mubr.bf16.gmra.mxu1 %v9536_v58  ;;  %4814 = vmatmul.mubr.bf16.gmra.mxu0 %v9536_v58 }
 0x53b   : > { %v3606_v14 = vadd.f32 %v3605_v40, %v9381_v53  ;;  %4951 = vmatpush2.bf16.msra.mxu1 %v7738_v22  ;;  %v3730_v16 = vmax.f32 %v3604_v52, 0.0  ;;  %v7767_v40 = vld [vmem:[%s10216_s6 + $0x1d4] ss:$28 sps:$4 sm:$0xff]  }
 0x53c   : > { %v3609_v25 = vpop.f32.mrf.mxu0  ;;  %4952 = vmatprep.subr.bf16.mxu1 %v7743_v5 }
 0x53d   : > { %v3731_v50 = vmax.f32 %v3606_v14, 0.0  ;;  %v9560_v6 = vpack.c.bf16 %v3730_v16, %v3728_v32  ;;  %v3610_v47 = vadd.f32 %v3609_v25, %v9384_v34 }
 0x53e   : > { %v3611_v0 = vpop.f32.mrf.mxu0 }
 0x53f   : > { %v9555_v30 = vpack.c.bf16 %v3731_v50, %v3729_v60  ;;  %4953 = vmatpush2.bf16.msra.mxu1 %v7741_v27  ;;  %v3612_v63 = vadd.f32 %v3611_v0, %v9381_v53  ;;  %v3732_v15 = vmax.f32 %v3610_v47, 0.0  ;;  %v7765_v60 = vld [vmem:[%s10216_s6 + $0x1d0] ss:$28 sps:$4 sm:$0xff]  }
 0x540   : > { %v3613_v2 = vpop.f32.mrf.mxu0  ;;  %4954 = vmatprep.subr.bf16.mxu1 %v7748_v12 }
 0x541   : > { %v3614_v51 = vadd.f32 %v3613_v2, %v9384_v34  ;;  %4630 = vmatprep.mubr.bf16.mxu1 %v9555_v30  ;;  %4823 = vmatprep.mubr.bf16.mxu0 %v9555_v30  ;;  %v3733_v42 = vmax.f32 %v3612_v63, 0.0 }
 0x542   : > { %v3615_v61 = vpop.f32.mrf.mxu0  ;;  %4631 = vmatmul.mubr.bf16.gmra.mxu1 %v9560_v6  ;;  %4824 = vmatmul.mubr.bf16.gmra.mxu0 %v9560_v6 }
 0x543   : > { %v3616_v49 = vadd.f32 %v3615_v61, %v9381_v53  ;;  %4955 = vmatpush2.bf16.msra.mxu1 %v7746_v7  ;;  %v3734_v31 = vmax.f32 %v3614_v51, 0.0 }
 0x544   : > { %v3619_v21 = vpop.f32.mrf.mxu0  ;;  %4956 = vmatprep.subr.bf16.mxu1 %v7751_v23 }
 0x545   : > { %v3735_v33 = vmax.f32 %v3616_v49, 0.0  ;;  %v9584_v48 = vpack.c.bf16 %v3734_v31, %v3732_v15  ;;  %v3620_v56 = vadd.f32 %v3619_v21, %v9384_v34 }
 0x546   : > { %v3621_v54 = vpop.f32.mrf.mxu0 }
 0x547   : > { %v9579_v4 = vpack.c.bf16 %v3735_v33, %v3733_v42  ;;  %4957 = vmatpush2.bf16.msra.mxu1 %v7749_v24  ;;  %v3622_v44 = vadd.f32 %v3621_v54, %v9381_v53  ;;  %v3736_v22 = vmax.f32 %v3620_v56, 0.0 }
 0x548   : > { %v3623_v45 = vpop.f32.mrf.mxu0  ;;  %4958 = vmatprep.subr.bf16.mxu1 %v7756_v36 }
 0x549   : > { %v3624_v57 = vadd.f32 %v3623_v45, %v9384_v34  ;;  %4640 = vmatprep.mubr.bf16.mxu1 %v9579_v4  ;;  %4833 = vmatprep.mubr.bf16.mxu0 %v9579_v4  ;;  %v3737_v1 = vmax.f32 %v3622_v44, 0.0 }
 0x54a   : > { %v3625_v29 = vpop.f32.mrf.mxu0  ;;  %4641 = vmatmul.mubr.bf16.gmra.mxu1 %v9584_v48  ;;  %4834 = vmatmul.mubr.bf16.gmra.mxu0 %v9584_v48 }
 0x54b   : > { %v3626_v19 = vadd.f32 %v3625_v29, %v9381_v53  ;;  %4959 = vmatpush2.bf16.msra.mxu1 %v7754_v39  ;;  %v3738_v38 = vmax.f32 %v3624_v57, 0.0 }
 0x54c   : > { %v3629_v10 = vpop.f32.mrf.mxu0  ;;  %4960 = vmatprep.subr.bf16.mxu1 %v7759_v18 }
 0x54d   : > { %v3739_v55 = vmax.f32 %v3626_v19, 0.0  ;;  %v9608_v52 = vpack.c.bf16 %v3738_v38, %v3736_v22  ;;  %v3630_v16 = vadd.f32 %v3629_v10, %v9384_v34 }
 0x54e   : > { %v3631_v3 = vpop.f32.mrf.mxu0 }
 0x54f   : > { %v9603_v5 = vpack.c.bf16 %v3739_v55, %v3737_v1  ;;  %4961 = vmatpush2.bf16.msra.mxu1 %v7757_v26  ;;  %v3632_v14 = vadd.f32 %v3631_v3, %v9381_v53  ;;  %v3740_v2 = vmax.f32 %v3630_v16, 0.0 }
 0x550   : > { %v3633_v17 = vpop.f32.mrf.mxu0  ;;  %4962 = vmatprep.subr.bf16.mxu1 %v7764_v59 }
 0x551   : > { %v3634_v27 = vadd.f32 %v3633_v17, %v9384_v34  ;;  %4650 = vmatprep.mubr.bf16.mxu1 %v9603_v5  ;;  %4843 = vmatprep.mubr.bf16.mxu0 %v9603_v5  ;;  %v3741_v0 = vmax.f32 %v3632_v14, 0.0 }
 0x552   : > { %v3635_v25 = vpop.f32.mrf.mxu0  ;;  %4651 = vmatmul.mubr.bf16.gmra.mxu1 %v9608_v52  ;;  %4844 = vmatmul.mubr.bf16.gmra.mxu0 %v9608_v52 }
 0x553   : > { %v3636_v12 = vadd.f32 %v3635_v25, %v9381_v53  ;;  %4963 = vmatpush2.bf16.msra.mxu1 %v7762_v11  ;;  %v3742_v50 = vmax.f32 %v3634_v27, 0.0 }
 0x554   : > { %v3639_v32 = vpop.f32.mrf.mxu0  ;;  %4964 = vmatprep.subr.bf16.mxu1 %v7767_v40 }
 0x555   : > { %v3743_v7 = vmax.f32 %v3636_v12, 0.0  ;;  %v9626_v51 = vpack.c.bf16 %v3742_v50, %v3740_v2  ;;  %v3640_v24 = vadd.f32 %v3639_v32, %v9384_v34 }
 0x556   : > { %v3641_v23 = vpop.f32.mrf.mxu0 }
 0x557   : > { %v9624_v63 = vpack.c.bf16 %v3743_v7, %v3741_v0  ;;  %4965 = vmatpush2.bf16.msra.mxu1 %v7765_v60  ;;  %v3642_v61 = vadd.f32 %v3641_v23, %v9381_v53  ;;  %v3744_v54 = vmax.f32 %v3640_v24, 0.0 }
 0x558   : > { %v3643_v47 = vpop.f32.mrf.mxu0 }
 0x559   : > { %v3644_v49 = vadd.f32 %v3643_v47, %v9384_v34  ;;  %4660 = vmatprep.mubr.bf16.mxu1 %v9624_v63  ;;  %4853 = vmatprep.mubr.bf16.mxu0 %v9624_v63  ;;  %v3745_v33 = vmax.f32 %v3642_v61, 0.0 }
 0x55a   : > { %v3645_v31 = vpop.f32.mrf.mxu0  ;;  %4661 = vmatmul.mubr.bf16.gmra.mxu1 %v9626_v51  ;;  %4854 = vmatmul.mubr.bf16.gmra.mxu0 %v9626_v51 }
 0x55b   : > { %v3646_v21 = vadd.f32 %v3645_v31, %v9381_v53  ;;  %v3746_v36 = vmax.f32 %v3644_v49, 0.0 }
 0x55c   : > { %v3649_v42 = vpop.f32.mrf.mxu0 }
 0x55d   : > { %v3747_v15 = vmax.f32 %v3646_v21, 0.0  ;;  %v9638_v18 = vpack.c.bf16 %v3746_v36, %v3744_v54  ;;  %v3650_v29 = vadd.f32 %v3649_v42, %v9384_v34 }
 0x55e   : > { %v3651_v39 = vpop.f32.mrf.mxu0 }
 0x55f   : > { %v9636_v45 = vpack.c.bf16 %v3747_v15, %v3745_v33  ;;  %v3652_v57 = vadd.f32 %v3651_v39, %v9381_v53  ;;  %v3748_v55 = vmax.f32 %v3650_v29, 0.0 }
 0x560   : > { %v3653_v44 = vpop.f32.mrf.mxu0 }
 0x561   : > { %v3654_v56 = vadd.f32 %v3653_v44, %v9384_v34  ;;  %4670 = vmatprep.mubr.bf16.mxu1 %v9636_v45  ;;  %4863 = vmatprep.mubr.bf16.mxu0 %v9636_v45  ;;  %v3749_v59 = vmax.f32 %v3652_v57, 0.0 }
 0x562   : > { %v3655_v19 = vpop.f32.mrf.mxu0  ;;  %4671 = vmatmul.mubr.bf16.gmra.mxu1 %v9638_v18  ;;  %4864 = vmatmul.mubr.bf16.gmra.mxu0 %v9638_v18 }
 0x563   : > { %v3656_v26 = vadd.f32 %v3655_v19, %v9381_v53  ;;  %v3750_v38 = vmax.f32 %v3654_v56, 0.0 }
 0x564   : > { %v3659_v10 = vpop.f32.mrf.mxu0 }
 0x565   : > { %v3751_v1 = vmax.f32 %v3656_v26, 0.0  ;;  %v9650_v11 = vpack.c.bf16 %v3750_v38, %v3748_v55  ;;  %v3660_v27 = vadd.f32 %v3659_v10, %v9384_v34 }
 0x566   : > { %v3661_v22 = vpop.f32.mrf.mxu0 }
 0x567   : > { %v9648_v3 = vpack.c.bf16 %v3751_v1, %v3749_v59  ;;  %v3662_v40 = vadd.f32 %v3661_v22, %v9381_v53  ;;  %v3752_v0 = vmax.f32 %v3660_v27, 0.0 }
 0x568   : > { %v3663_v17 = vpop.f32.mrf.mxu0 }
 0x569   : > { %v3664_v14 = vadd.f32 %v3663_v17, %v9384_v34  ;;  %4680 = vmatprep.mubr.bf16.mxu1 %v9648_v3  ;;  %4873 = vmatprep.mubr.bf16.mxu0 %v9648_v3  ;;  %v3753_v50 = vmax.f32 %v3662_v40, 0.0 }
 0x56a   : > { %v3665_v16 = vpop.f32.mrf.mxu0  ;;  %4681 = vmatmul.mubr.bf16.gmra.mxu1 %v9650_v11  ;;  %4874 = vmatmul.mubr.bf16.gmra.mxu0 %v9650_v11 }
 0x56b   : > { %v3666_v25 = vadd.f32 %v3665_v16, %v9381_v53  ;;  %v3754_v12 = vmax.f32 %v3664_v14, 0.0 }
 0x56c   : > { %v3669_v60 = vpop.f32.mrf.mxu0 }
 0x56d   : > { %v3755_v32 = vmax.f32 %v3666_v25, 0.0  ;;  %v9662_v23 = vpack.c.bf16 %v3754_v12, %v3752_v0  ;;  %v3670_v24 = vadd.f32 %v3669_v60, %v9384_v34 }
 0x56e   : > { %v3671_v7 = vpop.f32.mrf.mxu0 }
 0x56f   : > { %v9660_v2 = vpack.c.bf16 %v3755_v32, %v3753_v50  ;;  %v3672_v61 = vadd.f32 %v3671_v7, %v9381_v53  ;;  %v3756_v54 = vmax.f32 %v3670_v24, 0.0 }
 0x570   : > { %v3673_v47 = vpop.f32.mrf.mxu0 }
 0x571   : > { %v3674_v49 = vadd.f32 %v3673_v47, %v9384_v34  ;;  %4690 = vmatprep.mubr.bf16.mxu1 %v9660_v2  ;;  %4883 = vmatprep.mubr.bf16.mxu0 %v9660_v2  ;;  %v3757_v33 = vmax.f32 %v3672_v61, 0.0 }
 0x572   : > { %v3675_v31 = vpop.f32.mrf.mxu0  ;;  %4691 = vmatmul.mubr.bf16.gmra.mxu1 %v9662_v23  ;;  %4884 = vmatmul.mubr.bf16.gmra.mxu0 %v9662_v23 }
 0x573   : > { %v3676_v21 = vadd.f32 %v3675_v31, %v9381_v53  ;;  %v3758_v36 = vmax.f32 %v3674_v49, 0.0 }
 0x574   : > { %v3679_v42 = vpop.f32.mrf.mxu0 }
 0x575   : > { %v3759_v15 = vmax.f32 %v3676_v21, 0.0  ;;  %v9674_v57 = vpack.c.bf16 %v3758_v36, %v3756_v54  ;;  %v3680_v26 = vadd.f32 %v3679_v42, %v9384_v34 }
 0x576   : > { %v3681_v39 = vpop.f32.mrf.mxu0 }
 0x577   : > { %v9672_v44 = vpack.c.bf16 %v3759_v15, %v3757_v33  ;;  %v3682_v29 = vadd.f32 %v3681_v39, %v9381_v53  ;;  %v3760_v17 = vmax.f32 %v3680_v26, 0.0 }
 0x578   : > { %v3683_v56 = vpop.f32.mrf.mxu0 }
 0x579   : > { %v3684_v19 = vadd.f32 %v3683_v56, %v9384_v34  ;;  %4700 = vmatprep.mubr.bf16.mxu1 %v9672_v44  ;;  %4893 = vmatprep.mubr.bf16.mxu0 %v9672_v44  ;;  %v3761_v55 = vmax.f32 %v3682_v29, 0.0 }
 0x57a   : > { %v3685_v38 = vpop.f32.mrf.mxu0  ;;  %4701 = vmatmul.mubr.bf16.gmra.mxu1 %v9674_v57  ;;  %4894 = vmatmul.mubr.bf16.gmra.mxu0 %v9674_v57 }
 0x57b   : > { %v3686_v10 = vadd.f32 %v3685_v38, %v9381_v53  ;;  %v3762_v59 = vmax.f32 %v3684_v19, 0.0 }
 0x57c   : > { %v3689_v1 = vpop.f32.mrf.mxu0 }
 0x57d   : > { %v3763_v22 = vmax.f32 %v3686_v10, 0.0  ;;  %v9686_v27 = vpack.c.bf16 %v3762_v59, %v3760_v17  ;;  %v3690_v60 = vadd.f32 %v3689_v1, %v9384_v34 }
 0x57e   : > { %v3691_v40 = vpop.f32.mrf.mxu0 }
 0x57f   : > { %v9684_v14 = vpack.c.bf16 %v3763_v22, %v3761_v55  ;;  %v3692_v25 = vadd.f32 %v3691_v40, %v9381_v53  ;;  %v3764_v49 = vmax.f32 %v3690_v60, 0.0 }
 0x580   : > { %v3693_v16 = vpop.f32.mrf.mxu0 }
 0x581   : > { %v3694_v12 = vadd.f32 %v3693_v16, %v9384_v34  ;;  %4710 = vmatprep.mubr.bf16.mxu1 %v9684_v14  ;;  %4903 = vmatprep.mubr.bf16.mxu0 %v9684_v14  ;;  %v3765_v47 = vmax.f32 %v3692_v25, 0.0 }
 0x582   : > { %v3695_v50 = vpop.f32.mrf.mxu0  ;;  %4711 = vmatmul.mubr.bf16.gmra.mxu1 %v9686_v27  ;;  %4904 = vmatmul.mubr.bf16.gmra.mxu0 %v9686_v27 }
 0x583   : > { %v3696_v32 = vadd.f32 %v3695_v50, %v9381_v53  ;;  %v3766_v0 = vmax.f32 %v3694_v12, 0.0 }
 0x584   : > { %v3699_v7 = vpop.f32.mrf.mxu0 }
 0x585   : > { %v3767_v61 = vmax.f32 %v3696_v32, 0.0  ;;  %v9698_v21 = vpack.c.bf16 %v3766_v0, %v3764_v49  ;;  %v3700_v15 = vadd.f32 %v3699_v7, %v9384_v34 }
 0x586   : > { %v3701_v24 = vpop.f32.mrf.mxu0 }
 0x587   : > { %v9696_v31 = vpack.c.bf16 %v3767_v61, %v3765_v47  ;;  %v3702_v42 = vadd.f32 %v3701_v24, %v9381_v53  ;;  %v3768_v26 = vmax.f32 %v3700_v15, 0.0 }
 0x588   : > { %v3703_v36 = vpop.f32.mrf.mxu0 }
 0x589   : > { %v3704_v33 = vadd.f32 %v3703_v36, %v9384_v34  ;;  %4720 = vmatprep.mubr.bf16.mxu1 %v9696_v31  ;;  %4913 = vmatprep.mubr.bf16.mxu0 %v9696_v31  ;;  %v3769_v29 = vmax.f32 %v3702_v42, 0.0  ;;  %v6464_v34 = vld [vmem:[%s10217_s7 + $0x5] ss:$8 sm:$0x70] }
 0x58a   : > { %v3705_v54 = vpop.f32.mrf.mxu0  ;;  %4721 = vmatmul.mubr.bf16.gmra.mxu1 %v9698_v21  ;;  %4914 = vmatmul.mubr.bf16.gmra.mxu0 %v9698_v21 }
 0x58b   : > { %v3706_v39 = vadd.f32 %v3705_v54, %v9381_v53  ;;  %v3770_v56 = vmax.f32 %v3704_v33, 0.0  ;;  %v6463_v53 = vld [vmem:[%s10217_s7 + $0x5] ss:$8 sm:$0xf] }
 0x58d   : > { %v3771_v19 = vmax.f32 %v3706_v39, 0.0  ;;  %v9710_v10 = vpack.c.bf16 %v3770_v56, %v3768_v26 }
 0x58f   : > { %v9708_v38 = vpack.c.bf16 %v3771_v19, %v3769_v29 }
 0x591   : > { %4730 = vmatprep.mubr.bf16.mxu1 %v9708_v38  ;;  %4923 = vmatprep.mubr.bf16.mxu0 %v9708_v38 }
 0x592   : > { %4731 = vmatmul.mubr.bf16.gmra.mxu1 %v9710_v10  ;;  %4924 = vmatmul.mubr.bf16.gmra.mxu0 %v9710_v10 }
 0x593   : > { %4966 = vmatprep.mubr.bf16.mxu1 %v9390_v37  ;;  %5159 = vmatprep.mubr.bf16.mxu0 %v9390_v37  ;;  %v9756_v37 = vor.u32 %v6464_v34, %v6463_v53 }
 0x59a   : > { %4967 = vmatmul.mubr.bf16.vlgmr.msra.gmra.mxu1 %v9398_v20  ;;  %5160 = vmatmul.mubr.bf16.vlgmr.msra.gmra.mxu0 %v9398_v20  ;;  %v10377_v20 = vld [vmem:[#allocation2_spill] sm:$0xff] }
 0x59b   : > { %4976 = vmatprep.mubr.bf16.mxu1 %v9426_v13  ;;  %5167 = vmatprep.mubr.bf16.mxu0 %v9426_v13  ;;  %v3947_v13 = vsub.s32 2, %v10377_v20 }
 0x5a2   : > { %4977 = vmatmul.mubr.bf16.gmra.mxu1 %v9434_v28  ;;  %5168 = vmatmul.mubr.bf16.gmra.mxu0 %v9434_v28  ;;  %v3951_v28 = vsub.s32 3, %v10377_v20 }
 0x5a3   : > { %4986 = vmatprep.mubr.bf16.mxu1 %v9462_v8  ;;  %5175 = vmatprep.mubr.bf16.mxu0 %v9462_v8  ;;  %v9762_v8 = vrot.slane %v9756_v37, %v10376_v46 }
 0x5aa   : > { %4987 = vmatmul.mubr.bf16.gmra.mxu1 %v9470_v41  ;;  %5176 = vmatmul.mubr.bf16.gmra.mxu0 %v9470_v41  ;;  %v9765_v41 = vrot.slane %v9756_v37, %v3947_v13 }
 0x5ab   : > { %4996 = vmatprep.mubr.bf16.mxu1 %v9498_v43  ;;  %5183 = vmatprep.mubr.bf16.mxu0 %v9498_v43  ;;  %v9769_v43 = vrot.slane %v9756_v37, %v10375_v9 }
 0x5b2   : > { %4997 = vmatmul.mubr.bf16.gmra.mxu1 %v9506_v35  ;;  %5184 = vmatmul.mubr.bf16.gmra.mxu0 %v9506_v35  ;;  %v9772_v35 = vrot.slane %v9756_v37, %v3951_v28 }
 0x5b3   : > { %5006 = vmatprep.mubr.bf16.mxu1 %v9531_v62  ;;  %5191 = vmatprep.mubr.bf16.mxu0 %v9531_v62 }
 0x5ba   : > { %5007 = vmatmul.mubr.bf16.gmra.mxu1 %v9536_v58  ;;  %5192 = vmatmul.mubr.bf16.gmra.mxu0 %v9536_v58 }
 0x5bb   : > { %5016 = vmatprep.mubr.bf16.mxu1 %v9555_v30  ;;  %5199 = vmatprep.mubr.bf16.mxu0 %v9555_v30 }
 0x5c2   : > { %5017 = vmatmul.mubr.bf16.gmra.mxu1 %v9560_v6  ;;  %5200 = vmatmul.mubr.bf16.gmra.mxu0 %v9560_v6 }
 0x5c3   : > { %5026 = vmatprep.mubr.bf16.mxu1 %v9579_v4  ;;  %5207 = vmatprep.mubr.bf16.mxu0 %v9579_v4 }
 0x5ca   : > { %5027 = vmatmul.mubr.bf16.gmra.mxu1 %v9584_v48  ;;  %5208 = vmatmul.mubr.bf16.gmra.mxu0 %v9584_v48 }
 0x5cb   : > { %5036 = vmatprep.mubr.bf16.mxu1 %v9603_v5  ;;  %5215 = vmatprep.mubr.bf16.mxu0 %v9603_v5 }
 0x5d2   : > { %5037 = vmatmul.mubr.bf16.gmra.mxu1 %v9608_v52  ;;  %5216 = vmatmul.mubr.bf16.gmra.mxu0 %v9608_v52 }
 0x5d3   : > { %5046 = vmatprep.mubr.bf16.mxu1 %v9624_v63  ;;  %5223 = vmatprep.mubr.bf16.mxu0 %v9624_v63 }
 0x5da   : > { %v4582_v62 = vpop.f32.mrf.mxu1  ;;  %v4775_v58 = vpop.f32.mrf.mxu0  ;;  %5047 = vmatmul.mubr.bf16.gmra.mxu1 %v9626_v51  ;;  %5224 = vmatmul.mubr.bf16.gmra.mxu0 %v9626_v51 }
 0x5db   : > { %5056 = vmatprep.mubr.bf16.mxu1 %v9636_v45  ;;  %5231 = vmatprep.mubr.bf16.mxu0 %v9636_v45  ;;  %v4583_v6 = vadd.f32 %v4582_v62, %v9762_v8  ;;  %v4776_v9 = vadd.f32 %v4775_v58, %v9765_v41 }
 0x5dc   : > { %v4584_v46 = vpop.f32.mrf.mxu1  ;;  %v4777_v30 = vpop.f32.mrf.mxu0 }
 0x5dd   : > { %v4585_v4 = vadd.f32 %v4584_v46, %v9769_v43  ;;  %v4778_v48 = vadd.f32 %v4777_v30, %v9772_v35 }
 0x5de   : > { %v4586_v5 = vpop.f32.mrf.mxu1  ;;  %v4779_v52 = vpop.f32.mrf.mxu0 }
 0x5df   : > { %v6707_v63 = vpack.c.bf16 %v4585_v4, %v4583_v6  ;;  %v6708_v51 = vpack.c.bf16 %v4778_v48, %v4776_v9  ;;  %v4587_v1 = vadd.f32 %v4586_v5, %v9762_v8  ;;  %v4780_v55 = vadd.f32 %v4779_v52, %v9765_v41 }
 0x5e0   : > { %v4588_v45 = vpop.f32.mrf.mxu1  ;;  %v4781_v59 = vpop.f32.mrf.mxu0 }
 0x5e1   : > { %5992 = vst [vmem:[%s9787_s22] sm:$0xff] %v6707_v63  ;;  %5993 = vst [vmem:[%s9787_s22 + $0x8] sm:$0xff] %v6708_v51  ;;  %v4589_v22 = vadd.f32 %v4588_v45, %v9769_v43  ;;  %v4782_v17 = vadd.f32 %v4781_v59, %v9772_v35 }
 0x5e2   : > { %v4592_v40 = vpop.f32.mrf.mxu1  ;;  %v4785_v16 = vpop.f32.mrf.mxu0  ;;  %5057 = vmatmul.mubr.bf16.gmra.mxu1 %v9638_v18  ;;  %5232 = vmatmul.mubr.bf16.gmra.mxu0 %v9638_v18 }
 0x5e3   : > { %v6711_v25 = vpack.c.bf16 %v4589_v22, %v4587_v1  ;;  %v6712_v12 = vpack.c.bf16 %v4782_v17, %v4780_v55  ;;  %5066 = vmatprep.mubr.bf16.mxu1 %v9648_v3  ;;  %5239 = vmatprep.mubr.bf16.mxu0 %v9648_v3  ;;  %v4593_v32 = vadd.f32 %v4592_v40, %v9762_v8 }
 0x5e4   : > { %v4594_v60 = vpop.f32.mrf.mxu1  ;;  %v4787_v50 = vpop.f32.mrf.mxu0  ;;  %v4786_v0 = vadd.f32 %v4785_v16, %v9765_v41 }
 0x5e5   : > { %5997 = vst [vmem:[%s9787_s22 + $0x1c] sm:$0xff] %v6711_v25  ;;  %5998 = vst [vmem:[%s9787_s22 + $0x24] sm:$0xff] %v6712_v12  ;;  %v4595_v7 = vadd.f32 %v4594_v60, %v9769_v43  ;;  %v4788_v18 = vadd.f32 %v4787_v50, %v9772_v35 }
 0x5e6   : > { %v4596_v47 = vpop.f32.mrf.mxu1  ;;  %v4789_v61 = vpop.f32.mrf.mxu0 }
 0x5e7   : > { %v6715_v49 = vpack.c.bf16 %v4595_v7, %v4593_v32  ;;  %v6716_v24 = vpack.c.bf16 %v4788_v18, %v4786_v0  ;;  %v4597_v3 = vadd.f32 %v4596_v47, %v9762_v8  ;;  %v4790_v33 = vadd.f32 %v4789_v61, %v9765_v41 }
 0x5e8   : > { %v4598_v36 = vpop.f32.mrf.mxu1  ;;  %v4791_v42 = vpop.f32.mrf.mxu0 }
 0x5e9   : > { %6001 = vst [vmem:[%s9787_s22 + $0x38] sm:$0xff] %v6715_v49  ;;  %6002 = vst [vmem:[%s9787_s22 + $0x40] sm:$0xff] %v6716_v24  ;;  %v4599_v15 = vadd.f32 %v4598_v36, %v9769_v43  ;;  %v4792_v54 = vadd.f32 %v4791_v42, %v9772_v35 }
 0x5ea   : > { %v4602_v39 = vpop.f32.mrf.mxu1  ;;  %v4795_v56 = vpop.f32.mrf.mxu0  ;;  %5067 = vmatmul.mubr.bf16.gmra.mxu1 %v9650_v11  ;;  %5240 = vmatmul.mubr.bf16.gmra.mxu0 %v9650_v11 }
 0x5eb   : > { %v6719_v29 = vpack.c.bf16 %v4599_v15, %v4597_v3  ;;  %v6720_v19 = vpack.c.bf16 %v4792_v54, %v4790_v33  ;;  %5076 = vmatprep.mubr.bf16.mxu1 %v9660_v2  ;;  %5247 = vmatprep.mubr.bf16.mxu0 %v9660_v2  ;;  %v4603_v34 = vadd.f32 %v4602_v39, %v9762_v8 }
 0x5ec   : > { %v4604_v26 = vpop.f32.mrf.mxu1  ;;  %v4797_v53 = vpop.f32.mrf.mxu0  ;;  %v4796_v13 = vadd.f32 %v4795_v56, %v9765_v41 }
 0x5ed   : > { %6005 = vst [vmem:[%s9787_s22 + $0x54] sm:$0xff] %v6719_v29  ;;  %6006 = vst [vmem:[%s9787_s22 + $0x5c] sm:$0xff] %v6720_v19  ;;  %v4605_v28 = vadd.f32 %v4604_v26, %v9769_v43  ;;  %v4798_v11 = vadd.f32 %v4797_v53, %v9772_v35 }
 0x5ee   : > { %v4606_v62 = vpop.f32.mrf.mxu1  ;;  %v4799_v58 = vpop.f32.mrf.mxu0 }
 0x5ef   : > { %v6723_v46 = vpack.c.bf16 %v4605_v28, %v4603_v34  ;;  %v6724_v30 = vpack.c.bf16 %v4798_v11, %v4796_v13  ;;  %v4607_v2 = vadd.f32 %v4606_v62, %v9762_v8  ;;  %v4800_v4 = vadd.f32 %v4799_v58, %v9765_v41 }
 0x5f0   : > { %v4608_v6 = vpop.f32.mrf.mxu1  ;;  %v4801_v9 = vpop.f32.mrf.mxu0 }
 0x5f1   : > { %6009 = vst [vmem:[%s9787_s22 + $0x70] sm:$0xff] %v6723_v46  ;;  %6010 = vst [vmem:[%s9787_s22 + $0x78] sm:$0xff] %v6724_v30  ;;  %v4609_v48 = vadd.f32 %v4608_v6, %v9769_v43  ;;  %v4802_v5 = vadd.f32 %v4801_v9, %v9772_v35 }
 0x5f2   : > { %v4612_v52 = vpop.f32.mrf.mxu1  ;;  %v4805_v63 = vpop.f32.mrf.mxu0  ;;  %5077 = vmatmul.mubr.bf16.gmra.mxu1 %v9662_v23  ;;  %5248 = vmatmul.mubr.bf16.gmra.mxu0 %v9662_v23 }
 0x5f3   : > { %v6727_v51 = vpack.c.bf16 %v4609_v48, %v4607_v2  ;;  %v6728_v45 = vpack.c.bf16 %v4802_v5, %v4800_v4  ;;  %5086 = vmatprep.mubr.bf16.mxu1 %v9672_v44  ;;  %5255 = vmatprep.mubr.bf16.mxu0 %v9672_v44  ;;  %v4613_v55 = vadd.f32 %v4612_v52, %v9762_v8 }
 0x5f4   : > { %v4614_v59 = vpop.f32.mrf.mxu1  ;;  %v4807_v1 = vpop.f32.mrf.mxu0  ;;  %v4806_v22 = vadd.f32 %v4805_v63, %v9765_v41 }
 0x5f5   : > { %6013 = vst [vmem:[%s9787_s22 + $0x8c] sm:$0xff] %v6727_v51  ;;  %6014 = vst [vmem:[%s9787_s22 + $0x94] sm:$0xff] %v6728_v45  ;;  %v4615_v17 = vadd.f32 %v4614_v59, %v9769_v43  ;;  %v4808_v23 = vadd.f32 %v4807_v1, %v9772_v35 }
 0x5f6   : > { %v4616_v40 = vpop.f32.mrf.mxu1  ;;  %v4809_v16 = vpop.f32.mrf.mxu0 }
 0x5f7   : > { %v6731_v25 = vpack.c.bf16 %v4615_v17, %v4613_v55  ;;  %v6732_v12 = vpack.c.bf16 %v4808_v23, %v4806_v22  ;;  %v4617_v44 = vadd.f32 %v4616_v40, %v9762_v8  ;;  %v4810_v32 = vadd.f32 %v4809_v16, %v9765_v41 }
 0x5f8   : > { %v4618_v60 = vpop.f32.mrf.mxu1  ;;  %v4811_v50 = vpop.f32.mrf.mxu0 }
 0x5f9   : > { %6017 = vst [vmem:[%s9787_s22 + $0xa8] sm:$0xff] %v6731_v25  ;;  %6018 = vst [vmem:[%s9787_s22 + $0xb0] sm:$0xff] %v6732_v12  ;;  %v4619_v0 = vadd.f32 %v4618_v60, %v9769_v43  ;;  %v4812_v7 = vadd.f32 %v4811_v50, %v9772_v35 }
 0x5fa   : > { %v4622_v18 = vpop.f32.mrf.mxu1  ;;  %v4815_v47 = vpop.f32.mrf.mxu0  ;;  %5087 = vmatmul.mubr.bf16.gmra.mxu1 %v9674_v57  ;;  %5256 = vmatmul.mubr.bf16.gmra.mxu0 %v9674_v57 }
 0x5fb   : > { %v6735_v61 = vpack.c.bf16 %v4619_v0, %v4617_v44  ;;  %v6736_v49 = vpack.c.bf16 %v4812_v7, %v4810_v32  ;;  %5096 = vmatprep.mubr.bf16.mxu1 %v9684_v14  ;;  %5263 = vmatprep.mubr.bf16.mxu0 %v9684_v14  ;;  %v4623_v42 = vadd.f32 %v4622_v18, %v9762_v8 }
 0x5fc   : > { %v4624_v24 = vpop.f32.mrf.mxu1  ;;  %v4817_v36 = vpop.f32.mrf.mxu0  ;;  %v4816_v3 = vadd.f32 %v4815_v47, %v9765_v41 }
 0x5fd   : > { %6021 = vst [vmem:[%s9787_s22 + $0xc4] sm:$0xff] %v6735_v61  ;;  %6022 = vst [vmem:[%s9787_s22 + $0xcc] sm:$0xff] %v6736_v49  ;;  %v4625_v33 = vadd.f32 %v4624_v24, %v9769_v43  ;;  %v4818_v57 = vadd.f32 %v4817_v36, %v9772_v35 }
 0x5fe   : > { %v4626_v15 = vpop.f32.mrf.mxu1  ;;  %v4819_v54 = vpop.f32.mrf.mxu0 }
 0x5ff   : > { %v6739_v39 = vpack.c.bf16 %v4625_v33, %v4623_v42  ;;  %v6740_v56 = vpack.c.bf16 %v4818_v57, %v4816_v3  ;;  %v4627_v14 = vadd.f32 %v4626_v15, %v9762_v8  ;;  %v4820_v26 = vadd.f32 %v4819_v54, %v9765_v41 }
 0x600   : > { %v4628_v29 = vpop.f32.mrf.mxu1  ;;  %v4821_v19 = vpop.f32.mrf.mxu0 }
 0x601   : > { %6025 = vst [vmem:[%s9787_s22 + $0xe0] sm:$0xff] %v6739_v39  ;;  %6026 = vst [vmem:[%s9787_s22 + $0xe8] sm:$0xff] %v6740_v56  ;;  %v4629_v53 = vadd.f32 %v4628_v29, %v9769_v43  ;;  %v4822_v34 = vadd.f32 %v4821_v19, %v9772_v35 }
 0x602   : > { %v4632_v13 = vpop.f32.mrf.mxu1  ;;  %v4825_v28 = vpop.f32.mrf.mxu0  ;;  %5097 = vmatmul.mubr.bf16.gmra.mxu1 %v9686_v27  ;;  %5264 = vmatmul.mubr.bf16.gmra.mxu0 %v9686_v27 }
 0x603   : > { %v6743_v11 = vpack.c.bf16 %v4629_v53, %v4627_v14  ;;  %v6744_v62 = vpack.c.bf16 %v4822_v34, %v4820_v26  ;;  %5106 = vmatprep.mubr.bf16.mxu1 %v9696_v31  ;;  %5271 = vmatprep.mubr.bf16.mxu0 %v9696_v31  ;;  %v4633_v30 = vadd.f32 %v4632_v13, %v9762_v8 }
 0x604   : > { %v4634_v58 = vpop.f32.mrf.mxu1  ;;  %v4827_v46 = vpop.f32.mrf.mxu0  ;;  %v4826_v6 = vadd.f32 %v4825_v28, %v9765_v41 }
 0x605   : > { %6029 = vst [vmem:[%s9787_s22 + $0xfc] sm:$0xff] %v6743_v11  ;;  %6030 = vst [vmem:[%s9787_s22 + $0x104] sm:$0xff] %v6744_v62  ;;  %v4635_v9 = vadd.f32 %v4634_v58, %v9769_v43  ;;  %v4828_v27 = vadd.f32 %v4827_v46, %v9772_v35 }
 0x606   : > { %v4636_v2 = vpop.f32.mrf.mxu1  ;;  %v4829_v4 = vpop.f32.mrf.mxu0 }
 0x607   : > { %v6747_v48 = vpack.c.bf16 %v4635_v9, %v4633_v30  ;;  %v6748_v5 = vpack.c.bf16 %v4828_v27, %v4826_v6  ;;  %v4637_v31 = vadd.f32 %v4636_v2, %v9762_v8  ;;  %v4830_v51 = vadd.f32 %v4829_v4, %v9765_v41 }
 0x608   : > { %v4638_v52 = vpop.f32.mrf.mxu1  ;;  %v4831_v63 = vpop.f32.mrf.mxu0 }
 0x609   : > { %6033 = vst [vmem:[%s9787_s22 + $0x118] sm:$0xff] %v6747_v48  ;;  %6034 = vst [vmem:[%s9787_s22 + $0x120] sm:$0xff] %v6748_v5  ;;  %v4639_v45 = vadd.f32 %v4638_v52, %v9769_v43  ;;  %v4832_v59 = vadd.f32 %v4831_v63, %v9772_v35 }
 0x60a   : > { %v4642_v1 = vpop.f32.mrf.mxu1  ;;  %v4835_v55 = vpop.f32.mrf.mxu0  ;;  %5107 = vmatmul.mubr.bf16.gmra.mxu1 %v9698_v21  ;;  %5272 = vmatmul.mubr.bf16.gmra.mxu0 %v9698_v21 }
 0x60b   : > { %v6751_v22 = vpack.c.bf16 %v4639_v45, %v4637_v31  ;;  %v6752_v17 = vpack.c.bf16 %v4832_v59, %v4830_v51  ;;  %5116 = vmatprep.mubr.bf16.mxu1 %v9708_v38  ;;  %5279 = vmatprep.mubr.bf16.mxu0 %v9708_v38  ;;  %v4643_v16 = vadd.f32 %v4642_v1, %v9762_v8 }
 0x60c   : > { %v4644_v23 = vpop.f32.mrf.mxu1  ;;  %v4837_v40 = vpop.f32.mrf.mxu0  ;;  %v4836_v25 = vadd.f32 %v4835_v55, %v9765_v41 }
 0x60d   : > { %6037 = vst [vmem:[%s9787_s22 + $0x134] sm:$0xff] %v6751_v22  ;;  %6038 = vst [vmem:[%s9787_s22 + $0x13c] sm:$0xff] %v6752_v17  ;;  %v4645_v12 = vadd.f32 %v4644_v23, %v9769_v43  ;;  %v4838_v21 = vadd.f32 %v4837_v40, %v9772_v35 }
 0x60e   : > { %v4646_v60 = vpop.f32.mrf.mxu1  ;;  %v4839_v50 = vpop.f32.mrf.mxu0 }
 0x60f   : > { %v6755_v44 = vpack.c.bf16 %v4645_v12, %v4643_v16  ;;  %v6756_v32 = vpack.c.bf16 %v4838_v21, %v4836_v25  ;;  %v4647_v7 = vadd.f32 %v4646_v60, %v9762_v8  ;;  %v4840_v18 = vadd.f32 %v4839_v50, %v9765_v41 }
 0x610   : > { %v4648_v0 = vpop.f32.mrf.mxu1  ;;  %v4841_v38 = vpop.f32.mrf.mxu0 }
 0x611   : > { %6041 = vst [vmem:[%s9787_s22 + $0x150] sm:$0xff] %v6755_v44  ;;  %6042 = vst [vmem:[%s9787_s22 + $0x158] sm:$0xff] %v6756_v32  ;;  %v4649_v47 = vadd.f32 %v4648_v0, %v9769_v43  ;;  %v4842_v61 = vadd.f32 %v4841_v38, %v9772_v35 }
 0x612   : > { %v4652_v49 = vpop.f32.mrf.mxu1  ;;  %v4845_v24 = vpop.f32.mrf.mxu0  ;;  %5117 = vmatmul.mubr.bf16.gmra.mxu1 %v9710_v10  ;;  %5280 = vmatmul.mubr.bf16.gmra.mxu0 %v9710_v10 }
 0x613   : > { %v6759_v36 = vpack.c.bf16 %v4649_v47, %v4647_v7  ;;  %v6760_v42 = vpack.c.bf16 %v4842_v61, %v4840_v18  ;;  %v4653_v57 = vadd.f32 %v4652_v49, %v9762_v8  ;;  %v4846_v15 = vadd.f32 %v4845_v24, %v9765_v41 }
 0x614   : > { %v4654_v3 = vpop.f32.mrf.mxu1  ;;  %v4847_v33 = vpop.f32.mrf.mxu0 }
 0x615   : > { %6045 = vst [vmem:[%s9787_s22 + $0x16c] sm:$0xff] %v6759_v36  ;;  %6046 = vst [vmem:[%s9787_s22 + $0x174] sm:$0xff] %v6760_v42  ;;  %v4655_v54 = vadd.f32 %v4654_v3, %v9769_v43  ;;  %v4848_v39 = vadd.f32 %v4847_v33, %v9772_v35 }
 0x616   : > { %v4656_v56 = vpop.f32.mrf.mxu1  ;;  %v4849_v29 = vpop.f32.mrf.mxu0 }
 0x617   : > { %v6763_v19 = vpack.c.bf16 %v4655_v54, %v4653_v57  ;;  %v6764_v10 = vpack.c.bf16 %v4848_v39, %v4846_v15  ;;  %v4657_v53 = vadd.f32 %v4656_v56, %v9762_v8  ;;  %v4850_v34 = vadd.f32 %v4849_v29, %v9765_v41 }
 0x618   : > { %v4658_v14 = vpop.f32.mrf.mxu1  ;;  %v4851_v26 = vpop.f32.mrf.mxu0 }
 0x619   : > { %6049 = vst [vmem:[%s9787_s22 + $0x188] sm:$0xff] %v6763_v19  ;;  %6050 = vst [vmem:[%s9787_s22 + $0x190] sm:$0xff] %v6764_v10  ;;  %v4659_v13 = vadd.f32 %v4658_v14, %v9769_v43  ;;  %v4852_v28 = vadd.f32 %v4851_v26, %v9772_v35 }
 0x61a   : > { %v4662_v11 = vpop.f32.mrf.mxu1  ;;  %v4855_v62 = vpop.f32.mrf.mxu0 }
 0x61b   : > { %v6767_v58 = vpack.c.bf16 %v4659_v13, %v4657_v53  ;;  %v6768_v46 = vpack.c.bf16 %v4852_v28, %v4850_v34  ;;  %v4663_v9 = vadd.f32 %v4662_v11, %v9762_v8  ;;  %v4856_v27 = vadd.f32 %v4855_v62, %v9765_v41 }
 0x61c   : > { %v4664_v30 = vpop.f32.mrf.mxu1  ;;  %v4857_v6 = vpop.f32.mrf.mxu0 }
 0x61d   : > { %6053 = vst [vmem:[%s9787_s22 + $0x1a4] sm:$0xff] %v6767_v58  ;;  %6054 = vst [vmem:[%s9787_s22 + $0x1ac] sm:$0xff] %v6768_v46  ;;  %v4665_v2 = vadd.f32 %v4664_v30, %v9769_v43  ;;  %v4858_v4 = vadd.f32 %v4857_v6, %v9772_v35 }
 0x61e   : > { %v4666_v48 = vpop.f32.mrf.mxu1  ;;  %v4859_v5 = vpop.f32.mrf.mxu0 }
 0x61f   : > { %v6771_v52 = vpack.c.bf16 %v4665_v2, %v4663_v9  ;;  %v6772_v63 = vpack.c.bf16 %v4858_v4, %v4856_v27  ;;  %v4667_v45 = vadd.f32 %v4666_v48, %v9762_v8  ;;  %v4860_v59 = vadd.f32 %v4859_v5, %v9765_v41 }
 0x620   : > { %v4668_v31 = vpop.f32.mrf.mxu1  ;;  %v4861_v51 = vpop.f32.mrf.mxu0 }
 0x621   : > { %6057 = vst [vmem:[%s9787_s22 + $0x1c0] sm:$0xff] %v6771_v52  ;;  %6058 = vst [vmem:[%s9787_s22 + $0x1c8] sm:$0xff] %v6772_v63  ;;  %v4669_v1 = vadd.f32 %v4668_v31, %v9769_v43  ;;  %v4862_v55 = vadd.f32 %v4861_v51, %v9772_v35 }
 0x622   : > { %v4672_v22 = vpop.f32.mrf.mxu1  ;;  %v4865_v17 = vpop.f32.mrf.mxu0 }
 0x623   : > { %v6775_v23 = vpack.c.bf16 %v4669_v1, %v4667_v45  ;;  %v6776_v40 = vpack.c.bf16 %v4862_v55, %v4860_v59  ;;  %v4673_v12 = vadd.f32 %v4672_v22, %v9762_v8  ;;  %v4866_v21 = vadd.f32 %v4865_v17, %v9765_v41 }
 0x624   : > { %v4674_v16 = vpop.f32.mrf.mxu1  ;;  %v4867_v25 = vpop.f32.mrf.mxu0 }
 0x625   : > { %6061 = vst [vmem:[%s9787_s22 + $0x1dc] sm:$0xff] %v6775_v23  ;;  %6062 = vst [vmem:[%s9787_s22 + $0x1e4] sm:$0xff] %v6776_v40  ;;  %v4675_v60 = vadd.f32 %v4674_v16, %v9769_v43  ;;  %v4868_v50 = vadd.f32 %v4867_v25, %v9772_v35 }
 0x626   : > { %v4676_v44 = vpop.f32.mrf.mxu1  ;;  %v4869_v32 = vpop.f32.mrf.mxu0 }
 0x627   : > { %v6779_v0 = vpack.c.bf16 %v4675_v60, %v4673_v12  ;;  %v6780_v38 = vpack.c.bf16 %v4868_v50, %v4866_v21  ;;  %v4677_v47 = vadd.f32 %v4676_v44, %v9762_v8  ;;  %v4870_v61 = vadd.f32 %v4869_v32, %v9765_v41 }
 0x628   : > { %v4678_v7 = vpop.f32.mrf.mxu1  ;;  %v4871_v18 = vpop.f32.mrf.mxu0 }
 0x629   : > { %6065 = vst [vmem:[%s9787_s22 + $0x1f8] sm:$0xff] %v6779_v0  ;;  %6066 = vst [vmem:[%s9787_s22 + $0x200] sm:$0xff] %v6780_v38  ;;  %v4679_v49 = vadd.f32 %v4678_v7, %v9769_v43  ;;  %v4872_v24 = vadd.f32 %v4871_v18, %v9772_v35 }
 0x62a   : > { %v4682_v36 = vpop.f32.mrf.mxu1  ;;  %v4875_v42 = vpop.f32.mrf.mxu0 }
 0x62b   : > { %v6783_v3 = vpack.c.bf16 %v4679_v49, %v4677_v47  ;;  %v6784_v33 = vpack.c.bf16 %v4872_v24, %v4870_v61  ;;  %v4683_v54 = vadd.f32 %v4682_v36, %v9762_v8  ;;  %v4876_v39 = vadd.f32 %v4875_v42, %v9765_v41 }
 0x62c   : > { %v4684_v57 = vpop.f32.mrf.mxu1  ;;  %v4877_v15 = vpop.f32.mrf.mxu0 }
 0x62d   : > { %6069 = vst [vmem:[%s9787_s22 + $0x214] sm:$0xff] %v6783_v3  ;;  %6070 = vst [vmem:[%s9787_s22 + $0x21c] sm:$0xff] %v6784_v33  ;;  %v4685_v56 = vadd.f32 %v4684_v57, %v9769_v43  ;;  %v4878_v29 = vadd.f32 %v4877_v15, %v9772_v35 }
 0x62e   : > { %v4686_v19 = vpop.f32.mrf.mxu1  ;;  %v4879_v10 = vpop.f32.mrf.mxu0 }
 0x62f   : > { %v6787_v14 = vpack.c.bf16 %v4685_v56, %v4683_v54  ;;  %v6788_v26 = vpack.c.bf16 %v4878_v29, %v4876_v39  ;;  %v4687_v13 = vadd.f32 %v4686_v19, %v9762_v8  ;;  %v4880_v28 = vadd.f32 %v4879_v10, %v9765_v41 }
 0x630   : > { %v4688_v53 = vpop.f32.mrf.mxu1  ;;  %v4881_v34 = vpop.f32.mrf.mxu0 }
 0x631   : > { %6073 = vst [vmem:[%s9787_s22 + $0x230] sm:$0xff] %v6787_v14  ;;  %6074 = vst [vmem:[%s9787_s22 + $0x238] sm:$0xff] %v6788_v26  ;;  %v4689_v11 = vadd.f32 %v4688_v53, %v9769_v43  ;;  %v4882_v62 = vadd.f32 %v4881_v34, %v9772_v35 }
 0x632   : > { %v4692_v58 = vpop.f32.mrf.mxu1  ;;  %v4885_v46 = vpop.f32.mrf.mxu0 }
 0x633   : > { %v6791_v30 = vpack.c.bf16 %v4689_v11, %v4687_v13  ;;  %v6792_v6 = vpack.c.bf16 %v4882_v62, %v4880_v28  ;;  %v4693_v2 = vadd.f32 %v4692_v58, %v9762_v8  ;;  %v4886_v4 = vadd.f32 %v4885_v46, %v9765_v41 }
 0x634   : > { %v4694_v9 = vpop.f32.mrf.mxu1  ;;  %v4887_v27 = vpop.f32.mrf.mxu0 }
 0x635   : > { %6077 = vst [vmem:[%s9787_s22 + $0x24c] sm:$0xff] %v6791_v30  ;;  %6078 = vst [vmem:[%s9787_s22 + $0x254] sm:$0xff] %v6792_v6  ;;  %v4695_v48 = vadd.f32 %v4694_v9, %v9769_v43  ;;  %v4888_v5 = vadd.f32 %v4887_v27, %v9772_v35 }
 0x636   : > { %v4696_v52 = vpop.f32.mrf.mxu1  ;;  %v4889_v63 = vpop.f32.mrf.mxu0 }
 0x637   : > { %v6795_v31 = vpack.c.bf16 %v4695_v48, %v4693_v2  ;;  %v6796_v51 = vpack.c.bf16 %v4888_v5, %v4886_v4  ;;  %v4697_v1 = vadd.f32 %v4696_v52, %v9762_v8  ;;  %v4890_v55 = vadd.f32 %v4889_v63, %v9765_v41 }
 0x638   : > { %v4698_v45 = vpop.f32.mrf.mxu1  ;;  %v4891_v59 = vpop.f32.mrf.mxu0 }
 0x639   : > { %6081 = vst [vmem:[%s9787_s22 + $0x268] sm:$0xff] %v6795_v31  ;;  %6082 = vst [vmem:[%s9787_s22 + $0x270] sm:$0xff] %v6796_v51  ;;  %v4699_v22 = vadd.f32 %v4698_v45, %v9769_v43  ;;  %v4892_v17 = vadd.f32 %v4891_v59, %v9772_v35 }
 0x63a   : > { %v4702_v23 = vpop.f32.mrf.mxu1  ;;  %v4895_v40 = vpop.f32.mrf.mxu0 }
 0x63b   : > { %v6799_v16 = vpack.c.bf16 %v4699_v22, %v4697_v1  ;;  %v6800_v25 = vpack.c.bf16 %v4892_v17, %v4890_v55  ;;  %v4703_v60 = vadd.f32 %v4702_v23, %v9762_v8  ;;  %v4896_v50 = vadd.f32 %v4895_v40, %v9765_v41 }
 0x63c   : > { %v4704_v12 = vpop.f32.mrf.mxu1  ;;  %v4897_v21 = vpop.f32.mrf.mxu0 }
 0x63d   : > { %6085 = vst [vmem:[%s9787_s22 + $0x284] sm:$0xff] %v6799_v16  ;;  %6086 = vst [vmem:[%s9787_s22 + $0x28c] sm:$0xff] %v6800_v25  ;;  %v4705_v44 = vadd.f32 %v4704_v12, %v9769_v43  ;;  %v4898_v32 = vadd.f32 %v4897_v21, %v9772_v35 }
 0x63e   : > { %v4706_v0 = vpop.f32.mrf.mxu1  ;;  %v4899_v38 = vpop.f32.mrf.mxu0 }
 0x63f   : > { %v6803_v7 = vpack.c.bf16 %v4705_v44, %v4703_v60  ;;  %v6804_v18 = vpack.c.bf16 %v4898_v32, %v4896_v50  ;;  %v4707_v49 = vadd.f32 %v4706_v0, %v9762_v8  ;;  %v4900_v24 = vadd.f32 %v4899_v38, %v9765_v41 }
 0x640   : > { %v4708_v47 = vpop.f32.mrf.mxu1  ;;  %v4901_v61 = vpop.f32.mrf.mxu0  ;;  %v3955_v44 = vsub.s32 4, %v10377_v20  ;;  %v3959_v32 = vsub.s32 5, %v10377_v20 }
 0x641   : > { %6089 = vst [vmem:[%s9787_s22 + $0x2a0] sm:$0xff] %v6803_v7  ;;  %6090 = vst [vmem:[%s9787_s22 + $0x2a8] sm:$0xff] %v6804_v18  ;;  %v4709_v36 = vadd.f32 %v4708_v47, %v9769_v43  ;;  %v4902_v42 = vadd.f32 %v4901_v61, %v9772_v35 }
 0x642   : > { %v4712_v3 = vpop.f32.mrf.mxu1  ;;  %v4905_v33 = vpop.f32.mrf.mxu0 }
 0x643   : > { %v6807_v57 = vpack.c.bf16 %v4709_v36, %v4707_v49  ;;  %v6808_v15 = vpack.c.bf16 %v4902_v42, %v4900_v24  ;;  %v4713_v56 = vadd.f32 %v4712_v3, %v9762_v8  ;;  %v4906_v29 = vadd.f32 %v4905_v33, %v9765_v41 }
 0x644   : > { %v4714_v54 = vpop.f32.mrf.mxu1  ;;  %v4907_v39 = vpop.f32.mrf.mxu0  ;;  %v3963_v36 = vsub.s32 6, %v10377_v20  ;;  %v9999_v33 = vrot.slane %v9756_v37, %v3955_v44 }
 0x645   : > { %6093 = vst [vmem:[%s9787_s22 + $0x2bc] sm:$0xff] %v6807_v57  ;;  %6094 = vst [vmem:[%s9787_s22 + $0x2c4] sm:$0xff] %v6808_v15  ;;  %v4715_v19 = vadd.f32 %v4714_v54, %v9769_v43  ;;  %v4908_v10 = vadd.f32 %v4907_v39, %v9772_v35  ;;  %v10002_v57 = vrot.slane %v9756_v37, %v3959_v32 }
 0x646   : > { %v4716_v14 = vpop.f32.mrf.mxu1  ;;  %v4909_v26 = vpop.f32.mrf.mxu0 }
 0x647   : > { %v6811_v53 = vpack.c.bf16 %v4715_v19, %v4713_v56  ;;  %v6812_v34 = vpack.c.bf16 %v4908_v10, %v4906_v29  ;;  %v4717_v11 = vadd.f32 %v4716_v14, %v9762_v8  ;;  %v4910_v62 = vadd.f32 %v4909_v26, %v9765_v41 }
 0x648   : > { %v4718_v13 = vpop.f32.mrf.mxu1  ;;  %v4911_v28 = vpop.f32.mrf.mxu0  ;;  %v10011_v14 = vrot.slane %v9756_v37, %v3963_v36 }
 0x649   : > { %6097 = vst [vmem:[%s9787_s22 + $0x2d8] sm:$0xff] %v6811_v53  ;;  %6098 = vst [vmem:[%s9787_s22 + $0x2e0] sm:$0xff] %v6812_v34  ;;  %v4719_v58 = vadd.f32 %v4718_v13, %v9769_v43  ;;  %v4912_v46 = vadd.f32 %v4911_v28, %v9772_v35 }
 0x64a   : > { %v4722_v30 = vpop.f32.mrf.mxu1  ;;  %v4915_v6 = vpop.f32.mrf.mxu0 }
 0x64b   : > { %v6815_v9 = vpack.c.bf16 %v4719_v58, %v4717_v11  ;;  %v6816_v27 = vpack.c.bf16 %v4912_v46, %v4910_v62  ;;  %v4723_v48 = vadd.f32 %v4722_v30, %v9762_v8  ;;  %v4916_v5 = vadd.f32 %v4915_v6, %v9765_v41 }
 0x64c   : > { %v4724_v2 = vpop.f32.mrf.mxu1  ;;  %v4917_v4 = vpop.f32.mrf.mxu0 }
 0x64d   : > { %6101 = vst [vmem:[%s9787_s22 + $0x2f4] sm:$0xff] %v6815_v9  ;;  %6102 = vst [vmem:[%s9787_s22 + $0x2fc] sm:$0xff] %v6816_v27  ;;  %v4725_v52 = vadd.f32 %v4724_v2, %v9769_v43  ;;  %v4918_v63 = vadd.f32 %v4917_v4, %v9772_v35 }
 0x64e   : > { %v4726_v31 = vpop.f32.mrf.mxu1  ;;  %v4919_v51 = vpop.f32.mrf.mxu0 }
 0x64f   : > { %v6819_v45 = vpack.c.bf16 %v4725_v52, %v4723_v48  ;;  %v6820_v59 = vpack.c.bf16 %v4918_v63, %v4916_v5  ;;  %v4727_v22 = vadd.f32 %v4726_v31, %v9762_v8  ;;  %v4920_v17 = vadd.f32 %v4919_v51, %v9765_v41 }
 0x650   : > { %v4728_v1 = vpop.f32.mrf.mxu1  ;;  %v4921_v55 = vpop.f32.mrf.mxu0 }
 0x651   : > { %6105 = vst [vmem:[%s9787_s22 + $0x310] sm:$0xff] %v6819_v45  ;;  %6106 = vst [vmem:[%s9787_s22 + $0x318] sm:$0xff] %v6820_v59  ;;  %v4729_v23 = vadd.f32 %v4728_v1, %v9769_v43  ;;  %v4922_v40 = vadd.f32 %v4921_v55, %v9772_v35 }
 0x652   : > { %v4732_v16 = vpop.f32.mrf.mxu1  ;;  %v4925_v25 = vpop.f32.mrf.mxu0 }
 0x653   : > { %v6823_v12 = vpack.c.bf16 %v4729_v23, %v4727_v22  ;;  %v6824_v21 = vpack.c.bf16 %v4922_v40, %v4920_v17  ;;  %v4733_v0 = vadd.f32 %v4732_v16, %v9762_v8  ;;  %v4926_v38 = vadd.f32 %v4925_v25, %v9765_v41 }
 0x654   : > { %v4734_v60 = vpop.f32.mrf.mxu1  ;;  %v4927_v50 = vpop.f32.mrf.mxu0 }
 0x655   : > { %6109 = vst [vmem:[%s9787_s22 + $0x32c] sm:$0xff] %v6823_v12  ;;  %6110 = vst [vmem:[%s9787_s22 + $0x334] sm:$0xff] %v6824_v21  ;;  %v4735_v7 = vadd.f32 %v4734_v60, %v9769_v43  ;;  %v4928_v18 = vadd.f32 %v4927_v50, %v9772_v35 }
 0x656   : > { %v4736_v47 = vpop.f32.mrf.mxu1  ;;  %v4929_v61 = vpop.f32.mrf.mxu0 }
 0x657   : > { %v6827_v49 = vpack.c.bf16 %v4735_v7, %v4733_v0  ;;  %v6828_v24 = vpack.c.bf16 %v4928_v18, %v4926_v38  ;;  %v4737_v15 = vadd.f32 %v4736_v47, %v9762_v8  ;;  %v4930_v54 = vadd.f32 %v4929_v61, %v9765_v41 }
 0x658   : > { %v4738_v42 = vpop.f32.mrf.mxu1  ;;  %v4931_v3 = vpop.f32.mrf.mxu0 }
 0x659   : > { %6113 = vst [vmem:[%s9787_s22 + $0x348] sm:$0xff] %v6827_v49  ;;  %6114 = vst [vmem:[%s9787_s22 + $0x350] sm:$0xff] %v6828_v24  ;;  %v4739_v39 = vadd.f32 %v4738_v42, %v9769_v43  ;;  %v4932_v20 = vadd.f32 %v4931_v3, %v9772_v35 }
 0x65a   : > { %v4968_v56 = vpop.f32.mrf.mxu1  ;;  %v7011_v29 = vpop.f32.mrf.mxu0 }
 0x65b   : > { %v6831_v19 = vpack.c.bf16 %v4739_v39, %v4737_v15  ;;  %v6832_v10 = vpack.c.bf16 %v4932_v20, %v4930_v54  ;;  %v4969_v8 = vadd.f32 %v4968_v56, %v9999_v33 }
 0x65c   : > { %v4970_v26 = vpop.f32.mrf.mxu1  ;;  %v7012_v53 = vpop.f32.mrf.mxu0 }
 0x65d   : > { %6117 = vst [vmem:[%s9787_s22 + $0x364] sm:$0xff] %v6831_v19  ;;  %6118 = vst [vmem:[%s9787_s22 + $0x36c] sm:$0xff] %v6832_v10  ;;  %v4971_v41 = vadd.f32 %v4970_v26, %v10002_v57  ;;  %v7013_v43 = vadd.f32 %v7012_v53, %v7011_v29 }
 0x65e   : > { %v4972_v34 = vpop.f32.mrf.mxu1  ;;  %v7014_v35 = vpop.f32.mrf.mxu0 }
 0x65f   : > { %v6709_v13 = vpack.c.bf16 %v4971_v41, %v4969_v8  ;;  %v5162_v28 = vadd.f32 %v7013_v43, %v10011_v14  ;;  %v4973_v58 = vadd.f32 %v4972_v34, %v9999_v33 }
 0x660   : > { %v4974_v11 = vpop.f32.mrf.mxu1  ;;  %v7015_v37 = vpop.f32.mrf.mxu0 }
 0x661   : > { %5994 = vst [vmem:[%s9787_s22 + $0x10] sm:$0xff] %v6709_v13  ;;  %v6710_v62 = vpack.c.bf16 %v5162_v28, %v5162_v28  ;;  %v4975_v46 = vadd.f32 %v4974_v11, %v10002_v57  ;;  %v7016_v30 = vadd.f32 %v7015_v37, %v7014_v35 }
 0x662   : > { %v4978_v6 = vpop.f32.mrf.mxu1  ;;  %v7017_v9 = vpop.f32.mrf.mxu0 }
 0x663   : > { %5996 = vst.msk [vmem:[%s9787_s22 + $0x18] sm:$0xf] %vm5995_vm1, %v6710_v62  ;;  %v6713_v27 = vpack.c.bf16 %v4975_v46, %v4973_v58  ;;  %v5165_v2 = vadd.f32 %v7016_v30, %v10011_v14  ;;  %v4979_v52 = vadd.f32 %v4978_v6, %v9999_v33 }
 0x664   : > { %v4980_v4 = vpop.f32.mrf.mxu1  ;;  %v7018_v48 = vpop.f32.mrf.mxu0 }
 0x665   : > { %5999 = vst [vmem:[%s9787_s22 + $0x2c] sm:$0xff] %v6713_v27  ;;  %v6714_v5 = vpack.c.bf16 %v5165_v2, %v5165_v2  ;;  %v4981_v63 = vadd.f32 %v4980_v4, %v10002_v57  ;;  %v7019_v31 = vadd.f32 %v7018_v48, %v7017_v9 }
 0x666   : > { %v4982_v51 = vpop.f32.mrf.mxu1  ;;  %v7020_v45 = vpop.f32.mrf.mxu0 }
 0x667   : > { %6000 = vst.msk [vmem:[%s9787_s22 + $0x34] sm:$0xf] %vm5995_vm1, %v6714_v5  ;;  %v6717_v59 = vpack.c.bf16 %v4981_v63, %v4979_v52  ;;  %v5170_v1 = vadd.f32 %v7019_v31, %v10011_v14  ;;  %v4983_v23 = vadd.f32 %v4982_v51, %v9999_v33 }
 0x668   : > { %v4984_v55 = vpop.f32.mrf.mxu1  ;;  %v7021_v22 = vpop.f32.mrf.mxu0 }
 0x669   : > { %6003 = vst [vmem:[%s9787_s22 + $0x48] sm:$0xff] %v6717_v59  ;;  %v6718_v17 = vpack.c.bf16 %v5170_v1, %v5170_v1  ;;  %v4985_v40 = vadd.f32 %v4984_v55, %v10002_v57  ;;  %v7022_v16 = vadd.f32 %v7021_v22, %v7020_v45 }
 0x66a   : > { %v4988_v25 = vpop.f32.mrf.mxu1  ;;  %v7023_v12 = vpop.f32.mrf.mxu0 }
 0x66b   : > { %6004 = vst.msk [vmem:[%s9787_s22 + $0x50] sm:$0xf] %vm5995_vm1, %v6718_v17  ;;  %v6721_v21 = vpack.c.bf16 %v4985_v40, %v4983_v23  ;;  %v5173_v60 = vadd.f32 %v7022_v16, %v10011_v14  ;;  %v4989_v0 = vadd.f32 %v4988_v25, %v9999_v33 }
 0x66c   : > { %v4990_v50 = vpop.f32.mrf.mxu1  ;;  %v7024_v44 = vpop.f32.mrf.mxu0 }
 0x66d   : > { %6007 = vst [vmem:[%s9787_s22 + $0x64] sm:$0xff] %v6721_v21  ;;  %v6722_v32 = vpack.c.bf16 %v5173_v60, %v5173_v60  ;;  %v4991_v38 = vadd.f32 %v4990_v50, %v10002_v57  ;;  %v7025_v7 = vadd.f32 %v7024_v44, %v7023_v12 }
 0x66e   : > { %v4992_v18 = vpop.f32.mrf.mxu1  ;;  %v7026_v47 = vpop.f32.mrf.mxu0 }
 0x66f   : > { %6008 = vst.msk [vmem:[%s9787_s22 + $0x6c] sm:$0xf] %vm5995_vm1, %v6722_v32  ;;  %v6725_v61 = vpack.c.bf16 %v4991_v38, %v4989_v0  ;;  %v5178_v49 = vadd.f32 %v7025_v7, %v10011_v14  ;;  %v4993_v3 = vadd.f32 %v4992_v18, %v9999_v33 }
 0x670   : > { %v4994_v24 = vpop.f32.mrf.mxu1  ;;  %v7027_v36 = vpop.f32.mrf.mxu0 }
 0x671   : > { %6011 = vst [vmem:[%s9787_s22 + $0x80] sm:$0xff] %v6725_v61  ;;  %v6726_v42 = vpack.c.bf16 %v5178_v49, %v5178_v49  ;;  %v4995_v15 = vadd.f32 %v4994_v24, %v10002_v57  ;;  %v7028_v54 = vadd.f32 %v7027_v36, %v7026_v47 }
 0x672   : > { %v4998_v39 = vpop.f32.mrf.mxu1  ;;  %v7029_v20 = vpop.f32.mrf.mxu0 }
 0x673   : > { %6012 = vst.msk [vmem:[%s9787_s22 + $0x88] sm:$0xf] %vm5995_vm1, %v6726_v42  ;;  %v6729_v56 = vpack.c.bf16 %v4995_v15, %v4993_v3  ;;  %v5181_v29 = vadd.f32 %v7028_v54, %v10011_v14  ;;  %v4999_v53 = vadd.f32 %v4998_v39, %v9999_v33 }
 0x674   : > { %v5000_v19 = vpop.f32.mrf.mxu1  ;;  %v7030_v10 = vpop.f32.mrf.mxu0 }
 0x675   : > { %6015 = vst [vmem:[%s9787_s22 + $0x9c] sm:$0xff] %v6729_v56  ;;  %v6730_v26 = vpack.c.bf16 %v5181_v29, %v5181_v29  ;;  %v5001_v8 = vadd.f32 %v5000_v19, %v10002_v57  ;;  %v7031_v41 = vadd.f32 %v7030_v10, %v7029_v20 }
 0x676   : > { %v5002_v43 = vpop.f32.mrf.mxu1  ;;  %v7032_v34 = vpop.f32.mrf.mxu0 }
 0x677   : > { %6016 = vst.msk [vmem:[%s9787_s22 + $0xa4] sm:$0xf] %vm5995_vm1, %v6730_v26  ;;  %v6733_v35 = vpack.c.bf16 %v5001_v8, %v4999_v53  ;;  %v5186_v13 = vadd.f32 %v7031_v41, %v10011_v14  ;;  %v5003_v62 = vadd.f32 %v5002_v43, %v9999_v33 }
 0x678   : > { %v5004_v28 = vpop.f32.mrf.mxu1  ;;  %v7033_v11 = vpop.f32.mrf.mxu0 }
 0x679   : > { %6019 = vst [vmem:[%s9787_s22 + $0xb8] sm:$0xff] %v6733_v35  ;;  %v6734_v37 = vpack.c.bf16 %v5186_v13, %v5186_v13  ;;  %v5005_v58 = vadd.f32 %v5004_v28, %v10002_v57  ;;  %v7034_v46 = vadd.f32 %v7033_v11, %v7032_v34 }
 0x67a   : > { %v5008_v30 = vpop.f32.mrf.mxu1  ;;  %v7035_v6 = vpop.f32.mrf.mxu0 }
 0x67b   : > { %6020 = vst.msk [vmem:[%s9787_s22 + $0xc0] sm:$0xf] %vm5995_vm1, %v6734_v37  ;;  %v6737_v9 = vpack.c.bf16 %v5005_v58, %v5003_v62  ;;  %v5189_v27 = vadd.f32 %v7034_v46, %v10011_v14  ;;  %v5009_v5 = vadd.f32 %v5008_v30, %v9999_v33 }
 0x67c   : > { %v5010_v2 = vpop.f32.mrf.mxu1  ;;  %v7036_v4 = vpop.f32.mrf.mxu0 }
 0x67d   : > { %6023 = vst [vmem:[%s9787_s22 + $0xd4] sm:$0xff] %v6737_v9  ;;  %v6738_v48 = vpack.c.bf16 %v5189_v27, %v5189_v27  ;;  %v5011_v52 = vadd.f32 %v5010_v2, %v10002_v57  ;;  %v7037_v63 = vadd.f32 %v7036_v4, %v7035_v6 }
 0x67e   : > { %v5012_v31 = vpop.f32.mrf.mxu1  ;;  %v7038_v51 = vpop.f32.mrf.mxu0 }
 0x67f   : > { %6024 = vst.msk [vmem:[%s9787_s22 + $0xdc] sm:$0xf] %vm5995_vm1, %v6738_v48  ;;  %v6741_v45 = vpack.c.bf16 %v5011_v52, %v5009_v5  ;;  %v5194_v59 = vadd.f32 %v7037_v63, %v10011_v14  ;;  %v5013_v17 = vadd.f32 %v5012_v31, %v9999_v33 }
 0x680   : > { %v5014_v1 = vpop.f32.mrf.mxu1  ;;  %v7039_v55 = vpop.f32.mrf.mxu0 }
 0x681   : > { %6027 = vst [vmem:[%s9787_s22 + $0xf0] sm:$0xff] %v6741_v45  ;;  %v6742_v22 = vpack.c.bf16 %v5194_v59, %v5194_v59  ;;  %v5015_v23 = vadd.f32 %v5014_v1, %v10002_v57  ;;  %v7040_v40 = vadd.f32 %v7039_v55, %v7038_v51 }
 0x682   : > { %v5018_v16 = vpop.f32.mrf.mxu1  ;;  %v7041_v25 = vpop.f32.mrf.mxu0 }
 0x683   : > { %6028 = vst.msk [vmem:[%s9787_s22 + $0xf8] sm:$0xf] %vm5995_vm1, %v6742_v22  ;;  %v6745_v12 = vpack.c.bf16 %v5015_v23, %v5013_v17  ;;  %v5197_v21 = vadd.f32 %v7040_v40, %v10011_v14  ;;  %v5019_v32 = vadd.f32 %v5018_v16, %v9999_v33 }
 0x684   : > { %v5020_v60 = vpop.f32.mrf.mxu1  ;;  %v7042_v50 = vpop.f32.mrf.mxu0 }
 0x685   : > { %6031 = vst [vmem:[%s9787_s22 + $0x10c] sm:$0xff] %v6745_v12  ;;  %v6746_v44 = vpack.c.bf16 %v5197_v21, %v5197_v21  ;;  %v5021_v0 = vadd.f32 %v5020_v60, %v10002_v57  ;;  %v7043_v38 = vadd.f32 %v7042_v50, %v7041_v25 }
 0x686   : > { %v5022_v7 = vpop.f32.mrf.mxu1  ;;  %v7044_v18 = vpop.f32.mrf.mxu0 }
 0x687   : > { %6032 = vst.msk [vmem:[%s9787_s22 + $0x114] sm:$0xf] %vm5995_vm1, %v6746_v44  ;;  %v6749_v47 = vpack.c.bf16 %v5021_v0, %v5019_v32  ;;  %v5202_v61 = vadd.f32 %v7043_v38, %v10011_v14  ;;  %v5023_v42 = vadd.f32 %v5022_v7, %v9999_v33 }
 0x688   : > { %v5024_v49 = vpop.f32.mrf.mxu1  ;;  %v7045_v24 = vpop.f32.mrf.mxu0 }
 0x689   : > { %6035 = vst [vmem:[%s9787_s22 + $0x128] sm:$0xff] %v6749_v47  ;;  %v6750_v36 = vpack.c.bf16 %v5202_v61, %v5202_v61  ;;  %v5025_v3 = vadd.f32 %v5024_v49, %v10002_v57  ;;  %v7046_v15 = vadd.f32 %v7045_v24, %v7044_v18 }
 0x68a   : > { %v5028_v54 = vpop.f32.mrf.mxu1  ;;  %v7047_v39 = vpop.f32.mrf.mxu0 }
 0x68b   : > { %6036 = vst.msk [vmem:[%s9787_s22 + $0x130] sm:$0xf] %vm5995_vm1, %v6750_v36  ;;  %v6753_v20 = vpack.c.bf16 %v5025_v3, %v5023_v42  ;;  %v5205_v56 = vadd.f32 %v7046_v15, %v10011_v14  ;;  %v5029_v26 = vadd.f32 %v5028_v54, %v9999_v33 }
 0x68c   : > { %v5030_v29 = vpop.f32.mrf.mxu1  ;;  %v7048_v19 = vpop.f32.mrf.mxu0 }
 0x68d   : > { %6039 = vst [vmem:[%s9787_s22 + $0x144] sm:$0xff] %v6753_v20  ;;  %v6754_v10 = vpack.c.bf16 %v5205_v56, %v5205_v56  ;;  %v5031_v53 = vadd.f32 %v5030_v29, %v10002_v57  ;;  %v7049_v8 = vadd.f32 %v7048_v19, %v7047_v39 }
 0x68e   : > { %v5032_v41 = vpop.f32.mrf.mxu1  ;;  %v7050_v43 = vpop.f32.mrf.mxu0 }
 0x68f   : > { %6040 = vst.msk [vmem:[%s9787_s22 + $0x14c] sm:$0xf] %vm5995_vm1, %v6754_v10  ;;  %v6757_v34 = vpack.c.bf16 %v5031_v53, %v5029_v26  ;;  %v5210_v35 = vadd.f32 %v7049_v8, %v10011_v14  ;;  %v5033_v37 = vadd.f32 %v5032_v41, %v9999_v33 }
 0x690   : > { %v5034_v13 = vpop.f32.mrf.mxu1  ;;  %v7051_v28 = vpop.f32.mrf.mxu0 }
 0x691   : > { %6043 = vst [vmem:[%s9787_s22 + $0x160] sm:$0xff] %v6757_v34  ;;  %v6758_v11 = vpack.c.bf16 %v5210_v35, %v5210_v35  ;;  %v5035_v62 = vadd.f32 %v5034_v13, %v10002_v57  ;;  %v7052_v58 = vadd.f32 %v7051_v28, %v7050_v43 }
 0x692   : > { %v5038_v46 = vpop.f32.mrf.mxu1  ;;  %v7053_v30 = vpop.f32.mrf.mxu0 }
 0x693   : > { %6044 = vst.msk [vmem:[%s9787_s22 + $0x168] sm:$0xf] %vm5995_vm1, %v6758_v11  ;;  %v6761_v6 = vpack.c.bf16 %v5035_v62, %v5033_v37  ;;  %v5213_v9 = vadd.f32 %v7052_v58, %v10011_v14  ;;  %v5039_v48 = vadd.f32 %v5038_v46, %v9999_v33 }
 0x694   : > { %v5040_v27 = vpop.f32.mrf.mxu1  ;;  %v7054_v2 = vpop.f32.mrf.mxu0 }
 0x695   : > { %6047 = vst [vmem:[%s9787_s22 + $0x17c] sm:$0xff] %v6761_v6  ;;  %v6762_v4 = vpack.c.bf16 %v5213_v9, %v5213_v9  ;;  %v5041_v5 = vadd.f32 %v5040_v27, %v10002_v57  ;;  %v7055_v52 = vadd.f32 %v7054_v2, %v7053_v30 }
 0x696   : > { %v5042_v63 = vpop.f32.mrf.mxu1  ;;  %v7056_v31 = vpop.f32.mrf.mxu0 }
 0x697   : > { %6048 = vst.msk [vmem:[%s9787_s22 + $0x184] sm:$0xf] %vm5995_vm1, %v6762_v4  ;;  %v6765_v51 = vpack.c.bf16 %v5041_v5, %v5039_v48  ;;  %v5218_v45 = vadd.f32 %v7055_v52, %v10011_v14  ;;  %v5043_v22 = vadd.f32 %v5042_v63, %v9999_v33 }
 0x698   : > { %v5044_v59 = vpop.f32.mrf.mxu1  ;;  %v7057_v1 = vpop.f32.mrf.mxu0 }
 0x699   : > { %6051 = vst [vmem:[%s9787_s22 + $0x198] sm:$0xff] %v6765_v51  ;;  %v6766_v55 = vpack.c.bf16 %v5218_v45, %v5218_v45  ;;  %v5045_v17 = vadd.f32 %v5044_v59, %v10002_v57  ;;  %v7058_v23 = vadd.f32 %v7057_v1, %v7056_v31 }
 0x69a   : > { %v5048_v40 = vpop.f32.mrf.mxu1  ;;  %v7059_v16 = vpop.f32.mrf.mxu0 }
 0x69b   : > { %6052 = vst.msk [vmem:[%s9787_s22 + $0x1a0] sm:$0xf] %vm5995_vm1, %v6766_v55  ;;  %v6769_v25 = vpack.c.bf16 %v5045_v17, %v5043_v22  ;;  %v5221_v12 = vadd.f32 %v7058_v23, %v10011_v14  ;;  %v5049_v44 = vadd.f32 %v5048_v40, %v9999_v33 }
 0x69c   : > { %v5050_v21 = vpop.f32.mrf.mxu1  ;;  %v7060_v60 = vpop.f32.mrf.mxu0 }
 0x69d   : > { %6055 = vst [vmem:[%s9787_s22 + $0x1b4] sm:$0xff] %v6769_v25  ;;  %v6770_v50 = vpack.c.bf16 %v5221_v12, %v5221_v12  ;;  %v5051_v32 = vadd.f32 %v5050_v21, %v10002_v57  ;;  %v7061_v0 = vadd.f32 %v7060_v60, %v7059_v16 }
 0x69e   : > { %v5052_v38 = vpop.f32.mrf.mxu1  ;;  %v7062_v7 = vpop.f32.mrf.mxu0 }
 0x69f   : > { %6056 = vst.msk [vmem:[%s9787_s22 + $0x1bc] sm:$0xf] %vm5995_vm1, %v6770_v50  ;;  %v6773_v18 = vpack.c.bf16 %v5051_v32, %v5049_v44  ;;  %v5226_v47 = vadd.f32 %v7061_v0, %v10011_v14  ;;  %v5053_v36 = vadd.f32 %v5052_v38, %v9999_v33 }
 0x6a0   : > { %v5054_v61 = vpop.f32.mrf.mxu1  ;;  %v7063_v49 = vpop.f32.mrf.mxu0 }
 0x6a1   : > { %6059 = vst [vmem:[%s9787_s22 + $0x1d0] sm:$0xff] %v6773_v18  ;;  %v6774_v24 = vpack.c.bf16 %v5226_v47, %v5226_v47  ;;  %v5055_v42 = vadd.f32 %v5054_v61, %v10002_v57  ;;  %v7064_v3 = vadd.f32 %v7063_v49, %v7062_v7 }
 0x6a2   : > { %v5058_v15 = vpop.f32.mrf.mxu1  ;;  %v7065_v54 = vpop.f32.mrf.mxu0 }
 0x6a3   : > { %6060 = vst.msk [vmem:[%s9787_s22 + $0x1d8] sm:$0xf] %vm5995_vm1, %v6774_v24  ;;  %v6777_v39 = vpack.c.bf16 %v5055_v42, %v5053_v36  ;;  %v5229_v20 = vadd.f32 %v7064_v3, %v10011_v14  ;;  %v5059_v10 = vadd.f32 %v5058_v15, %v9999_v33 }
 0x6a4   : > { %v5060_v56 = vpop.f32.mrf.mxu1  ;;  %v7066_v29 = vpop.f32.mrf.mxu0 }
 0x6a5   : > { %6063 = vst [vmem:[%s9787_s22 + $0x1ec] sm:$0xff] %v6777_v39  ;;  %v6778_v19 = vpack.c.bf16 %v5229_v20, %v5229_v20  ;;  %v5061_v26 = vadd.f32 %v5060_v56, %v10002_v57  ;;  %v7067_v53 = vadd.f32 %v7066_v29, %v7065_v54 }
 0x6a6   : > { %v5062_v8 = vpop.f32.mrf.mxu1  ;;  %v7068_v41 = vpop.f32.mrf.mxu0 }
 0x6a7   : > { %6064 = vst.msk [vmem:[%s9787_s22 + $0x1f4] sm:$0xf] %vm5995_vm1, %v6778_v19  ;;  %v6781_v43 = vpack.c.bf16 %v5061_v26, %v5059_v10  ;;  %v5234_v34 = vadd.f32 %v7067_v53, %v10011_v14  ;;  %v5063_v11 = vadd.f32 %v5062_v8, %v9999_v33 }
 0x6a8   : > { %v5064_v35 = vpop.f32.mrf.mxu1  ;;  %v7069_v13 = vpop.f32.mrf.mxu0 }
 0x6a9   : > { %6067 = vst [vmem:[%s9787_s22 + $0x208] sm:$0xff] %v6781_v43  ;;  %v6782_v28 = vpack.c.bf16 %v5234_v34, %v5234_v34  ;;  %v5065_v37 = vadd.f32 %v5064_v35, %v10002_v57  ;;  %v7070_v62 = vadd.f32 %v7069_v13, %v7068_v41 }
 0x6aa   : > { %v5068_v58 = vpop.f32.mrf.mxu1  ;;  %v7071_v46 = vpop.f32.mrf.mxu0 }
 0x6ab   : > { %6068 = vst.msk [vmem:[%s9787_s22 + $0x210] sm:$0xf] %vm5995_vm1, %v6782_v28  ;;  %v6785_v30 = vpack.c.bf16 %v5065_v37, %v5063_v11  ;;  %v5237_v6 = vadd.f32 %v7070_v62, %v10011_v14  ;;  %v5069_v4 = vadd.f32 %v5068_v58, %v9999_v33 }
 0x6ac   : > { %v5070_v9 = vpop.f32.mrf.mxu1  ;;  %v7072_v27 = vpop.f32.mrf.mxu0 }
 0x6ad   : > { %6071 = vst [vmem:[%s9787_s22 + $0x224] sm:$0xff] %v6785_v30  ;;  %v6786_v2 = vpack.c.bf16 %v5237_v6, %v5237_v6  ;;  %v5071_v48 = vadd.f32 %v5070_v9, %v10002_v57  ;;  %v7073_v5 = vadd.f32 %v7072_v27, %v7071_v46 }
 0x6ae   : > { %v5072_v52 = vpop.f32.mrf.mxu1  ;;  %v7074_v63 = vpop.f32.mrf.mxu0 }
 0x6af   : > { %6072 = vst.msk [vmem:[%s9787_s22 + $0x22c] sm:$0xf] %vm5995_vm1, %v6786_v2  ;;  %v6789_v31 = vpack.c.bf16 %v5071_v48, %v5069_v4  ;;  %v5242_v51 = vadd.f32 %v7073_v5, %v10011_v14  ;;  %v5073_v55 = vadd.f32 %v5072_v52, %v9999_v33 }
 0x6b0   : > { %v5074_v45 = vpop.f32.mrf.mxu1  ;;  %v7075_v59 = vpop.f32.mrf.mxu0 }
 0x6b1   : > { %6075 = vst [vmem:[%s9787_s22 + $0x240] sm:$0xff] %v6789_v31  ;;  %v6790_v1 = vpack.c.bf16 %v5242_v51, %v5242_v51  ;;  %v5075_v22 = vadd.f32 %v5074_v45, %v10002_v57  ;;  %v7076_v17 = vadd.f32 %v7075_v59, %v7074_v63 }
 0x6b2   : > { %v5078_v23 = vpop.f32.mrf.mxu1  ;;  %v7077_v40 = vpop.f32.mrf.mxu0 }
 0x6b3   : > { %6076 = vst.msk [vmem:[%s9787_s22 + $0x248] sm:$0xf] %vm5995_vm1, %v6790_v1  ;;  %v6793_v16 = vpack.c.bf16 %v5075_v22, %v5073_v55  ;;  %v5245_v25 = vadd.f32 %v7076_v17, %v10011_v14  ;;  %v5079_v50 = vadd.f32 %v5078_v23, %v9999_v33 }
 0x6b4   : > { %v5080_v12 = vpop.f32.mrf.mxu1  ;;  %v7078_v21 = vpop.f32.mrf.mxu0 }
 0x6b5   : > { %6079 = vst [vmem:[%s9787_s22 + $0x25c] sm:$0xff] %v6793_v16  ;;  %v6794_v60 = vpack.c.bf16 %v5245_v25, %v5245_v25  ;;  %v5081_v44 = vadd.f32 %v5080_v12, %v10002_v57  ;;  %v7079_v32 = vadd.f32 %v7078_v21, %v7077_v40 }
 0x6b6   : > { %v5082_v0 = vpop.f32.mrf.mxu1  ;;  %v7080_v38 = vpop.f32.mrf.mxu0 }
 0x6b7   : > { %6080 = vst.msk [vmem:[%s9787_s22 + $0x264] sm:$0xf] %vm5995_vm1, %v6794_v60  ;;  %v6797_v7 = vpack.c.bf16 %v5081_v44, %v5079_v50  ;;  %v5250_v18 = vadd.f32 %v7079_v32, %v10011_v14  ;;  %v5083_v24 = vadd.f32 %v5082_v0, %v9999_v33 }
 0x6b8   : > { %v5084_v47 = vpop.f32.mrf.mxu1  ;;  %v7081_v61 = vpop.f32.mrf.mxu0 }
 0x6b9   : > { %6083 = vst [vmem:[%s9787_s22 + $0x278] sm:$0xff] %v6797_v7  ;;  %v6798_v49 = vpack.c.bf16 %v5250_v18, %v5250_v18  ;;  %v5085_v36 = vadd.f32 %v5084_v47, %v10002_v57  ;;  %v7082_v42 = vadd.f32 %v7081_v61, %v7080_v38 }
 0x6ba   : > { %v5088_v3 = vpop.f32.mrf.mxu1  ;;  %v7083_v15 = vpop.f32.mrf.mxu0 }
 0x6bb   : > { %6084 = vst.msk [vmem:[%s9787_s22 + $0x280] sm:$0xf] %vm5995_vm1, %v6798_v49  ;;  %v6801_v54 = vpack.c.bf16 %v5085_v36, %v5083_v24  ;;  %v5253_v39 = vadd.f32 %v7082_v42, %v10011_v14  ;;  %v5089_v19 = vadd.f32 %v5088_v3, %v9999_v33 }
 0x6bc   : > { %v5090_v20 = vpop.f32.mrf.mxu1  ;;  %v7084_v56 = vpop.f32.mrf.mxu0 }
 0x6bd   : > { %6087 = vst [vmem:[%s9787_s22 + $0x294] sm:$0xff] %v6801_v54  ;;  %v6802_v29 = vpack.c.bf16 %v5253_v39, %v5253_v39  ;;  %v5091_v10 = vadd.f32 %v5090_v20, %v10002_v57  ;;  %v7085_v26 = vadd.f32 %v7084_v56, %v7083_v15 }
 0x6be   : > { %v5092_v53 = vpop.f32.mrf.mxu1  ;;  %v7086_v8 = vpop.f32.mrf.mxu0 }
 0x6bf   : > { %6088 = vst.msk [vmem:[%s9787_s22 + $0x29c] sm:$0xf] %vm5995_vm1, %v6802_v29  ;;  %v6805_v41 = vpack.c.bf16 %v5091_v10, %v5089_v19  ;;  %v5258_v43 = vadd.f32 %v7085_v26, %v10011_v14  ;;  %v5093_v28 = vadd.f32 %v5092_v53, %v9999_v33 }
 0x6c0   : > { %v5094_v34 = vpop.f32.mrf.mxu1  ;;  %v7087_v35 = vpop.f32.mrf.mxu0 }
 0x6c1   : > { %6091 = vst [vmem:[%s9787_s22 + $0x2b0] sm:$0xff] %v6805_v41  ;;  %v6806_v13 = vpack.c.bf16 %v5258_v43, %v5258_v43  ;;  %v5095_v11 = vadd.f32 %v5094_v34, %v10002_v57  ;;  %v7088_v37 = vadd.f32 %v7087_v35, %v7086_v8 }
 0x6c2   : > { %v5098_v62 = vpop.f32.mrf.mxu1  ;;  %v7089_v58 = vpop.f32.mrf.mxu0 }
 0x6c3   : > { %6092 = vst.msk [vmem:[%s9787_s22 + $0x2b8] sm:$0xf] %vm5995_vm1, %v6806_v13  ;;  %v6809_v46 = vpack.c.bf16 %v5095_v11, %v5093_v28  ;;  %v5261_v30 = vadd.f32 %v7088_v37, %v10011_v14  ;;  %v5099_v2 = vadd.f32 %v5098_v62, %v9999_v33 }
 0x6c4   : > { %v5100_v6 = vpop.f32.mrf.mxu1  ;;  %v7090_v9 = vpop.f32.mrf.mxu0 }
 0x6c5   : > { %6095 = vst [vmem:[%s9787_s22 + $0x2cc] sm:$0xff] %v6809_v46  ;;  %v6810_v27 = vpack.c.bf16 %v5261_v30, %v5261_v30  ;;  %v5101_v4 = vadd.f32 %v5100_v6, %v10002_v57  ;;  %v7091_v48 = vadd.f32 %v7090_v9, %v7089_v58 }
 0x6c6   : > { %v5102_v5 = vpop.f32.mrf.mxu1  ;;  %v7092_v52 = vpop.f32.mrf.mxu0 }
 0x6c7   : > { %6096 = vst.msk [vmem:[%s9787_s22 + $0x2d4] sm:$0xf] %vm5995_vm1, %v6810_v27  ;;  %v6813_v63 = vpack.c.bf16 %v5101_v4, %v5099_v2  ;;  %v5266_v31 = vadd.f32 %v7091_v48, %v10011_v14  ;;  %v5103_v1 = vadd.f32 %v5102_v5, %v9999_v33 }
 0x6c8   : > { %v5104_v51 = vpop.f32.mrf.mxu1  ;;  %v7093_v45 = vpop.f32.mrf.mxu0 }
 0x6c9   : > { %6099 = vst [vmem:[%s9787_s22 + $0x2e8] sm:$0xff] %v6813_v63  ;;  %v6814_v59 = vpack.c.bf16 %v5266_v31, %v5266_v31  ;;  %v5105_v55 = vadd.f32 %v5104_v51, %v10002_v57  ;;  %v7094_v22 = vadd.f32 %v7093_v45, %v7092_v52 }
 0x6ca   : > { %v5108_v17 = vpop.f32.mrf.mxu1  ;;  %v7095_v23 = vpop.f32.mrf.mxu0 }
 0x6cb   : > { %6100 = vst.msk [vmem:[%s9787_s22 + $0x2f0] sm:$0xf] %vm5995_vm1, %v6814_v59  ;;  %v6817_v40 = vpack.c.bf16 %v5105_v55, %v5103_v1  ;;  %v5269_v16 = vadd.f32 %v7094_v22, %v10011_v14  ;;  %v5109_v60 = vadd.f32 %v5108_v17, %v9999_v33 }
 0x6cc   : > { %v5110_v25 = vpop.f32.mrf.mxu1  ;;  %v7096_v12 = vpop.f32.mrf.mxu0 }
 0x6cd   : > { %6103 = vst [vmem:[%s9787_s22 + $0x304] sm:$0xff] %v6817_v40  ;;  %v6818_v21 = vpack.c.bf16 %v5269_v16, %v5269_v16  ;;  %v5111_v50 = vadd.f32 %v5110_v25, %v10002_v57  ;;  %v7097_v44 = vadd.f32 %v7096_v12, %v7095_v23 }
 0x6ce   : > { %v5112_v32 = vpop.f32.mrf.mxu1  ;;  %v7098_v0 = vpop.f32.mrf.mxu0 }
 0x6cf   : > { %6104 = vst.msk [vmem:[%s9787_s22 + $0x30c] sm:$0xf] %vm5995_vm1, %v6818_v21  ;;  %v6821_v38 = vpack.c.bf16 %v5111_v50, %v5109_v60  ;;  %v5274_v7 = vadd.f32 %v7097_v44, %v10011_v14  ;;  %v5113_v49 = vadd.f32 %v5112_v32, %v9999_v33 }
 0x6d0   : > { %v5114_v18 = vpop.f32.mrf.mxu1  ;;  %v7099_v47 = vpop.f32.mrf.mxu0 }
 0x6d1   : > { %6107 = vst [vmem:[%s9787_s22 + $0x320] sm:$0xff] %v6821_v38  ;;  %v6822_v61 = vpack.c.bf16 %v5274_v7, %v5274_v7  ;;  %v5115_v24 = vadd.f32 %v5114_v18, %v10002_v57  ;;  %v7100_v36 = vadd.f32 %v7099_v47, %v7098_v0 }
 0x6d2   : > { %v5118_v42 = vpop.f32.mrf.mxu1  ;;  %v7101_v3 = vpop.f32.mrf.mxu0 }
 0x6d3   : > { %6108 = vst.msk [vmem:[%s9787_s22 + $0x328] sm:$0xf] %vm5995_vm1, %v6822_v61  ;;  %v6825_v15 = vpack.c.bf16 %v5115_v24, %v5113_v49  ;;  %v5277_v54 = vadd.f32 %v7100_v36, %v10011_v14  ;;  %v5119_v29 = vadd.f32 %v5118_v42, %v9999_v33 }
 0x6d4   : > { %v5120_v39 = vpop.f32.mrf.mxu1  ;;  %v7102_v20 = vpop.f32.mrf.mxu0 }
 0x6d5   : > { %6111 = vst [vmem:[%s9787_s22 + $0x33c] sm:$0xff] %v6825_v15  ;;  %v6826_v56 = vpack.c.bf16 %v5277_v54, %v5277_v54  ;;  %v5121_v19 = vadd.f32 %v5120_v39, %v10002_v57  ;;  %v7103_v10 = vadd.f32 %v7102_v20, %v7101_v3 }
 0x6d6   : > { %v5122_v26 = vpop.f32.mrf.mxu1  ;;  %v7104_v53 = vpop.f32.mrf.mxu0 }
 0x6d7   : > { %6112 = vst.msk [vmem:[%s9787_s22 + $0x344] sm:$0xf] %vm5995_vm1, %v6826_v56  ;;  %v6829_v8 = vpack.c.bf16 %v5121_v19, %v5119_v29  ;;  %v5282_v41 = vadd.f32 %v7103_v10, %v10011_v14  ;;  %v5123_v13 = vadd.f32 %v5122_v26, %v9999_v33 }
 0x6d8   : > { %v5124_v43 = vpop.f32.mrf.mxu1  ;;  %v7105_v34 = vpop.f32.mrf.mxu0 }
 0x6d9   : > { %6115 = vst [vmem:[%s9787_s22 + $0x358] sm:$0xff] %v6829_v8  ;;  %v6830_v35 = vpack.c.bf16 %v5282_v41, %v5282_v41  ;;  %v5125_v28 = vadd.f32 %v5124_v43, %v10002_v57  ;;  %v7106_v11 = vadd.f32 %v7105_v34, %v7104_v53 }
 0x6db   : > { %6116 = vst.msk [vmem:[%s9787_s22 + $0x360] sm:$0xf] %vm5995_vm1, %v6830_v35  ;;  %v6833_v37 = vpack.c.bf16 %v5125_v28, %v5123_v13  ;;  %v5285_v62 = vadd.f32 %v7106_v11, %v10011_v14 }
 0x6dd   : > { %6119 = vst [vmem:[%s9787_s22 + $0x374] sm:$0xff] %v6833_v37  ;;  %v6834_v58 = vpack.c.bf16 %v5285_v62, %v5285_v62 }
 0x6df   : > { %6120 = vst.msk [vmem:[%s9787_s22 + $0x37c] sm:$0xf] %vm5995_vm1, %v6834_v58 }
 0x6e0 PF: > { %s18_s27 = sadd.s32 1, %s7774_s27  }
 0x6e1   : > { %p15_p4 = scmp.ge.s32.totalorder %s18_s27, 6  }
 0x6e3   :  { %17 = sbr.rel (!%p15_p4) target bundleno = 1 (0x1), region = 84 }

</bundles_post_ra>
